<compile_context>
chip_gen: v7x
topology: tpu7x:2x2x1
jax: 0.10.0
libtpu: 0.0.40
codegen_flags: <defaults>
</compile_context>

<pallas_src>
import functools

import jax
import jax.numpy as jnp
from jax.experimental import pallas as pl
from jax.experimental.pallas import tpu as pltpu

LANE = 128  # TPU vreg lane width


# ----------------------------- Pallas kernel ---------------------------------

def _basic_block_kernel(H, W, Cp,
                        x_ref, w1_ref, w2_ref, bn_ref,
                        out_ref, y1pad_ref):
    """Fused conv1 -> bn1 -> relu -> conv2 -> bn2 -> +residual -> relu for ONE image.

    x_ref    : (1, H+2, W+2, Cp) f32   zero-padded (spatial + channel) input tile
    w1_ref   : (3, 3*Cp, Cp)     bf16  conv1 weights, dw taps stacked along K
    w2_ref   : (3, 3*Cp, Cp)     bf16  conv2 weights, dw taps stacked along K
    bn_ref   : (8, Cp)           f32   rows: s1, b1, s2, b2, 0, 0, 0, 0
    out_ref  : (1, H, W, Cp)     f32
    y1pad_ref: (H+2, W+2, Cp)    bf16  scratch: padded relu(bn1(conv1(x)))
    """
    bn = bn_ref[...]
    s1, b1 = bn[0:1, :], bn[1:2, :]
    s2, b2 = bn[2:3, :], bn[3:4, :]

    def conv3x3(band_getter, w_ref):
        # Per dh: one (H*W, 3*Cp) x (3*Cp, Cp) bf16 matmul (K = 3*Cp fills the MXU
        # better than K = Cp) -> only 3 accumulator updates per conv instead of 9.
        acc = None
        for dh in range(3):
            band = band_getter(dh)                         # (H, W+2, Cp) bf16
            slab = jnp.concatenate(
                [band[:, 0:W, :], band[:, 1:W + 1, :], band[:, 2:W + 2, :]],
                axis=-1).reshape(H * W, 3 * Cp)
            contrib = jnp.dot(slab, w_ref[dh],
                              preferred_element_type=jnp.float32)
            acc = contrib if acc is None else acc + contrib
        return acc                                         # (H*W, Cp) f32

    # ---- conv1 (bf16 operands, f32 accumulate) + bn1 + relu -----------------
    acc1 = conv3x3(lambda dh: x_ref[0, dh:dh + H, :, :].astype(jnp.bfloat16),
                   w1_ref)
    y1 = jnp.maximum(acc1 * s1 + b1, 0.0).reshape(H, W, Cp).astype(jnp.bfloat16)

    # ---- stage y1 with a halo in bf16 VMEM scratch ---------------------------
    # Left/right halo columns are folded into the interior store via an in-register
    # concat; only the top/bottom halo rows need explicit zeroing.  Done every grid
    # step so the kernel stays correct when the batch axis is split across cores
    # (each TensorCore has its own scratch instance).
    zrow = jnp.zeros((1, W + 2, Cp), jnp.bfloat16)
    zcol = jnp.zeros((H, 1, Cp), jnp.bfloat16)
    y1pad_ref[0:1, :, :] = zrow
    y1pad_ref[H + 1:H + 2, :, :] = zrow
    y1pad_ref[1:H + 1, :, :] = jnp.concatenate([zcol, y1, zcol], axis=1)

    # ---- conv2 + bn2 + residual + relu --------------------------------------
    acc2 = conv3x3(lambda dh: y1pad_ref[dh:dh + H, :, :], w2_ref)
    # Residual read from the interior of the SAME f32 input tile already in VMEM.
    res = x_ref[0, 1:H + 1, 1:W + 1, :].reshape(H * W, Cp)
    out = jnp.maximum(acc2 * s2 + b2 + res, 0.0)
    out_ref[...] = out.reshape(1, H, W, Cp)


# -------------------------------- wrapper -------------------------------------

@jax.jit
def basic_block_forward(x_nchw, w1_hwio, w2_hwio, s1, b1, s2, b2):
    """x_nchw: (B, C, H, W) float32 (PyTorch layout). Returns NCHW output."""
    x = jnp.transpose(x_nchw, (0, 2, 3, 1)).astype(jnp.float32)  # NHWC
    B, H, W, Ci = x.shape
    Co = w1_hwio.shape[-1]
    assert Ci == Co, "identity residual requires inplanes == planes"

    # Pad channels up to the 128-lane width (lane-dense loads/stores, full-N MXU).
    Cp = -(-max(Ci, LANE) // LANE) * LANE

    # Single padded input (f32, residual needs full precision): spatial halo + channel pad.
    xpad = jnp.pad(x, ((0, 0), (1, 1), (1, 1), (0, Cp - Ci)))

    def prep_w(w_hwio, cin):
        # (3,3,Ci,Co) -> channel-pad -> (3, 3*Cp, Cp) with the three dw taps stacked
        # along K (matches the kernel's channel-axis concat of dw-shifted windows),
        # stored as bf16 so weights arrive in VMEM at half size.
        wp = jnp.pad(w_hwio.astype(jnp.float32),
                     ((0, 0), (0, 0), (0, Cp - cin), (0, Cp - Co)))
        return wp.reshape(3, 3 * Cp, Cp).astype(jnp.bfloat16)

    w1p = prep_w(w1_hwio, Ci)
    w2p = prep_w(w2_hwio, Co)

    # Fused BN parameters in one (8, Cp) tile: rows = s1, b1, s2, b2, then zeros.
    bn = jnp.zeros((8, Cp), jnp.float32)
    bn = bn.at[0, :Co].set(s1.astype(jnp.float32))
    bn = bn.at[1, :Co].set(b1.astype(jnp.float32))
    bn = bn.at[2, :Co].set(s2.astype(jnp.float32))
    bn = bn.at[3, :Co].set(b2.astype(jnp.float32))

    kernel = functools.partial(_basic_block_kernel, H, W, Cp)

    out_padded = pl.pallas_call(
        kernel,
        out_shape=jax.ShapeDtypeStruct((B, H, W, Cp), jnp.float32),
        grid=(B,),
        in_specs=[
            pl.BlockSpec((1, H + 2, W + 2, Cp), lambda b: (b, 0, 0, 0)),  # padded x
            pl.BlockSpec((3, 3 * Cp, Cp), lambda b: (0, 0, 0)),           # w1 (bf16)
            pl.BlockSpec((3, 3 * Cp, Cp), lambda b: (0, 0, 0)),           # w2 (bf16)
            pl.BlockSpec((8, Cp), lambda b: (0, 0)),                      # bn params
        ],
        out_specs=pl.BlockSpec((1, H, W, Cp), lambda b: (b, 0, 0, 0)),
        scratch_shapes=[
            pltpu.VMEM((H + 2, W + 2, Cp), jnp.bfloat16),  # padded y1 (bf16)
        ],
        compiler_params=pltpu.CompilerParams(
            dimension_semantics=("parallel",),        # shard batch across TCs (v7x)
            vmem_limit_bytes=48 * 1024 * 1024,        # stay inside v7x's 64 MiB/TC
        ),
    )(xpad, w1p, w2p, bn)

    out_nhwc = out_padded[..., :Co]
    return jnp.transpose(out_nhwc, (0, 3, 1, 2))  # back to NCHW


# ------------------------ parameter setup (plain JAX glue) -------------------

def nm_prune_oihw(w_oihw, N=2, M=4):
    """N:M magnitude pruning along flattened (Ci*kh*kw), matching SparseConv."""
    Co = w_oihw.shape[0]
    wf = w_oihw.reshape(Co, -1)
    G = wf.shape[1] // M
    wg = wf.reshape(Co, G, M)
    order = jnp.argsort(jnp.abs(wg), axis=-1)          # ascending by magnitude
    ranks = jnp.argsort(order, axis=-1)
    mask = ranks >= (M - N)                            # keep top-N per group of M
    return jnp.where(mask, wg, 0.0).reshape(w_oihw.shape)


def oihw_to_hwio(w):
    return jnp.transpose(w, (2, 3, 1, 0))


def make_params(key, inplanes, planes, N=2, M=4):
    k1, k2, k3, k4 = jax.random.split(key, 4)
    fan1 = inplanes * 9
    fan2 = planes * 9
    w1 = jax.random.normal(k1, (planes, inplanes, 3, 3), jnp.float32) / jnp.sqrt(fan1)
    w2 = jax.random.normal(k2, (planes, planes, 3, 3), jnp.float32) / jnp.sqrt(fan2)
    w1 = nm_prune_oihw(w1, N, M)
    w2 = nm_prune_oihw(w2, N, M)

    eps = 1e-5
    g1 = 1.0 + 0.1 * jax.random.normal(k3, (planes,), jnp.float32)
    be1 = 0.1 * jax.random.normal(k4, (planes,), jnp.float32)
    mu1 = 0.05 * jnp.arange(planes, dtype=jnp.float32)
    var1 = 1.0 + 0.1 * jnp.arange(planes, dtype=jnp.float32)
    g2, be2 = be1 + 1.0, g1 - 1.0
    mu2, var2 = -mu1, var1 + 0.25

    s1 = g1 / jnp.sqrt(var1 + eps)
    b1 = be1 - mu1 * s1
    s2 = g2 / jnp.sqrt(var2 + eps)
    b2 = be2 - mu2 * s2
    return oihw_to_hwio(w1), oihw_to_hwio(w2), s1, b1, s2, b2


# ------------------------------- reference -----------------------------------

def ref_forward(x_nchw, w1, w2, s1, b1, s2, b2):
    x = jnp.transpose(x_nchw, (0, 2, 3, 1))
    dn = ('NHWC', 'HWIO', 'NHWC')
    hi = jax.lax.Precision.HIGHEST
    y1 = jax.lax.conv_general_dilated(x, w1, (1, 1), 'SAME',
                                      dimension_numbers=dn, precision=hi)
    y1 = jnp.maximum(y1 * s1 + b1, 0.0)
    y2 = jax.lax.conv_general_dilated(y1, w2, (1, 1), 'SAME',
                                      dimension_numbers=dn, precision=hi)
    y2 = y2 * s2 + b2
    out = jnp.maximum(y2 + x, 0.0)
    return jnp.transpose(out, (0, 3, 1, 2))


# --------------------------------- main ---------------------------------------

if __name__ == "__main__":
    key = jax.random.PRNGKey(0)
    kx, kp = jax.random.split(key)

    B, C, H, W = 2, 4, 16, 16          # inplanes == planes == 4, stride=1, no downsample
    x = jax.random.normal(kx, (B, C, H, W), jnp.float32)
    w1, w2, s1, b1, s2, b2 = make_params(kp, inplanes=C, planes=C, N=2, M=4)

    out = jax.block_until_ready(basic_block_forward(x, w1, w2, s1, b1, s2, b2))
    ref = jax.block_until_ready(ref_forward(x, w1, w2, s1, b1, s2, b2))

    assert out.shape == (B, C, H, W)
    # Kernel uses bf16 MXU operands (f32 accumulate); tolerance set accordingly.
    assert jnp.allclose(out, ref, atol=3e-2, rtol=3e-2), "mismatch vs reference"

    print("KERNEL_OK")
</pallas_src>

<mosaic_0001>
module attributes {stable_mosaic.version = 11 : i64} {
  func.func @_basic_block_kernel(%arg0: i32, %arg1: memref<1x18x18x128xf32, #tpu.memory_space<vmem>>, %arg2: memref<3x384x128xbf16, #tpu.memory_space<vmem>>, %arg3: memref<3x384x128xbf16, #tpu.memory_space<vmem>>, %arg4: memref<8x128xf32, #tpu.memory_space<vmem>>, %arg5: memref<1x16x16x128xf32, #tpu.memory_space<vmem>>, %arg6: memref<18x18x128xbf16, #tpu.memory_space<vmem>>) attributes {dimension_semantics = [#tpu.dimension_semantics<parallel>], iteration_bounds = array<i64: 2>, scalar_prefetch = 0 : i64, scratch_operands = 1 : i64, tpu.core_type = #tpu.core_type<tc>, window_params = [{transform_indices = @transform_0, window_bounds = array<i64: 1, 18, 18, 128>}, {pipeline_mode = #tpu.pipeline_mode<synchronous>, transform_indices = @transform_1, window_bounds = array<i64: 3, 384, 128>}, {pipeline_mode = #tpu.pipeline_mode<synchronous>, transform_indices = @transform_2, window_bounds = array<i64: 3, 384, 128>}, {pipeline_mode = #tpu.pipeline_mode<synchronous>, transform_indices = @transform_3, window_bounds = array<i64: 8, 128>}, {transform_indices = @transform_4, window_bounds = array<i64: 1, 16, 16, 128>}]} {
    %c0 = arith.constant 0 : index
    %c0_0 = arith.constant 0 : index
    %0 = vector.load %arg4[%c0, %c0_0] : memref<8x128xf32, #tpu.memory_space<vmem>>, vector<8x128xf32>
    %1 = vector.extract_strided_slice %0 {offsets = [0, 0], sizes = [1, 128], strides = [1, 1]} : vector<8x128xf32> to vector<1x128xf32>
    %2 = vector.extract_strided_slice %0 {offsets = [1, 0], sizes = [1, 128], strides = [1, 1]} : vector<8x128xf32> to vector<1x128xf32>
    %3 = vector.extract_strided_slice %0 {offsets = [2, 0], sizes = [1, 128], strides = [1, 1]} : vector<8x128xf32> to vector<1x128xf32>
    %4 = vector.extract_strided_slice %0 {offsets = [3, 0], sizes = [1, 128], strides = [1, 1]} : vector<8x128xf32> to vector<1x128xf32>
    %c0_1 = arith.constant 0 : index
    %c0_2 = arith.constant 0 : index
    %c0_3 = arith.constant 0 : index
    %c0_4 = arith.constant 0 : index
    %5 = vector.load %arg1[%c0_1, %c0_2, %c0_3, %c0_4] : memref<1x18x18x128xf32, #tpu.memory_space<vmem>>, vector<1x16x18x128xf32>
    %6 = vector.shape_cast %5 : vector<1x16x18x128xf32> to vector<16x18x128xf32>
    %7 = arith.truncf %6 : vector<16x18x128xf32> to vector<16x18x128xbf16>
    %8 = vector.extract_strided_slice %7 {offsets = [0, 0, 0], sizes = [16, 16, 128], strides = [1, 1, 1]} : vector<16x18x128xbf16> to vector<16x16x128xbf16>
    %9 = vector.extract_strided_slice %7 {offsets = [0, 1, 0], sizes = [16, 16, 128], strides = [1, 1, 1]} : vector<16x18x128xbf16> to vector<16x16x128xbf16>
    %10 = vector.extract_strided_slice %7 {offsets = [0, 2, 0], sizes = [16, 16, 128], strides = [1, 1, 1]} : vector<16x18x128xbf16> to vector<16x16x128xbf16>
    %11 = tpu.concatenate %8, %9, %10 in 2 : vector<16x16x128xbf16>, vector<16x16x128xbf16>, vector<16x16x128xbf16> -> vector<16x16x384xbf16>
    %12 = vector.shape_cast %11 : vector<16x16x384xbf16> to vector<256x384xbf16>
    %c0_5 = arith.constant 0 : index
    %c0_6 = arith.constant 0 : index
    %c0_7 = arith.constant 0 : index
    %13 = vector.load %arg2[%c0_5, %c0_6, %c0_7] : memref<3x384x128xbf16, #tpu.memory_space<vmem>>, vector<1x384x128xbf16>
    %14 = vector.shape_cast %13 : vector<1x384x128xbf16> to vector<384x128xbf16>
    %cst = arith.constant dense<0.000000e+00> : vector<256x128xf32>
    %15 = tpu.matmul %12, %14, %cst {dimension_numbers = #tpu.dot_dimension_numbers<[1], [0], [0], [1], [0, 0, 1, 1], [], []>} : vector<256x384xbf16>, vector<384x128xbf16>, vector<256x128xf32> -> vector<256x128xf32>
    %c0_8 = arith.constant 0 : index
    %c1 = arith.constant 1 : index
    %c0_9 = arith.constant 0 : index
    %c0_10 = arith.constant 0 : index
    %16 = vector.load %arg1[%c0_8, %c1, %c0_9, %c0_10] : memref<1x18x18x128xf32, #tpu.memory_space<vmem>>, vector<1x16x18x128xf32>
    %17 = vector.shape_cast %16 : vector<1x16x18x128xf32> to vector<16x18x128xf32>
    %18 = arith.truncf %17 : vector<16x18x128xf32> to vector<16x18x128xbf16>
    %19 = vector.extract_strided_slice %18 {offsets = [0, 0, 0], sizes = [16, 16, 128], strides = [1, 1, 1]} : vector<16x18x128xbf16> to vector<16x16x128xbf16>
    %20 = vector.extract_strided_slice %18 {offsets = [0, 1, 0], sizes = [16, 16, 128], strides = [1, 1, 1]} : vector<16x18x128xbf16> to vector<16x16x128xbf16>
    %21 = vector.extract_strided_slice %18 {offsets = [0, 2, 0], sizes = [16, 16, 128], strides = [1, 1, 1]} : vector<16x18x128xbf16> to vector<16x16x128xbf16>
    %22 = tpu.concatenate %19, %20, %21 in 2 : vector<16x16x128xbf16>, vector<16x16x128xbf16>, vector<16x16x128xbf16> -> vector<16x16x384xbf16>
    %23 = vector.shape_cast %22 : vector<16x16x384xbf16> to vector<256x384xbf16>
    %c1_11 = arith.constant 1 : index
    %c0_12 = arith.constant 0 : index
    %c0_13 = arith.constant 0 : index
    %24 = vector.load %arg2[%c1_11, %c0_12, %c0_13] : memref<3x384x128xbf16, #tpu.memory_space<vmem>>, vector<1x384x128xbf16>
    %25 = vector.shape_cast %24 : vector<1x384x128xbf16> to vector<384x128xbf16>
    %cst_14 = arith.constant dense<0.000000e+00> : vector<256x128xf32>
    %26 = tpu.matmul %23, %25, %cst_14 {dimension_numbers = #tpu.dot_dimension_numbers<[1], [0], [0], [1], [0, 0, 1, 1], [], []>} : vector<256x384xbf16>, vector<384x128xbf16>, vector<256x128xf32> -> vector<256x128xf32>
    %27 = arith.addf %15, %26 : vector<256x128xf32>
    %c0_15 = arith.constant 0 : index
    %c2 = arith.constant 2 : index
    %c0_16 = arith.constant 0 : index
    %c0_17 = arith.constant 0 : index
    %28 = vector.load %arg1[%c0_15, %c2, %c0_16, %c0_17] : memref<1x18x18x128xf32, #tpu.memory_space<vmem>>, vector<1x16x18x128xf32>
    %29 = vector.shape_cast %28 : vector<1x16x18x128xf32> to vector<16x18x128xf32>
    %30 = arith.truncf %29 : vector<16x18x128xf32> to vector<16x18x128xbf16>
    %31 = vector.extract_strided_slice %30 {offsets = [0, 0, 0], sizes = [16, 16, 128], strides = [1, 1, 1]} : vector<16x18x128xbf16> to vector<16x16x128xbf16>
    %32 = vector.extract_strided_slice %30 {offsets = [0, 1, 0], sizes = [16, 16, 128], strides = [1, 1, 1]} : vector<16x18x128xbf16> to vector<16x16x128xbf16>
    %33 = vector.extract_strided_slice %30 {offsets = [0, 2, 0], sizes = [16, 16, 128], strides = [1, 1, 1]} : vector<16x18x128xbf16> to vector<16x16x128xbf16>
    %34 = tpu.concatenate %31, %32, %33 in 2 : vector<16x16x128xbf16>, vector<16x16x128xbf16>, vector<16x16x128xbf16> -> vector<16x16x384xbf16>
    %35 = vector.shape_cast %34 : vector<16x16x384xbf16> to vector<256x384xbf16>
    %c2_18 = arith.constant 2 : index
    %c0_19 = arith.constant 0 : index
    %c0_20 = arith.constant 0 : index
    %36 = vector.load %arg2[%c2_18, %c0_19, %c0_20] : memref<3x384x128xbf16, #tpu.memory_space<vmem>>, vector<1x384x128xbf16>
    %37 = vector.shape_cast %36 : vector<1x384x128xbf16> to vector<384x128xbf16>
    %cst_21 = arith.constant dense<0.000000e+00> : vector<256x128xf32>
    %38 = tpu.matmul %35, %37, %cst_21 {dimension_numbers = #tpu.dot_dimension_numbers<[1], [0], [0], [1], [0, 0, 1, 1], [], []>} : vector<256x384xbf16>, vector<384x128xbf16>, vector<256x128xf32> -> vector<256x128xf32>
    %39 = arith.addf %27, %38 : vector<256x128xf32>
    %40 = vector.broadcast %1 : vector<1x128xf32> to vector<256x128xf32>
    %41 = arith.mulf %39, %40 : vector<256x128xf32>
    %42 = vector.broadcast %2 : vector<1x128xf32> to vector<256x128xf32>
    %43 = arith.addf %41, %42 : vector<256x128xf32>
    %cst_22 = arith.constant 0.000000e+00 : f32
    %44 = vector.broadcast %cst_22 : f32 to vector<256x128xf32>
    %45 = arith.maximumf %43, %44 : vector<256x128xf32>
    %46 = vector.shape_cast %45 : vector<256x128xf32> to vector<16x16x128xf32>
    %47 = arith.truncf %46 : vector<16x16x128xf32> to vector<16x16x128xbf16>
    %cst_23 = arith.constant 0.000000e+00 : bf16
    %48 = vector.broadcast %cst_23 : bf16 to vector<1x18x128xbf16>
    %cst_24 = arith.constant 0.000000e+00 : bf16
    %49 = vector.broadcast %cst_24 : bf16 to vector<16x1x128xbf16>
    %c0_25 = arith.constant 0 : index
    %c0_26 = arith.constant 0 : index
    %c0_27 = arith.constant 0 : index
    %50 = vector.load %arg6[%c0_25, %c0_26, %c0_27] : memref<18x18x128xbf16, #tpu.memory_space<vmem>>, vector<1x18x128xbf16>
    tpu.vector_store %arg6[%c0_25, %c0_26, %c0_27], %48 {strides = array<i32>} : memref<18x18x128xbf16, #tpu.memory_space<vmem>>, vector<1x18x128xbf16>,
    %c17 = arith.constant 17 : index
    %c0_28 = arith.constant 0 : index
    %c0_29 = arith.constant 0 : index
    %51 = vector.load %arg6[%c17, %c0_28, %c0_29] : memref<18x18x128xbf16, #tpu.memory_space<vmem>>, vector<1x18x128xbf16>
    tpu.vector_store %arg6[%c17, %c0_28, %c0_29], %48 {strides = array<i32>} : memref<18x18x128xbf16, #tpu.memory_space<vmem>>, vector<1x18x128xbf16>,
    %52 = tpu.concatenate %49, %47, %49 in 1 : vector<16x1x128xbf16>, vector<16x16x128xbf16>, vector<16x1x128xbf16> -> vector<16x18x128xbf16>
    %c1_30 = arith.constant 1 : index
    %c0_31 = arith.constant 0 : index
    %c0_32 = arith.constant 0 : index
    %53 = vector.load %arg6[%c1_30, %c0_31, %c0_32] : memref<18x18x128xbf16, #tpu.memory_space<vmem>>, vector<16x18x128xbf16>
    tpu.vector_store %arg6[%c1_30, %c0_31, %c0_32], %52 {strides = array<i32>} : memref<18x18x128xbf16, #tpu.memory_space<vmem>>, vector<16x18x128xbf16>,
    %c0_33 = arith.constant 0 : index
    %c0_34 = arith.constant 0 : index
    %c0_35 = arith.constant 0 : index
    %54 = vector.load %arg6[%c0_33, %c0_34, %c0_35] : memref<18x18x128xbf16, #tpu.memory_space<vmem>>, vector<16x18x128xbf16>
    %55 = vector.extract_strided_slice %54 {offsets = [0, 0, 0], sizes = [16, 16, 128], strides = [1, 1, 1]} : vector<16x18x128xbf16> to vector<16x16x128xbf16>
    %56 = vector.extract_strided_slice %54 {offsets = [0, 1, 0], sizes = [16, 16, 128], strides = [1, 1, 1]} : vector<16x18x128xbf16> to vector<16x16x128xbf16>
    %57 = vector.extract_strided_slice %54 {offsets = [0, 2, 0], sizes = [16, 16, 128], strides = [1, 1, 1]} : vector<16x18x128xbf16> to vector<16x16x128xbf16>
    %58 = tpu.concatenate %55, %56, %57 in 2 : vector<16x16x128xbf16>, vector<16x16x128xbf16>, vector<16x16x128xbf16> -> vector<16x16x384xbf16>
    %59 = vector.shape_cast %58 : vector<16x16x384xbf16> to vector<256x384xbf16>
    %c0_36 = arith.constant 0 : index
    %c0_37 = arith.constant 0 : index
    %c0_38 = arith.constant 0 : index
    %60 = vector.load %arg3[%c0_36, %c0_37, %c0_38] : memref<3x384x128xbf16, #tpu.memory_space<vmem>>, vector<1x384x128xbf16>
    %61 = vector.shape_cast %60 : vector<1x384x128xbf16> to vector<384x128xbf16>
    %cst_39 = arith.constant dense<0.000000e+00> : vector<256x128xf32>
    %62 = tpu.matmul %59, %61, %cst_39 {dimension_numbers = #tpu.dot_dimension_numbers<[1], [0], [0], [1], [0, 0, 1, 1], [], []>} : vector<256x384xbf16>, vector<384x128xbf16>, vector<256x128xf32> -> vector<256x128xf32>
    %c1_40 = arith.constant 1 : index
    %c0_41 = arith.constant 0 : index
    %c0_42 = arith.constant 0 : index
    %63 = vector.load %arg6[%c1_40, %c0_41, %c0_42] : memref<18x18x128xbf16, #tpu.memory_space<vmem>>, vector<16x18x128xbf16>
    %64 = vector.extract_strided_slice %63 {offsets = [0, 0, 0], sizes = [16, 16, 128], strides = [1, 1, 1]} : vector<16x18x128xbf16> to vector<16x16x128xbf16>
    %65 = vector.extract_strided_slice %63 {offsets = [0, 1, 0], sizes = [16, 16, 128], strides = [1, 1, 1]} : vector<16x18x128xbf16> to vector<16x16x128xbf16>
    %66 = vector.extract_strided_slice %63 {offsets = [0, 2, 0], sizes = [16, 16, 128], strides = [1, 1, 1]} : vector<16x18x128xbf16> to vector<16x16x128xbf16>
    %67 = tpu.concatenate %64, %65, %66 in 2 : vector<16x16x128xbf16>, vector<16x16x128xbf16>, vector<16x16x128xbf16> -> vector<16x16x384xbf16>
    %68 = vector.shape_cast %67 : vector<16x16x384xbf16> to vector<256x384xbf16>
    %c1_43 = arith.constant 1 : index
    %c0_44 = arith.constant 0 : index
    %c0_45 = arith.constant 0 : index
    %69 = vector.load %arg3[%c1_43, %c0_44, %c0_45] : memref<3x384x128xbf16, #tpu.memory_space<vmem>>, vector<1x384x128xbf16>
    %70 = vector.shape_cast %69 : vector<1x384x128xbf16> to vector<384x128xbf16>
    %cst_46 = arith.constant dense<0.000000e+00> : vector<256x128xf32>
    %71 = tpu.matmul %68, %70, %cst_46 {dimension_numbers = #tpu.dot_dimension_numbers<[1], [0], [0], [1], [0, 0, 1, 1], [], []>} : vector<256x384xbf16>, vector<384x128xbf16>, vector<256x128xf32> -> vector<256x128xf32>
    %72 = arith.addf %62, %71 : vector<256x128xf32>
    %c2_47 = arith.constant 2 : index
    %c0_48 = arith.constant 0 : index
    %c0_49 = arith.constant 0 : index
    %73 = vector.load %arg6[%c2_47, %c0_48, %c0_49] : memref<18x18x128xbf16, #tpu.memory_space<vmem>>, vector<16x18x128xbf16>
    %74 = vector.extract_strided_slice %73 {offsets = [0, 0, 0], sizes = [16, 16, 128], strides = [1, 1, 1]} : vector<16x18x128xbf16> to vector<16x16x128xbf16>
    %75 = vector.extract_strided_slice %73 {offsets = [0, 1, 0], sizes = [16, 16, 128], strides = [1, 1, 1]} : vector<16x18x128xbf16> to vector<16x16x128xbf16>
    %76 = vector.extract_strided_slice %73 {offsets = [0, 2, 0], sizes = [16, 16, 128], strides = [1, 1, 1]} : vector<16x18x128xbf16> to vector<16x16x128xbf16>
    %77 = tpu.concatenate %74, %75, %76 in 2 : vector<16x16x128xbf16>, vector<16x16x128xbf16>, vector<16x16x128xbf16> -> vector<16x16x384xbf16>
    %78 = vector.shape_cast %77 : vector<16x16x384xbf16> to vector<256x384xbf16>
    %c2_50 = arith.constant 2 : index
    %c0_51 = arith.constant 0 : index
    %c0_52 = arith.constant 0 : index
    %79 = vector.load %arg3[%c2_50, %c0_51, %c0_52] : memref<3x384x128xbf16, #tpu.memory_space<vmem>>, vector<1x384x128xbf16>
    %80 = vector.shape_cast %79 : vector<1x384x128xbf16> to vector<384x128xbf16>
    %cst_53 = arith.constant dense<0.000000e+00> : vector<256x128xf32>
    %81 = tpu.matmul %78, %80, %cst_53 {dimension_numbers = #tpu.dot_dimension_numbers<[1], [0], [0], [1], [0, 0, 1, 1], [], []>} : vector<256x384xbf16>, vector<384x128xbf16>, vector<256x128xf32> -> vector<256x128xf32>
    %82 = arith.addf %72, %81 : vector<256x128xf32>
    %c0_54 = arith.constant 0 : index
    %c1_55 = arith.constant 1 : index
    %c1_56 = arith.constant 1 : index
    %c0_57 = arith.constant 0 : index
    %83 = vector.load %arg1[%c0_54, %c1_55, %c1_56, %c0_57] : memref<1x18x18x128xf32, #tpu.memory_space<vmem>>, vector<1x16x16x128xf32>
    %84 = vector.shape_cast %83 : vector<1x16x16x128xf32> to vector<16x16x128xf32>
    %85 = vector.shape_cast %84 : vector<16x16x128xf32> to vector<256x128xf32>
    %86 = vector.broadcast %3 : vector<1x128xf32> to vector<256x128xf32>
    %87 = arith.mulf %82, %86 : vector<256x128xf32>
    %88 = vector.broadcast %4 : vector<1x128xf32> to vector<256x128xf32>
    %89 = arith.addf %87, %88 : vector<256x128xf32>
    %90 = arith.addf %89, %85 : vector<256x128xf32>
    %cst_58 = arith.constant 0.000000e+00 : f32
    %91 = vector.broadcast %cst_58 : f32 to vector<256x128xf32>
    %92 = arith.maximumf %90, %91 : vector<256x128xf32>
    %93 = vector.shape_cast %92 : vector<256x128xf32> to vector<1x16x16x128xf32>
    %c0_59 = arith.constant 0 : index
    %c0_60 = arith.constant 0 : index
    %c0_61 = arith.constant 0 : index
    %c0_62 = arith.constant 0 : index
    %94 = vector.load %arg5[%c0_59, %c0_60, %c0_61, %c0_62] : memref<1x16x16x128xf32, #tpu.memory_space<vmem>>, vector<1x16x16x128xf32>
    tpu.vector_store %arg5[%c0_59, %c0_60, %c0_61, %c0_62], %93 {strides = array<i32>} : memref<1x16x16x128xf32, #tpu.memory_space<vmem>>, vector<1x16x16x128xf32>,
    return
  }
  func.func @transform_0(%arg0: i32) -> (i32, i32, i32, i32) {
    %c0_i32 = arith.constant 0 : i32
    %c0_i32_0 = arith.constant 0 : i32
    %c0_i32_1 = arith.constant 0 : i32
    %c0_i32_2 = arith.constant 0 : i32
    return %arg0, %c0_i32, %c0_i32_0, %c0_i32_1 : i32, i32, i32, i32
  }
  func.func @transform_1(%arg0: i32) -> (i32, i32, i32) {
    %c0_i32 = arith.constant 0 : i32
    %c0_i32_0 = arith.constant 0 : i32
    %c0_i32_1 = arith.constant 0 : i32
    %c0_i32_2 = arith.constant 0 : i32
    return %c0_i32, %c0_i32_0, %c0_i32_1 : i32, i32, i32
  }
  func.func @transform_2(%arg0: i32) -> (i32, i32, i32) {
    %c0_i32 = arith.constant 0 : i32
    %c0_i32_0 = arith.constant 0 : i32
    %c0_i32_1 = arith.constant 0 : i32
    %c0_i32_2 = arith.constant 0 : i32
    return %c0_i32, %c0_i32_0, %c0_i32_1 : i32, i32, i32
  }
  func.func @transform_3(%arg0: i32) -> (i32, i32) {
    %c0_i32 = arith.constant 0 : i32
    %c0_i32_0 = arith.constant 0 : i32
    %c0_i32_1 = arith.constant 0 : i32
    return %c0_i32, %c0_i32_0 : i32, i32
  }
  func.func @transform_4(%arg0: i32) -> (i32, i32, i32, i32) {
    %c0_i32 = arith.constant 0 : i32
    %c0_i32_0 = arith.constant 0 : i32
    %c0_i32_1 = arith.constant 0 : i32
    %c0_i32_2 = arith.constant 0 : i32
    return %arg0, %c0_i32, %c0_i32_0, %c0_i32_1 : i32, i32, i32, i32
  }
}

</mosaic_0001>

<bundles_post_ra>
// kernel: basic_block_forward.1
= control target key start
LH: loop header
LB: loop body
LE: loop exit
PB: predicated region body
PF: predicated region fallthrough
CT: control target
= control target key end

     0   :  { %s9015_s15 = smov 0   ;;  %s11615_s0 = inlined_call_operand.vmem [shape: f32[2,18,18,128], index: 0, kind: input, shape index: {}]   ;;  %s11616_s1 = inlined_call_operand.vmem [shape: bf16[3,384,128], index: 1, kind: input, shape index: {}]   ;;  %s11617_s2 = inlined_call_operand.vmem [shape: bf16[3,384,128], index: 2, kind: input, shape index: {}]   ;;  %s11618_s3 = inlined_call_operand.vmem [shape: f32[8,128], index: 3, kind: input, shape index: {}]   ;;  %s11619_s4 = inlined_call_operand.vmem [shape: f32[2,16,16,128], index: 4, kind: output, shape index: {}]  }
   0x1 LB: > { %s6687_s16 = sadd.s32 4294967295, %s8987_s15   ;;  %p6691_p0 = scmp.ge.s32.totalorder %s8987_s15, 1  ;;  %s8987_s15 = sphi %s9015_s15, %s14_s15  }
   0x2   : > { %p162_p1 = scmp.lt.s32.totalorder %s8987_s15, 3 }
   0x4   : > { %p163_p2 = pnand %p6691_p0, %p162_p1 }
   0x6   : > { %166 = sbr.rel (%p163_p2) target bundleno = 1091 (0x443), region = 36 }
   0xd   : > { %v8740_v0 = vld [vmem:[%s11616_s1 + $0x100] sm:$0xff]   ;;  %v8744_v4 = vld [vmem:[%s11616_s1 + $0x108] sm:$0xff]   ;;  %v8748_v8 = vld [vmem:[%s11616_s1 + $0x110] sm:$0xff]   ;;  %p188_p3 = scmp.lt.s32.totalorder %s6687_s16, 1  ;;  %vm280_vm0 = vsmask.f32 7424 }
   0xe   : > { %v8741_v1 = vld [vmem:[%s11616_s1 + $0xc0] sm:$0xff]   ;;  %7306 = vmatprep.subr.bf16.mxu0 %v8740_v0  ;;  %v8745_v5 = vld [vmem:[%s11616_s1 + $0xc8] sm:$0xff]   ;;  %v8749_v9 = vld [vmem:[%s11616_s1 + $0xd0] sm:$0xff]   ;;  %vm521_vm1 = vcmask 1046528   ;;  %vm3203_vm2 = vcmask 1040384  }
   0xf   : > { %v8742_v2 = vld [vmem:[%s11616_s1 + $0x40] sm:$0xff]   ;;  %7307 = vmatpush3.bf16.msra.mxu0 %v8741_v1  ;;  %v8746_v6 = vld [vmem:[%s11616_s1 + $0x48] sm:$0xff]   ;;  %v8750_v10 = vld [vmem:[%s11616_s1 + $0x50] sm:$0xff]   ;;  %s11665_s16 = smov (!%p188_p3, %s6687_s16), 1  ;;  %vm3204_vm3 = vsmask.f32 256 }
  0x10   : > { %v8743_v3 = vld [vmem:[%s11616_s1] sm:$0xff]   ;;  %7442 = vmatprep.subr.bf16.mxu1 %v8742_v2  ;;  %7308 = vmatprep.subr.bf16.mxu0 %v8744_v4  ;;  %v8747_v7 = vld [vmem:[%s11616_s1 + $0x8] sm:$0xff]   ;;  %v8751_v11 = vld [vmem:[%s11616_s1 + $0x10] sm:$0xff]   ;;  %s8730_s21 = smul.u32 432, %s11665_s16  ;;  %s7305_s9 = sshll.u32 %s11665_s16, 8 }
  0x11   : > { %7443 = vmatpush3.bf16.msra.mxu1 %v8743_v3  ;;  %v8752_v12 = vld [vmem:[%s11616_s1 + $0x118] sm:$0xff]   ;;  %v8756_v16 = vld [vmem:[%s11616_s1 + $0x120] sm:$0xff]   ;;  %v8760_v20 = vld [vmem:[%s11616_s1 + $0x128] sm:$0xff]   ;;  %s11465_s12 = scalar_lea.vmem %s11619_s4, %s7305_s9 }
  0x12   : > { %7444 = vmatprep.subr.bf16.mxu1 %v8746_v6  ;;  %v8753_v13 = vld [vmem:[%s11616_s1 + $0xd8] sm:$0xff]   ;;  %v8757_v17 = vld [vmem:[%s11616_s1 + $0xe0] sm:$0xff]   ;;  %v8761_v21 = vld [vmem:[%s11616_s1 + $0xe8] sm:$0xff]   ;;  %s9123_s6 = scalar_lea.vmem %s11615_s0, %s8730_s21 }
  0x13   : > { %7309 = vmatpush3.bf16.msra.mxu0 %v8745_v5  ;;  %v8754_v14 = vld [vmem:[%s11616_s1 + $0x58] sm:$0xff]   ;;  %v8758_v18 = vld [vmem:[%s11616_s1 + $0x60] sm:$0xff]   ;;  %v8762_v22 = vld [vmem:[%s11616_s1 + $0x68] sm:$0xff]  }
  0x14   : > { %7310 = vmatprep.subr.bf16.mxu0 %v8748_v8  ;;  %v8755_v15 = vld [vmem:[%s11616_s1 + $0x18] sm:$0xff]   ;;  %v8759_v19 = vld [vmem:[%s11616_s1 + $0x20] sm:$0xff]   ;;  %v8763_v23 = vld [vmem:[%s11616_s1 + $0x28] sm:$0xff]  }
  0x15   : > { %7445 = vmatpush3.bf16.msra.mxu1 %v8747_v7  ;;  %v8764_v24 = vld [vmem:[%s11616_s1 + $0x130] sm:$0xff]   ;;  %v8768_v28 = vld [vmem:[%s11616_s1 + $0x138] sm:$0xff]   ;;  %v6696_v33 = vld [vmem:[%s9123_s6 + $0x20] sm:$0xff] }
  0x16   : > { %7446 = vmatprep.subr.bf16.mxu1 %v8750_v10  ;;  %v8765_v25 = vld [vmem:[%s11616_s1 + $0xf0] sm:$0xff]   ;;  %v8769_v29 = vld [vmem:[%s11616_s1 + $0xf8] sm:$0xff]   ;;  %v6697_v34 = vld [vmem:[%s9123_s6 + $0x28] sm:$0x3] }
  0x17   : > { %7311 = vmatpush3.bf16.msra.mxu0 %v8749_v9  ;;  %v8766_v26 = vld [vmem:[%s11616_s1 + $0x70] sm:$0xff]   ;;  %v8770_v30 = vld [vmem:[%s11616_s1 + $0x78] sm:$0xff]   ;;  %v9136_v36 = vpack.c.bf16 %v6697_v34, %v6697_v34  ;;  %v8772_v37 = vld [vmem:[%s11616_s1 + $0x140] sm:$0xff]  }
  0x18   : > { %7312 = vmatprep.subr.bf16.mxu0 %v8752_v12  ;;  %v8767_v27 = vld [vmem:[%s11616_s1 + $0x30] sm:$0xff]   ;;  %v8771_v31 = vld [vmem:[%s11616_s1 + $0x38] sm:$0xff]   ;;  %v200_v38 = vld [vmem:[%s9123_s6] sm:$0xff] }
  0x19   : > { %7447 = vmatpush3.bf16.msra.mxu1 %v8751_v11  ;;  %v6695_v32 = vld [vmem:[%s9123_s6 + $0x18] sm:$0xff]  ;;  %v201_v39 = vld [vmem:[%s9123_s6 + $0x8] sm:$0xff]  ;;  %v202_v40 = vld [vmem:[%s9123_s6 + $0x10] sm:$0x3]  ;;  %v723_v43 = vshll.u32 %v9136_v36, 16 }
  0x1a   : > { %7448 = vmatprep.subr.bf16.mxu1 %v8754_v14  ;;  %v9134_v35 = vpack.c.bf16 %v6696_v33, %v6695_v32  ;;  %v9147_v44 = vpack.c.bf16 %v201_v39, %v200_v38  ;;  %v6698_v45 = vld [vmem:[%s9123_s6 + $0x30] sm:$0xff]  ;;  %v6699_v46 = vld [vmem:[%s9123_s6 + $0x38] sm:$0xff]  ;;  %v6701_v47 = vld [vmem:[%s9123_s6 + $0x48] sm:$0xff]  ;;  %v9152_v48 = vpack.c.bf16 %v202_v40, %v202_v40 }
  0x1b   : > { %7313 = vmatpush3.bf16.msra.mxu0 %v8753_v13  ;;  %v6700_v49 = vld [vmem:[%s9123_s6 + $0x40] sm:$0x3]  ;;  %v9155_v50 = vpack.c.bf16 %v6699_v46, %v6698_v45  ;;  %v205_v51 = vld [vmem:[%s9123_s6 + $0x28] sm:$0x3]  ;;  %v6702_v52 = vld [vmem:[%s9123_s6 + $0x50] sm:$0xff]  ;;  %v725_v54 = vrot.slane %v723_v43, 1 }
  0x1c   : > { %7314 = vmatprep.subr.bf16.mxu0 %v8756_v16  ;;  %v716_v41 = vshrl.u32 %v9134_v35, 16  ;;  %v718_v42 = vshll.u32 %v9134_v35, 16  ;;  %v282_v55 = vshrl.u32 %v9147_v44, 16  ;;  %v284_v56 = vshll.u32 %v9147_v44, 16  ;;  %v6703_v57 = vld [vmem:[%s9123_s6 + $0x58] sm:$0x3]  ;;  %vm10294_vm4 = vmand %vm3203_vm2, %vm3204_vm3 }
  0x1d   : > { %7449 = vmatpush3.bf16.msra.mxu1 %v8755_v15  ;;  %v289_v58 = vshll.u32 %v9152_v48, 16  ;;  %v9163_v59 = vpack.c.bf16 %v6700_v49, %v6700_v49  ;;  %v728_v60 = vshrl.u32 %v9155_v50, 16  ;;  %v730_v61 = vshll.u32 %v9155_v50, 16  ;;  %v208_v2 = vld [vmem:[%s9123_s6 + $0x40] sm:$0x3]  ;;  %v6705_v8 = vld [vmem:[%s9123_s6 + $0x68] sm:$0xff] }
  0x1e   : > { %7450 = vmatprep.subr.bf16.mxu1 %v8758_v18  ;;  %v720_v53 = vrot.slane %v718_v42, 1  ;;  %v286_v63 = vrot.slane %v284_v56, 1  ;;  %v9167_v0 = vpack.c.bf16 %v205_v51, %v205_v51  ;;  %v9169_v1 = vpack.c.bf16 %v6702_v52, %v6701_v47  ;;  %v6704_v7 = vld [vmem:[%s9123_s6 + $0x60] sm:$0xff]  ;;  %v6706_v18 = vld [vmem:[%s9123_s6 + $0x70] sm:$0x3]  ;;  %v6707_v33 = vld [vmem:[%s9123_s6 + $0x78] sm:$0xff] }
  0x1f   : > { %7315 = vmatpush3.bf16.msra.mxu0 %v8757_v17  ;;  %v291_v3 = vrot.slane %v289_v58, 1  ;;  %v732_v4 = vrot.slane %v730_v61, 1  ;;  %v735_v5 = vshll.u32 %v9163_v59, 16  ;;  %v9173_v6 = vpack.c.bf16 %v6703_v57, %v6703_v57  ;;  %v8773_v17 = vld [vmem:[%s11616_s1 + $0x148] sm:$0xff]   ;;  %v6708_v34 = vld [vmem:[%s9123_s6 + $0x80] sm:$0xff]  ;;  %v8775_v45 = vld [vmem:[%s11616_s1 + $0x158] sm:$0xff]  }
  0x20   : > { %7316 = vmatprep.subr.bf16.mxu0 %v8760_v20  ;;  %v721_v62 = vor.u32 %v720_v53, %v716_v41  ;;  %v287_v10 = vor.u32 %v286_v63, %v282_v55  ;;  %v301_v11 = vshll.u32 %v9167_v0, 16  ;;  %v740_v12 = vshrl.u32 %v9169_v1, 16  ;;  %v6709_v46 = vld [vmem:[%s9123_s6 + $0x88] sm:$0x3]  ;;  %v214_v51 = vld [vmem:[%s9123_s6 + $0x70] sm:$0x3] }
  0x21   : > { %7451 = vmatpush3.bf16.msra.mxu1 %v8759_v19  ;;  %v733_v13 = vor.u32 %v732_v4, %v728_v60  ;;  %v737_v14 = vrot.slane %v735_v5, 1  ;;  %v742_v15 = vshll.u32 %v9169_v1, 16  ;;  %v747_v16 = vshll.u32 %v9173_v6, 16  ;;  %v8777_v52 = vld [vmem:[%s11616_s1 + $0x80] sm:$0xff]   ;;  %v6710_v58 = vld [vmem:[%s9123_s6 + $0x90] sm:$0xff]  ;;  %v6711_v60 = vld [vmem:[%s9123_s6 + $0x98] sm:$0xff] }
  0x22   : > { %7452 = vmatprep.subr.bf16.mxu1 %v8762_v22  ;;  %v726_v9 = vsel %vm280_vm0, %v721_v62, %v725_v54  ;;  %v292_v19 = vsel %vm280_vm0, %v287_v10, %v291_v3  ;;  %v303_v20 = vrot.slane %v301_v11, 1  ;;  %v9190_v22 = vpack.c.bf16 %v6705_v8, %v6704_v7  ;;  %v8776_v57 = vld [vmem:[%s11616_s1 + $0x160] sm:$0xff]   ;;  %v8778_v8 = vld [vmem:[%s11616_s1 + $0x168] sm:$0xff]  }
  0x23   : > { %7317 = vmatpush3.bf16.msra.mxu0 %v8761_v21  ;;  %1244 = vmatprep.mubr.bf16.mxu0 %v726_v9  ;;  %v9188_v21 = vpack.c.bf16 %v208_v2, %v208_v2  ;;  %v9210_v43 = vpack.c.bf16 %v6708_v34, %v6707_v33  ;;  %v9224_v55 = vpack.c.bf16 %v6709_v46, %v6709_v46  ;;  %v6712_v7 = vld [vmem:[%s9123_s6 + $0xa0] sm:$0x3]  ;;  %v217_v11 = vld [vmem:[%s9123_s6 + $0x88] sm:$0x3] }
  0x24   : > { %7318 = vmatprep.subr.bf16.mxu0 %v8764_v24  ;;  %1710 = vmatprep.mubr.bf16.mxu1 %v292_v19  ;;  %v744_v24 = vrot.slane %v742_v15, 1  ;;  %v752_v39 = vshrl.u32 %v9190_v22, 16  ;;  %v9237_v5 = vpack.c.bf16 %v6711_v60, %v6710_v58  ;;  %v9253_v15 = vpack.c.bf16 %v6712_v7, %v6712_v7  ;;  %v6716_v34 = vld [vmem:[%s9123_s6 + $0xc0] sm:$0xff] }
  0x25   : > { %7453 = vmatpush3.bf16.msra.mxu1 %v8763_v23  ;;  %v738_v23 = vsel %vm280_vm0, %v733_v13, %v737_v14  ;;  %v766_v56 = vshll.u32 %v9210_v43, 16  ;;  %v764_v63 = vshrl.u32 %v9210_v43, 16  ;;  %v771_v4 = vshll.u32 %v9224_v55, 16 }
  0x26   : > { %7454 = vmatprep.subr.bf16.mxu1 %v8766_v26  ;;  %v211_v26 = vld [vmem:[%s9123_s6 + $0x58] sm:$0x3]  ;;  %v745_v32 = vor.u32 %v744_v24, %v740_v12  ;;  %v8779_v12 = vld [vmem:[%s11616_s1 + $0x88] sm:$0xff]   ;;  %v8780_v24 = vld [vmem:[%s11616_s1 + $0x170] sm:$0xff]  }
  0x27   : > { %7319 = vmatpush3.bf16.msra.mxu0 %v8765_v25  ;;  %v749_v25 = vrot.slane %v747_v16, 1  ;;  %v9205_v38 = vpack.c.bf16 %v211_v26, %v211_v26  ;;  %v768_v3 = vrot.slane %v766_v56, 1  ;;  %v773_v14 = vrot.slane %v771_v4, 1  ;;  %v6720_v56 = vld [vmem:[%s9123_s6 + $0xe0] sm:$0xff] }
  0x28   : > { %7320 = vmatprep.subr.bf16.mxu0 %v8768_v28  ;;  %v313_v28 = vshll.u32 %v9188_v21, 16  ;;  %v778_v16 = vshll.u32 %v9237_v5, 16  ;;  %v8784_v4 = vld [vmem:[%s11616_s1 + $0xa0] sm:$0xff]  }
  0x29   : > { %7455 = vmatpush3.bf16.msra.mxu1 %v8767_v27  ;;  %v304_v27 = vsel %vm280_vm0, %v721_v62, %v303_v20  ;;  %v750_v40 = vsel %vm280_vm0, %v745_v32, %v749_v25  ;;  %v325_v49 = vshll.u32 %v9205_v38, 16  ;;  %v9232_v62 = vpack.c.bf16 %v214_v51, %v214_v51  ;;  %v8781_v25 = vld [vmem:[%s11616_s1 + $0x90] sm:$0xff]   ;;  %v223_v51 = vld [vmem:[%s9123_s6 + $0xb8] sm:$0x3] }
  0x2a   : > { %7456 = vmatprep.subr.bf16.mxu1 %v8770_v30  ;;  %v754_v30 = vshll.u32 %v9190_v22, 16  ;;  %v9258_v20 = vpack.c.bf16 %v217_v11, %v217_v11  ;;  %v8785_v11 = vld [vmem:[%s11616_s1 + $0xa8] sm:$0xff]  }
  0x2b   : > { %7321 = vmatpush3.bf16.msra.mxu0 %v8769_v29  ;;  %v9197_v29 = vpack.c.bf16 %v6706_v18, %v6706_v18  ;;  %v327_v61 = vrot.slane %v325_v49, 1  ;;  %v337_v10 = vshll.u32 %v9232_v62, 16  ;;  %v6714_v18 = vld [vmem:[%s9123_s6 + $0xb0] sm:$0xff] }
  0x2c   : > { %8122 = vmatprep.subr.bf16.mxu0 %v8772_v37  ;;  %v756_v41 = vrot.slane %v754_v30, 1  ;;  %v6715_v30 = vld [vmem:[%s9123_s6 + $0xb8] sm:$0x3]  ;;  %v349_v33 = vshll.u32 %v9258_v20, 16 }
  0x2d   : > { %7457 = vmatpush3.bf16.msra.mxu1 %v8771_v31  ;;  %v8774_v31 = vld [vmem:[%s11616_s1 + $0x150] sm:$0xff]   ;;  %v759_v42 = vshll.u32 %v9197_v29, 16  ;;  %v328_v9 = vsel %vm280_vm0, %v745_v32, %v327_v61  ;;  %v339_v19 = vrot.slane %v337_v10, 1 }
  0x2e   : > { %1245 = vmatmul.mubr.bf16.vlgmr.msra.gmra.mrb[0].mxu0 %v9134_v35  ;;  %v757_v53 = vor.u32 %v756_v41, %v752_v39  ;;  %8170 = vmatprep.subr.bf16.mxu1 %v8777_v52  ;;  %v9278_v39 = vpack.c.bf16 %v6715_v30, %v6715_v30  ;;  %v8782_v41 = vld [vmem:[%s11616_s1 + $0x98] sm:$0xff]   ;;  %v226_v61 = vld [vmem:[%s9123_s6 + $0xd0] sm:$0x3]  ;;  %v6724_v30 = vld [vmem:[%s9123_s6 + $0x100] sm:$0x3] }
  0x2f   : > { %8123 = vmatpush3.bf16.msra.mxu0 %v8772_v37  ;;  %1252 = vmatprep.mubr.bf16.mxu0 %v738_v23  ;;  %v315_v37 = vrot.slane %v313_v28, 1  ;;  %v761_v54 = vrot.slane %v759_v42, 1  ;;  %v776_v23 = vshrl.u32 %v9237_v5, 16  ;;  %v783_v28 = vshll.u32 %v9253_v15, 16 }
  0x30   : > { %1711 = vmatmul.mubr.bf16.vlgmr.msra.gmra.mrb[0].mxu1 %v9147_v44  ;;  %8124 = vmatprep.subr.bf16.mxu0 %v8773_v17  ;;  %v340_v32 = vsel %vm280_vm0, %v757_v53, %v339_v19  ;;  %v795_v60 = vshll.u32 %v9278_v39, 16  ;;  %v6723_v19 = vld [vmem:[%s9123_s6 + $0xf8] sm:$0xff] }
  0x31   : > { %1718 = vmatprep.mubr.bf16.mxu1 %v304_v27  ;;  %v316_v47 = vsel %vm280_vm0, %v733_v13, %v315_v37  ;;  %8171 = vmatpush3.bf16.msra.mxu1 %v8777_v52  ;;  %v762_v2 = vsel %vm280_vm0, %v757_v53, %v761_v54  ;;  %v9251_v13 = vor.u32 %v768_v3, %v764_v63  ;;  %v780_v27 = vrot.slane %v778_v16, 1  ;;  %v6717_v37 = vld [vmem:[%s9123_s6 + $0xc8] sm:$0xff]  ;;  %v6719_v52 = vld [vmem:[%s9123_s6 + $0xd8] sm:$0xff] }
  0x32   : > { %8172 = vmatprep.subr.bf16.mxu1 %v8779_v12  ;;  %v9289_v49 = vpack.c.bf16 %v6717_v37, %v6716_v34  ;;  %v351_v53 = vrot.slane %v349_v33, 1  ;;  %v9304_v3 = vpack.c.bf16 %v223_v51, %v223_v51  ;;  %v9313_v10 = vpack.c.bf16 %v6720_v56, %v6719_v52  ;;  %v229_v34 = vld [vmem:[%s9123_s6 + $0xe8] sm:$0x3]  ;;  %v8788_v37 = vld [vmem:[%s11616_s1 + $0x1c0] sm:$0xff]   ;;  %v8787_v51 = vld [vmem:[%s11616_s1 + $0xb8] sm:$0xff]  }
  0x33   : > { %8125 = vmatpush3.bf16.msra.mxu0 %v8773_v17  ;;  %v6713_v17 = vld [vmem:[%s9123_s6 + $0xa8] sm:$0xff]  ;;  %v774_v26 = vsel %vm280_vm0, %v9251_v13, %v773_v14  ;;  %v9285_v42 = vor.u32 %v780_v27, %v776_v23  ;;  %v797_v16 = vrot.slane %v795_v60, 1 }
  0x34   : > { %8126 = vmatprep.subr.bf16.mxu0 %v8774_v31  ;;  %v812_v56 = vshrl.u32 %v9313_v10, 16 }
  0x35   : > { %8173 = vmatpush3.bf16.msra.mxu1 %v8779_v12  ;;  %v352_v12 = vsel %vm280_vm0, %v9251_v13, %v351_v53 }
  0x36   : > { %1253 = vmatmul.mubr.bf16.gmra.mrb[4].mxu0 %v9155_v50  ;;  %8174 = vmatprep.subr.bf16.mxu1 %v8781_v25 }
  0x37   : > { %1260 = vmatprep.mubr.bf16.mxu0 %v750_v40  ;;  %8127 = vmatpush3.bf16.msra.mxu0 %v8774_v31  ;;  %v9271_v31 = vpack.c.bf16 %v6714_v18, %v6713_v17  ;;  %v220_v40 = vld [vmem:[%s9123_s6 + $0xa0] sm:$0x3]  ;;  %v9322_v17 = vpack.c.bf16 %v226_v61, %v226_v61  ;;  %v6722_v18 = vld [vmem:[%s9123_s6 + $0xf0] sm:$0xff]  ;;  %v9354_v61 = vpack.c.bf16 %v6724_v30, %v6724_v30  ;;  %v522_v30 = vrot.slane %v9147_v44, 1 }
  0x38   : > { %1719 = vmatmul.mubr.bf16.gmra.mrb[4].mxu1 %v9134_v35  ;;  %8128 = vmatprep.subr.bf16.mxu0 %v8775_v45  ;;  %v9293_v54 = vpack.c.bf16 %v220_v40, %v220_v40 }
  0x39   : > { %1726 = vmatprep.mubr.bf16.mxu1 %v316_v47  ;;  %8175 = vmatpush3.bf16.msra.mxu1 %v8781_v25  ;;  %v790_v46 = vshll.u32 %v9271_v31, 16  ;;  %v6718_v47 = vld [vmem:[%s9123_s6 + $0xd0] sm:$0x3]  ;;  %v788_v58 = vshrl.u32 %v9271_v31, 16  ;;  %v373_v25 = vshll.u32 %v9304_v3, 16  ;;  %v385_v40 = vshll.u32 %v9322_v17, 16 }
  0x3a   : > { %8176 = vmatprep.subr.bf16.mxu1 %v8782_v41  ;;  %v9309_v7 = vpack.c.bf16 %v6718_v47, %v6718_v47  ;;  %v361_v14 = vshll.u32 %v9293_v54, 16  ;;  %v9344_v47 = vpack.c.bf16 %v6723_v19, %v6722_v18  ;;  %v955_v18 = vrot.slane %v9134_v35, 1 }
  0x3b   : > { %8129 = vmatpush3.bf16.msra.mxu0 %v8775_v45  ;;  %v785_v45 = vrot.slane %v783_v28, 1  ;;  %v814_v28 = vshll.u32 %v9313_v10, 16  ;;  %v831_v19 = vshll.u32 %v9354_v61, 16 }
  0x3c   : > { %8130 = vmatprep.subr.bf16.mxu0 %v8776_v57  ;;  %v807_v27 = vshll.u32 %v9309_v7, 16  ;;  %v363_v33 = vrot.slane %v361_v14, 1  ;;  %v826_v14 = vshll.u32 %v9344_v47, 16 }
  0x3d   : > { %8177 = vmatpush3.bf16.msra.mxu1 %v8782_v41  ;;  %v786_v63 = vsel %vm280_vm0, %v9285_v42, %v785_v45  ;;  %v375_v45 = vrot.slane %v373_v25, 1 }
  0x3e   : > { %1261 = vmatmul.mubr.bf16.gmra.mrb[8].mxu0 %v9169_v1  ;;  %8178 = vmatprep.subr.bf16.mxu1 %v8784_v4  ;;  %v809_v53 = vrot.slane %v807_v27, 1  ;;  %v364_v60 = vsel %vm280_vm0, %v9285_v42, %v363_v33  ;;  %v958_v27 = vrot.slane %v9155_v50, 1 }
  0x3f   : > { %1268 = vmatprep.mubr.bf16.mxu0 %v762_v2  ;;  %8131 = vmatpush3.bf16.msra.mxu0 %v8776_v57  ;;  %v8783_v57 = vld [vmem:[%s11616_s1 + $0x178] sm:$0xff]   ;;  %v792_v2 = vrot.slane %v790_v46, 1 }
  0x40   : > { %1727 = vmatmul.mubr.bf16.gmra.mrb[8].mxu1 %v9155_v50  ;;  %8132 = vmatprep.subr.bf16.mxu0 %v8778_v8  ;;  %v962_v50 = vrot.slane %v9173_v6, 1  ;;  %v532_v6 = vrot.slane %v9205_v38, 1 }
  0x41   : > { %1734 = vmatprep.mubr.bf16.mxu1 %v328_v9  ;;  %v6721_v9 = vld [vmem:[%s9123_s6 + $0xe8] sm:$0x3]  ;;  %8179 = vmatpush3.bf16.msra.mxu1 %v8784_v4  ;;  %v793_v23 = vor.u32 %v792_v2, %v788_v58  ;;  %v387_v2 = vrot.slane %v385_v40, 1  ;;  %v6726_v4 = vld [vmem:[%s9123_s6 + $0x110] sm:$0xff]  ;;  %v961_v40 = vrot.slane %v9169_v1, 1 }
  0x42   : > { %v9329_v13 = vpack.c.bf16 %v6721_v9, %v6721_v9  ;;  %8180 = vmatprep.subr.bf16.mxu1 %v8785_v11  ;;  %v6725_v58 = vld [vmem:[%s9123_s6 + $0x108] sm:$0xff] }
  0x43   : > { %8133 = vmatpush3.bf16.msra.mxu0 %v8778_v8  ;;  %v802_v8 = vshll.u32 %v9289_v49, 16  ;;  %v798_v41 = vsel %vm280_vm0, %v793_v23, %v797_v16  ;;  %v376_v9 = vsel %vm280_vm0, %v793_v23, %v375_v45  ;;  %v9370_v25 = vpack.c.bf16 %v6726_v4, %v6725_v58 }
  0x44   : > { %8134 = vmatprep.subr.bf16.mxu0 %v8780_v24  ;;  %v819_v46 = vshll.u32 %v9329_v13, 16  ;;  %v956_v23 = vrot.slane %v9136_v36, 1  ;;  %v9423_v38 = vsel %vm521_vm1, %v961_v40, %v532_v6  ;;  %v235_v6 = vld [vmem:[%s9123_s6 + $0x118] sm:$0x3] }
  0x45   : > { %8181 = vmatpush3.bf16.msra.mxu1 %v8785_v11 }
  0x46   : > { %1269 = vmatmul.mubr.bf16.gmra.mrb[12].mxu0 %v9190_v22  ;;  %v821_v11 = vrot.slane %v819_v46, 1  ;;  %v9382_v33 = vsel %vm521_vm1, %v955_v18, %v956_v23  ;;  %v833_v23 = vrot.slane %v831_v19, 1 }
  0x47   : > { %1276 = vmatprep.mubr.bf16.mxu0 %v774_v26  ;;  %8135 = vmatpush3.bf16.msra.mxu0 %v8780_v24  ;;  %v800_v24 = vshrl.u32 %v9289_v49, 16  ;;  %v804_v26 = vrot.slane %v802_v8, 1  ;;  %v6727_v8 = vld [vmem:[%s9123_s6 + $0x118] sm:$0x3] }
  0x48   : > { %1735 = vmatmul.mubr.bf16.gmra.mrb[12].mxu1 %v9169_v1  ;;  %8136 = vmatprep.subr.bf16.mxu0 %v8783_v57  ;;  %v9379_v35 = vpack.c.bf16 %v6727_v8, %v6727_v8  ;;  %v529_v1 = vrot.slane %v9188_v21, 1  ;;  %v544_v8 = vrot.slane %v9304_v3, 1  ;;  %v547_v3 = vrot.slane %v9322_v17, 1 }
  0x49   : > { %1742 = vmatprep.mubr.bf16.mxu1 %v340_v32  ;;  %v8786_v32 = vld [vmem:[%s11616_s1 + $0xb0] sm:$0xff]   ;;  %v805_v52 = vor.u32 %v804_v26, %v800_v24 }
  0x4a   : > { %8182 = vmatprep.subr.bf16.mxu1 %v8786_v32  ;;  %v9420_v21 = vsel %vm521_vm1, %v958_v27, %v529_v1  ;;  %v6730_v1 = vld [vmem:[%s9123_s6 + $0x130] sm:$0x3] }
  0x4b   : > { %8137 = vmatpush3.bf16.msra.mxu0 %v8783_v57  ;;  %v816_v57 = vrot.slane %v814_v28, 1  ;;  %8183 = vmatpush3.bf16.msra.mxu1 %v8786_v32  ;;  %v810_v42 = vsel %vm280_vm0, %v805_v52, %v809_v53  ;;  %v9374_v26 = vsel %vm280_vm0, %v805_v52, %v387_v2  ;;  %v959_v28 = vrot.slane %v9163_v59, 1  ;;  %v9417_v52 = vld [vmem:[%s11616_s1 + $0x200] sm:$0xff]  }
  0x4c   : > { %7578 = vmatprep.subr.bf16.mxu0 %v8788_v37  ;;  %8184 = vmatprep.subr.bf16.mxu1 %v8787_v51  ;;  %v828_v32 = vrot.slane %v826_v14, 1  ;;  %v526_v37 = vrot.slane %v9167_v0, 1  ;;  %v9403_v0 = vsel %vm521_vm1, %v961_v40, %v962_v50  ;;  %v971_v53 = vrot.slane %v9253_v15, 1  ;;  %v232_v2 = vld [vmem:[%s9123_s6 + $0x100] sm:$0x3] }
  0x4d   : > { %v9365_v16 = vor.u32 %v816_v57, %v812_v56  ;;  %v9386_v36 = vsel %vm521_vm1, %v958_v27, %v959_v28  ;;  %v973_v56 = vrot.slane %v9271_v31, 1  ;;  %v974_v57 = vrot.slane %v9278_v39, 1  ;;  %v6728_v28 = vld [vmem:[%s9123_s6 + $0x120] sm:$0xff] }
  0x4e   : > { %1277 = vmatmul.mubr.bf16.gmra.mrb[16].mxu0 %v9210_v43  ;;  %v9400_v45 = vsel %vm521_vm1, %v955_v18, %v526_v37  ;;  %v976_v15 = vrot.slane %v9289_v49, 1  ;;  %v541_v39 = vrot.slane %v9293_v54, 1  ;;  %v980_v14 = vrot.slane %v9329_v13, 1 }
  0x4f   : > { %1284 = vmatprep.mubr.bf16.mxu0 %v786_v63  ;;  %v9356_v63 = vpack.c.bf16 %v229_v34, %v229_v34  ;;  %8185 = vmatpush3.bf16.msra.mxu1 %v8787_v51  ;;  %v523_v34 = vrot.slane %v9152_v48, 1  ;;  %v822_v44 = vsel %vm280_vm0, %v9365_v16, %v821_v11  ;;  %v965_v48 = vrot.slane %v9197_v29, 1 }
  0x50   : > { %1743 = vmatmul.mubr.bf16.gmra.mrb[16].mxu1 %v9190_v22  ;;  %v968_v29 = vrot.slane %v9224_v55, 1  ;;  %v970_v51 = vrot.slane %v9237_v5, 1  ;;  %8218 = vmatprep.subr.bf16.mxu1 %v9417_v52  ;;  %v979_v11 = vrot.slane %v9313_v10, 1  ;;  %v9462_v18 = vsel %vm521_vm1, %v973_v56, %v544_v8 }
  0x51   : > { %1750 = vmatprep.mubr.bf16.mxu1 %v352_v12  ;;  %v824_v12 = vshrl.u32 %v9344_v47, 16  ;;  %v397_v24 = vshll.u32 %v9356_v63, 16  ;;  %v9395_v59 = vsel %vm521_vm1, %v522_v30, %v523_v34  ;;  %v983_v54 = vrot.slane %v9354_v61, 1  ;;  %v6729_v61 = vld [vmem:[%s9123_s6 + $0x128] sm:$0xff] }
  0x52   : > { %v9435_v58 = vsel %vm521_vm1, %v970_v51, %v971_v53  ;;  %v269_v27 = vpack.c.bf16 %v232_v2, %v232_v2  ;;  %v9468_v13 = vsel %vm521_vm1, %v979_v11, %v980_v14  ;;  %v550_v30 = vrot.slane %v9356_v63, 1  ;;  %v238_v14 = vld [vmem:[%s9123_s6 + $0x130] sm:$0x3] }
  0x53   : > { %v829_v34 = vor.u32 %v828_v32, %v824_v12  ;;  %v838_v37 = vshll.u32 %v9370_v25, 16  ;;  %v9480_v19 = vsel %vm521_vm1, %v976_v15, %v547_v3  ;;  %v399_v12 = vrot.slane %v397_v24, 1 }
  0x54   : > { %v9484_v40 = vsel %vm521_vm1, %v979_v11, %v550_v30  ;;  %v843_v32 = vshll.u32 %v9379_v35, 16  ;;  %v9489_v50 = vpack.c.bf16 %v6729_v61, %v6728_v28  ;;  %v409_v24 = vshll.u32 %v269_v27, 16  ;;  %v6735_v28 = vld [vmem:[%s9123_s6 + $0x158] sm:$0xff] }
  0x55   : > { %v400_v63 = vsel %vm280_vm0, %v9365_v16, %v399_v12 }
  0x56   : > { %1285 = vmatmul.mubr.bf16.gmra.mrb[20].mxu0 %v9237_v5  ;;  %v848_v16 = vshrl.u32 %v9489_v50, 16 }
  0x57   : > { %1292 = vmatprep.mubr.bf16.mxu0 %v798_v41  ;;  %v964_v41 = vrot.slane %v9190_v22, 1  ;;  %v967_v22 = vrot.slane %v9210_v43, 1 }
  0x58   : > { %1751 = vmatmul.mubr.bf16.gmra.mrb[20].mxu1 %v9210_v43  ;;  %v535_v43 = vrot.slane %v9232_v62, 1  ;;  %v977_v62 = vrot.slane %v9309_v7, 1  ;;  %v982_v7 = vrot.slane %v9344_v47, 1 }
  0x59   : > { %1758 = vmatprep.mubr.bf16.mxu1 %v364_v60  ;;  %v9409_v46 = vsel %vm521_vm1, %v964_v41, %v965_v48  ;;  %v9428_v55 = vsel %vm521_vm1, %v967_v22, %v968_v29  ;;  %v840_v48 = vrot.slane %v838_v37, 1  ;;  %v850_v29 = vshll.u32 %v9489_v50, 16 }
  0x5a   : > { %v9438_v60 = vsel %vm521_vm1, %v964_v41, %v535_v43  ;;  %v9477_v17 = vsel %vm521_vm1, %v982_v7, %v983_v54  ;;  %v834_v41 = vsel %vm280_vm0, %v829_v34, %v833_v23  ;;  %v9504_v43 = vpack.c.bf16 %v6730_v1, %v6730_v1 }
  0x5b   : > { %v9525_v37 = vpack.c.bf16 %v238_v14, %v238_v14 }
  0x5c   : > { %v855_v2 = vshll.u32 %v9504_v43, 16 }
  0x5e   : > { %1293 = vmatmul.mubr.bf16.gmra.mrb[24].mxu0 %v9271_v31  ;;  %v857_v54 = vrot.slane %v855_v2, 1  ;;  %v244_v2 = vld [vmem:[%s9123_s6 + $0x160] sm:$0x3] }
  0x5f   : > { %1300 = vmatprep.mubr.bf16.mxu0 %v810_v42  ;;  %v9459_v42 = vsel %vm521_vm1, %v970_v51, %v541_v39  ;;  %v6731_v51 = vld [vmem:[%s9123_s6 + $0x138] sm:$0xff] }
  0x60   : > { %1759 = vmatmul.mubr.bf16.gmra.mrb[24].mxu1 %v9237_v5  ;;  %v538_v5 = vrot.slane %v9258_v20, 1  ;;  %v9447_v20 = vsel %vm521_vm1, %v973_v56, %v974_v57  ;;  %v411_v56 = vrot.slane %v409_v24, 1  ;;  %v9507_v57 = vpack.c.bf16 %v235_v6, %v235_v6 }
  0x61   : > { %1766 = vmatprep.mubr.bf16.mxu1 %v376_v9  ;;  %v9452_v9 = vsel %vm521_vm1, %v976_v15, %v977_v62  ;;  %v852_v62 = vrot.slane %v850_v29, 1  ;;  %v6738_v29 = vld [vmem:[%s9123_s6 + $0x170] sm:$0xff] }
  0x62   : > { %v9444_v4 = vsel %vm521_vm1, %v967_v22, %v538_v5  ;;  %v845_v22 = vrot.slane %v843_v32, 1  ;;  %v6732_v5 = vld [vmem:[%s9123_s6 + $0x140] sm:$0xff]  ;;  %v412_v8 = vsel %vm280_vm0, %v829_v34, %v411_v56  ;;  %v421_v11 = vshll.u32 %v9507_v57, 16 }
  0x63   : > { %v9512_v39 = vpack.c.bf16 %v6732_v5, %v6731_v51  ;;  %v6736_v32 = vld [vmem:[%s9123_s6 + $0x160] sm:$0x3] }
  0x64   : > { %v423_v30 = vrot.slane %v421_v11, 1  ;;  %v9538_v24 = vpack.c.bf16 %v6736_v32, %v6736_v32 }
  0x65   : > { %v862_v23 = vshll.u32 %v9512_v39, 16  ;;  %v860_v34 = vshrl.u32 %v9512_v39, 16 }
  0x66   : > { %1301 = vmatmul.mubr.bf16.gmra.mrb[28].mxu0 %v9289_v49 }
  0x67   : > { %1308 = vmatprep.mubr.bf16.mxu0 %v822_v44 }
  0x68   : > { %1767 = vmatmul.mubr.bf16.gmra.mrb[28].mxu1 %v9271_v31  ;;  %v553_v31 = vrot.slane %v269_v27, 1  ;;  %v6734_v27 = vld [vmem:[%s9123_s6 + $0x150] sm:$0xff] }
  0x69   : > { %1774 = vmatprep.mubr.bf16.mxu1 %v9374_v26  ;;  %v836_v26 = vshrl.u32 %v9370_v25, 16  ;;  %v9530_v12 = vpack.c.bf16 %v6735_v28, %v6734_v27  ;;  %v6740_v27 = vld [vmem:[%s9123_s6 + $0x180] sm:$0xff]  ;;  %v6741_v28 = vld [vmem:[%s9123_s6 + $0x188] sm:$0xff] }
  0x6a   : > { %v9492_v44 = vsel %vm521_vm1, %v982_v7, %v553_v31  ;;  %v853_v7 = vor.u32 %v852_v62, %v848_v16  ;;  %v864_v31 = vrot.slane %v862_v23, 1  ;;  %v6739_v62 = vld [vmem:[%s9123_s6 + $0x178] sm:$0x3] }
  0x6b   : > { %v841_v53 = vor.u32 %v840_v48, %v836_v26  ;;  %v433_v26 = vshll.u32 %v9525_v37, 16  ;;  %v241_v48 = vld [vmem:[%s9123_s6 + $0x148] sm:$0x3]  ;;  %v874_v6 = vshll.u32 %v9530_v12, 16 }
  0x6c   : > { %v858_v61 = vsel %vm280_vm0, %v853_v7, %v857_v54  ;;  %v865_v1 = vor.u32 %v864_v31, %v860_v34  ;;  %v9543_v5 = vpack.c.bf16 %v241_v48, %v241_v48  ;;  %v9556_v54 = vpack.c.bf16 %v6739_v62, %v6739_v62 }
  0x6d   : > { %v846_v15 = vsel %vm280_vm0, %v841_v53, %v845_v22  ;;  %v6737_v22 = vld [vmem:[%s9123_s6 + $0x168] sm:$0xff]  ;;  %v435_v51 = vrot.slane %v433_v26, 1  ;;  %v876_v16 = vrot.slane %v874_v6, 1  ;;  %v9561_v34 = vpack.c.bf16 %v244_v2, %v244_v2  ;;  %v247_v26 = vld [vmem:[%s9123_s6 + $0x178] sm:$0x3] }
  0x6e   : > { %1309 = vmatmul.mubr.bf16.gmra.mrb[32].mxu0 %v9313_v10  ;;  %v891_v32 = vshll.u32 %v9556_v54, 16 }
  0x6f   : > { %1316 = vmatprep.mubr.bf16.mxu0 %v834_v41  ;;  %v424_v41 = vsel %vm280_vm0, %v841_v53, %v423_v30  ;;  %v872_v53 = vshrl.u32 %v9530_v12, 16 }
  0x70   : > { %1775 = vmatmul.mubr.bf16.gmra.mrb[32].mxu1 %v9289_v49  ;;  %v6733_v49 = vld [vmem:[%s9123_s6 + $0x148] sm:$0x3] }
  0x71   : > { %1782 = vmatprep.mubr.bf16.mxu1 %v400_v63  ;;  %v9520_v3 = vpack.c.bf16 %v6733_v49, %v6733_v49  ;;  %v436_v49 = vsel %vm280_vm0, %v853_v7, %v435_v51  ;;  %v877_v11 = vor.u32 %v876_v16, %v872_v53 }
  0x76   : > { %1317 = vmatmul.mubr.bf16.gmra.mrb[36].mxu0 %v9344_v47 }
  0x77   : > { %1324 = vmatprep.mubr.bf16.mxu0 %v846_v15  ;;  %v9548_v15 = vpack.c.bf16 %v6738_v29, %v6737_v22  ;;  %v893_v22 = vrot.slane %v891_v32, 1  ;;  %v8810_v32 = vld [vmem:[%s11616_s1 + $0x230] sm:$0xff]  }
  0x78   : > { %1783 = vmatmul.mubr.bf16.gmra.mrb[36].mxu1 %v9313_v10  ;;  %v867_v10 = vshll.u32 %v9520_v3, 16 }
  0x79   : > { %1790 = vmatprep.mubr.bf16.mxu1 %v412_v8  ;;  %v445_v8 = vshll.u32 %v9543_v5, 16  ;;  %v886_v23 = vshll.u32 %v9548_v15, 16  ;;  %v884_v7 = vshrl.u32 %v9548_v15, 16 }
  0x7a   : > { %v869_v63 = vrot.slane %v867_v10, 1 }
  0x7b   : > { %v447_v30 = vrot.slane %v445_v8, 1  ;;  %v888_v10 = vrot.slane %v886_v23, 1 }
  0x7c   : > { %v870_v56 = vsel %vm280_vm0, %v865_v1, %v869_v63  ;;  %v457_v63 = vshll.u32 %v9561_v34, 16 }
  0x7d   : > { %v448_v48 = vsel %vm280_vm0, %v865_v1, %v447_v30  ;;  %v9574_v6 = vor.u32 %v888_v10, %v884_v7  ;;  %v8790_v30 = vld [vmem:[%s11616_s1 + $0x1c8] sm:$0xff]   ;;  %v8804_v10 = vld [vmem:[%s11616_s1 + $0x1f0] sm:$0xff]  }
  0x7e   : > { %1325 = vmatmul.mubr.bf16.gmra.mrb[40].mxu0 %v9370_v25  ;;  %v459_v53 = vrot.slane %v457_v63, 1  ;;  %v8799_v7 = vld [vmem:[%s11616_s1 + $0x208] sm:$0xff]   ;;  %v6839_v63 = vld [vmem:[%s9123_s6 + $0x30] sm:$0xff] }
  0x7f   : > { %1332 = vmatprep.mubr.bf16.mxu0 %v858_v61  ;;  %v6742_v61 = vld [vmem:[%s9123_s6 + $0x190] sm:$0x3]  ;;  %v894_v1 = vsel %vm280_vm0, %v9574_v6, %v893_v22  ;;  %v6840_v22 = vld [vmem:[%s9123_s6 + $0x38] sm:$0xff] }
  0x80   : > { %1791 = vmatmul.mubr.bf16.gmra.mrb[40].mxu1 %v9344_v47  ;;  %v879_v47 = vshll.u32 %v9538_v24, 16  ;;  %v9576_v29 = vpack.c.bf16 %v6742_v61, %v6742_v61  ;;  %v460_v2 = vsel %vm280_vm0, %v877_v11, %v459_v53  ;;  %v8793_v61 = vld [vmem:[%s11616_s1 + $0x190] sm:$0xff]   ;;  %v9700_v53 = vpack.c.bf16 %v6840_v22, %v6839_v63  ;;  %v6852_v63 = vld [vmem:[%s9123_s6 + $0x98] sm:$0xff]  ;;  %v6853_v22 = vld [vmem:[%s9123_s6 + $0xa0] sm:$0x3] }
  0x81   : > { %1798 = vmatprep.mubr.bf16.mxu1 %v424_v41  ;;  %v9567_v41 = vpack.c.bf16 %v6741_v28, %v6740_v27 }
  0x82   : > { %v881_v14 = vrot.slane %v879_v47, 1  ;;  %v903_v62 = vshll.u32 %v9576_v29, 16 }
  0x83   : > { %v898_v51 = vshll.u32 %v9567_v41, 16  ;;  %v896_v16 = vshrl.u32 %v9567_v41, 16 }
  0x84   : > { %v882_v31 = vsel %vm280_vm0, %v877_v11, %v881_v14  ;;  %v905_v14 = vrot.slane %v903_v62, 1  ;;  %v8789_v11 = vld [vmem:[%s11616_s1 + $0x180] sm:$0xff]   ;;  %v565_v62 = vrot.slane %v9561_v34, 1  ;;  %v1000_v34 = vrot.slane %v9567_v41, 1 }
  0x85   : > { %v900_v47 = vrot.slane %v898_v51, 1 }
  0x86   : > { %1333 = vmatmul.mubr.bf16.gmra.mrb[44].mxu0 %v9489_v50 }
  0x87   : > { %1340 = vmatprep.mubr.bf16.mxu0 %v870_v56  ;;  %v9579_v56 = vpack.c.bf16 %v247_v26, %v247_v26  ;;  %v9589_v8 = vor.u32 %v900_v47, %v896_v16  ;;  %v985_v26 = vrot.slane %v9370_v25, 1  ;;  %v562_v47 = vrot.slane %v9543_v5, 1 }
  0x88   : > { %1799 = vmatmul.mubr.bf16.gmra.mrb[44].mxu1 %v9370_v25  ;;  %v989_v25 = vrot.slane %v9504_v43, 1  ;;  %v6841_v43 = vld [vmem:[%s9123_s6 + $0x40] sm:$0x3] }
  0x89   : > { %1806 = vmatprep.mubr.bf16.mxu1 %v436_v49  ;;  %v469_v49 = vshll.u32 %v9579_v56, 16  ;;  %v906_v27 = vsel %vm280_vm0, %v9589_v8, %v905_v14  ;;  %v2050_v16 = vpack.c.bf16 %v6841_v43, %v6841_v43  ;;  %v2082_v14 = vshrl.u32 %v9700_v53, 16 }
  0x8b   : > { %v471_v23 = vrot.slane %v469_v49, 1  ;;  %v6843_v49 = vld [vmem:[%s9123_s6 + $0x50] sm:$0xff] }
  0x8d   : > { %v472_v28 = vsel %vm280_vm0, %v9574_v6, %v471_v23 }
  0x8e   : > { %1341 = vmatmul.mubr.bf16.gmra.mrb[48].mxu0 %v9512_v39 }
  0x8f   : > { %1348 = vmatprep.mubr.bf16.mxu0 %v882_v31  ;;  %v8797_v31 = vld [vmem:[%s11616_s1 + $0x1a0] sm:$0xff]  }
  0x90   : > { %1807 = vmatmul.mubr.bf16.gmra.mrb[48].mxu1 %v9489_v50 }
  0x91   : > { %1814 = vmatprep.mubr.bf16.mxu1 %v448_v48  ;;  %v986_v48 = vrot.slane %v9379_v35, 1  ;;  %v991_v35 = vrot.slane %v9512_v39, 1 }
  0x96   : > { %1349 = vmatmul.mubr.bf16.gmra.mrb[52].mxu0 %v9530_v12 }
  0x97   : > { %1356 = vmatprep.mubr.bf16.mxu0 %v894_v1  ;;  %v2084_v1 = vshll.u32 %v9700_v53, 16 }
  0x98   : > { %1815 = vmatmul.mubr.bf16.gmra.mrb[52].mxu1 %v9512_v39  ;;  %v995_v39 = vrot.slane %v9538_v24, 1 }
  0x99   : > { %1822 = vmatprep.mubr.bf16.mxu1 %v460_v2  ;;  %v2086_v23 = vrot.slane %v2084_v1, 1 }
  0x9e   : > { %1357 = vmatmul.mubr.bf16.gmra.mrb[56].mxu0 %v9548_v15 }
  0x9f   : > { %1364 = vmatprep.mubr.bf16.mxu0 %v906_v27  ;;  %v563_v27 = vsel %vm521_vm1, %v991_v35, %v562_v47 }
  0xa0   : > { %1823 = vmatmul.mubr.bf16.gmra.mrb[56].mxu1 %v9530_v12 }
  0xa1   : > { %1830 = vmatprep.mubr.bf16.mxu1 %v472_v28 }
  0xa6   : > { %1365 = vmatmul.mubr.bf16.gmra.mrb[60].mxu0 %v9567_v41 }
  0xa7   : > { %8138 = vmatprep.mubr.bf16.mxu0 %v9382_v33  ;;  %v8791_v33 = vld [vmem:[%s11616_s1 + $0x188] sm:$0xff]  }
  0xa8   : > { %1831 = vmatmul.mubr.bf16.gmra.mrb[60].mxu1 %v9548_v15 }
  0xa9   : > { %8186 = vmatprep.mubr.bf16.mxu1 %v9395_v59  ;;  %v8792_v59 = vld [vmem:[%s11616_s1 + $0x1d0] sm:$0xff]  }
  0xae   : > { %8139 = vmatmul.mubr.bf16.vlgmr.msra.gmra.mrb[64].mxu0 %v9386_v36  ;;  %v8794_v36 = vld [vmem:[%s11616_s1 + $0x1d8] sm:$0xff]  }
  0xaf   : > { %7579 = vmatpush3.bf16.msra.mxu0 %v8789_v11  ;;  %8142 = vmatprep.mubr.bf16.mxu0 %v9403_v0  ;;  %v8803_v0 = vld [vmem:[%s11616_s1 + $0x218] sm:$0xff]   ;;  %v1001_v11 = vrot.slane %v9576_v29, 1  ;;  %v6847_v29 = vld [vmem:[%s9123_s6 + $0x70] sm:$0x3] }
  0xb0   : > { %8187 = vmatmul.mubr.bf16.vlgmr.msra.gmra.mrb[64].mxu1 %v9400_v45  ;;  %7580 = vmatprep.subr.bf16.mxu0 %v8790_v30  ;;  %v8802_v45 = vld [vmem:[%s11616_s1 + $0x210] sm:$0xff]   ;;  %v6844_v30 = vld [vmem:[%s9123_s6 + $0x58] sm:$0x3] }
  0xb1   : > { %8190 = vmatprep.mubr.bf16.mxu1 %v9420_v21  ;;  %8219 = vmatpush3.bf16.msra.mxu1 %v9417_v52  ;;  %v8795_v21 = vld [vmem:[%s11616_s1 + $0x198] sm:$0xff]   ;;  %v8796_v52 = vld [vmem:[%s11616_s1 + $0x1e0] sm:$0xff]  }
  0xb2   : > { %8220 = vmatprep.subr.bf16.mxu1 %v8799_v7 }
  0xb3   : > { %7581 = vmatpush3.bf16.msra.mxu0 %v8791_v33 }
  0xb4   : > { %7582 = vmatprep.subr.bf16.mxu0 %v8792_v59 }
  0xb5   : > { %8221 = vmatpush3.bf16.msra.mxu1 %v8799_v7  ;;  %v2087_v7 = vor.u32 %v2086_v23, %v2082_v14  ;;  %v6855_v14 = vld [vmem:[%s9123_s6 + $0xb0] sm:$0xff]  ;;  %v6856_v23 = vld [vmem:[%s9123_s6 + $0xb8] sm:$0x3] }
  0xb6   : > { %8143 = vmatmul.mubr.bf16.gmra.mrb[68].mxu0 %v9409_v46  ;;  %8222 = vmatprep.subr.bf16.mxu1 %v8802_v45  ;;  %v8800_v46 = vld [vmem:[%s11616_s1 + $0x1e8] sm:$0xff]  }
  0xb7   : > { %8146 = vmatprep.mubr.bf16.mxu0 %v9428_v55  ;;  %7583 = vmatpush3.bf16.msra.mxu0 %v8793_v61  ;;  %v8807_v55 = vld [vmem:[%s11616_s1 + $0x228] sm:$0xff]   ;;  %v568_v61 = vrot.slane %v9579_v56, 1 }
  0xb8   : > { %8191 = vmatmul.mubr.bf16.gmra.mrb[68].mxu1 %v9423_v38  ;;  %7584 = vmatprep.subr.bf16.mxu0 %v8794_v36  ;;  %v8806_v38 = vld [vmem:[%s11616_s1 + $0x220] sm:$0xff]   ;;  %v2321_v36 = vrot.slane %v9700_v53, 1 }
  0xb9   : > { %8194 = vmatprep.mubr.bf16.mxu1 %v9438_v60  ;;  %8223 = vmatpush3.bf16.msra.mxu1 %v8802_v45  ;;  %v8801_v60 = vld [vmem:[%s11616_s1 + $0x1a8] sm:$0xff]   ;;  %v2322_v45 = vrot.slane %v2050_v16, 1 }
  0xba   : > { %8224 = vmatprep.subr.bf16.mxu1 %v8803_v0 }
  0xbb   : > { %7585 = vmatpush3.bf16.msra.mxu0 %v8795_v21  ;;  %v1002_v21 = vsel %vm521_vm1, %v1000_v34, %v1001_v11 }
  0xbc   : > { %7586 = vmatprep.subr.bf16.mxu0 %v8796_v52  ;;  %v6845_v52 = vld [vmem:[%s9123_s6 + $0x60] sm:$0xff] }
  0xbd   : > { %8225 = vmatpush3.bf16.msra.mxu1 %v8803_v0  ;;  %v2052_v0 = vpack.c.bf16 %v6844_v30, %v6844_v30 }
  0xbe   : > { %8147 = vmatmul.mubr.bf16.gmra.mrb[72].mxu0 %v9435_v58  ;;  %8226 = vmatprep.subr.bf16.mxu1 %v8806_v38  ;;  %v8805_v58 = vld [vmem:[%s11616_s1 + $0x1b0] sm:$0xff]  }
  0xbf   : > { %8150 = vmatprep.mubr.bf16.mxu0 %v9447_v20  ;;  %7587 = vmatpush3.bf16.msra.mxu0 %v8797_v31  ;;  %v8811_v20 = vld [vmem:[%s11616_s1 + $0x238] sm:$0xff]   ;;  %v6846_v31 = vld [vmem:[%s9123_s6 + $0x68] sm:$0xff] }
  0xc0   : > { %8195 = vmatmul.mubr.bf16.gmra.mrb[72].mxu1 %v9444_v4  ;;  %7588 = vmatprep.subr.bf16.mxu0 %v8800_v46  ;;  %v8808_v4 = vld [vmem:[%s11616_s1 + $0x1f8] sm:$0xff]  }
  0xc1   : > { %8198 = vmatprep.mubr.bf16.mxu1 %v9459_v42  ;;  %8227 = vmatpush3.bf16.msra.mxu1 %v8806_v38  ;;  %v8809_v42 = vld [vmem:[%s11616_s1 + $0x1b8] sm:$0xff]  }
  0xc2   : > { %8228 = vmatprep.subr.bf16.mxu1 %v8807_v55 }
  0xc3   : > { %7589 = vmatpush3.bf16.msra.mxu0 %v8801_v60  ;;  %v2101_v60 = vshll.u32 %v2052_v0, 16 }
  0xc4   : > { %7590 = vmatprep.subr.bf16.mxu0 %v8804_v10  ;;  %v2323_v10 = vsel %vm521_vm1, %v2321_v36, %v2322_v45  ;;  %v9775_v36 = vpack.c.bf16 %v6856_v23, %v6856_v23 }
  0xc5   : > { %8229 = vmatpush3.bf16.msra.mxu1 %v8807_v55 }
  0xc6   : > { %8151 = vmatmul.mubr.bf16.gmra.mrb[76].mxu0 %v9452_v9  ;;  %8230 = vmatprep.subr.bf16.mxu1 %v8810_v32  ;;  %v987_v9 = vsel %vm521_vm1, %v985_v26, %v986_v48  ;;  %v2325_v48 = vrot.slane %v2052_v0, 1 }
  0xc7   : > { %8154 = vmatprep.mubr.bf16.mxu0 %v9468_v13  ;;  %7591 = vmatpush3.bf16.msra.mxu0 %v8805_v58  ;;  %v992_v13 = vrot.slane %v9520_v3, 1  ;;  %v9708_v3 = vrot.slane %v9548_v15, 1  ;;  %v2054_v58 = vpack.c.bf16 %v6847_v29, %v6847_v29 }
  0xc8   : > { %8199 = vmatmul.mubr.bf16.gmra.mrb[76].mxu1 %v9462_v18  ;;  %7592 = vmatprep.subr.bf16.mxu0 %v8808_v4  ;;  %v988_v18 = vrot.slane %v9489_v50, 1 }
  0xc9   : > { %8202 = vmatprep.mubr.bf16.mxu1 %v9480_v19  ;;  %8231 = vmatpush3.bf16.msra.mxu1 %v8810_v32  ;;  %v556_v19 = vrot.slane %v9507_v57, 1  ;;  %v993_v50 = vsel %vm521_vm1, %v991_v35, %v992_v13  ;;  %v994_v57 = vrot.slane %v9530_v12, 1  ;;  %v6842_v12 = vld [vmem:[%s9123_s6 + $0x48] sm:$0xff]  ;;  %v569_v56 = vsel %vm521_vm1, %v9708_v3, %v568_v61  ;;  %v6849_v35 = vld [vmem:[%s9123_s6 + $0x80] sm:$0xff] }
  0xca   : > { %8232 = vmatprep.subr.bf16.mxu1 %v8811_v20  ;;  %v990_v51 = vsel %vm521_vm1, %v988_v18, %v989_v25  ;;  %v9722_v5 = vpack.c.bf16 %v6843_v49, %v6842_v12  ;;  %v9741_v32 = vpack.c.bf16 %v6846_v31, %v6845_v52  ;;  %v6848_v25 = vld [vmem:[%s9123_s6 + $0x78] sm:$0xff]  ;;  %v6850_v13 = vld [vmem:[%s9123_s6 + $0x88] sm:$0x3] }
  0xcb   : > { %7593 = vmatpush3.bf16.msra.mxu0 %v8809_v42  ;;  %v996_v2 = vsel %vm521_vm1, %v994_v57, %v995_v39  ;;  %v566_v28 = vsel %vm521_vm1, %v994_v57, %v565_v62  ;;  %v2056_v57 = vpack.c.bf16 %v6850_v13, %v6850_v13 }
  0xcc   : > { %v2096_v59 = vshll.u32 %v9722_v5, 16  ;;  %v2094_v38 = vshrl.u32 %v9722_v5, 16  ;;  %v2108_v42 = vshll.u32 %v9741_v32, 16 }
  0xcd   : > { %8233 = vmatpush3.bf16.msra.mxu1 %v8811_v20  ;;  %v2103_v20 = vrot.slane %v2101_v60, 1  ;;  %v2331_v12 = vrot.slane %v2056_v57, 1  ;;  %v6860_v60 = vld [vmem:[%s9123_s6 + $0xd8] sm:$0xff] }
  0xce   : > { %8155 = vmatmul.mubr.bf16.gmra.mrb[80].mxu0 %v9477_v17  ;;  %v559_v17 = vrot.slane %v9525_v37, 1  ;;  %v998_v37 = vrot.slane %v9556_v54, 1  ;;  %v2089_v54 = vshll.u32 %v2050_v16, 16  ;;  %v2098_v55 = vrot.slane %v2096_v59, 1 }
  0xcf   : > { %8158 = vmatprep.mubr.bf16.mxu0 %v987_v9  ;;  %v2327_v9 = vrot.slane %v9741_v32, 1  ;;  %v2058_v16 = vpack.c.bf16 %v6853_v22, %v6853_v22 }
  0xd0   : > { %8203 = vmatmul.mubr.bf16.gmra.mrb[80].mxu1 %v9484_v40  ;;  %v557_v40 = vsel %vm521_vm1, %v985_v26, %v556_v19  ;;  %v999_v24 = vsel %vm521_vm1, %v9708_v3, %v998_v37  ;;  %v2091_v33 = vrot.slane %v2089_v54, 1  ;;  %v2099_v4 = vor.u32 %v2098_v55, %v2094_v38  ;;  %v6851_v19 = vld [vmem:[%s9123_s6 + $0x90] sm:$0xff]  ;;  %v6857_v54 = vld [vmem:[%s9123_s6 + $0xc0] sm:$0xff] }
  0xd1   : > { %8206 = vmatprep.mubr.bf16.mxu1 %v9492_v44  ;;  %v560_v44 = vsel %vm521_vm1, %v988_v18, %v559_v17  ;;  %v2324_v26 = vrot.slane %v9722_v5, 1  ;;  %v2328_v18 = vrot.slane %v2054_v58, 1  ;;  %v9759_v37 = vpack.c.bf16 %v6852_v63, %v6851_v19 }
  0xd2   : > { %v2092_v46 = vsel %vm280_vm0, %v2087_v7, %v2091_v33  ;;  %v2104_v17 = vsel %vm280_vm0, %v2099_v4, %v2103_v20  ;;  %v2334_v49 = vrot.slane %v2058_v16, 1  ;;  %v2125_v33 = vshll.u32 %v2056_v57, 16  ;;  %v6864_v4 = vld [vmem:[%s9123_s6 + $0xf8] sm:$0xff]  ;;  %v6865_v20 = vld [vmem:[%s9123_s6 + $0x100] sm:$0x3] }
  0xd3   : > { %v2326_v43 = vsel %vm521_vm1, %v2324_v26, %v2325_v48  ;;  %v2329_v39 = vsel %vm521_vm1, %v2327_v9, %v2328_v18  ;;  %v2132_v29 = vshll.u32 %v9759_v37, 16  ;;  %v2130_v26 = vshrl.u32 %v9759_v37, 16 }
  0xd4   : > { %v2127_v31 = vrot.slane %v2125_v33, 1  ;;  %v2137_v9 = vshll.u32 %v2058_v16, 16  ;;  %v9805_v63 = vpack.c.bf16 %v6865_v20, %v6865_v20 }
  0xd5   : > { %v2134_v48 = vrot.slane %v2132_v29, 1 }
  0xd6   : > { %8159 = vmatmul.mubr.bf16.gmra.mrb[84].mxu0 %v990_v51  ;;  %v2106_v51 = vshrl.u32 %v9741_v32, 16 }
  0xd7   : > { %8162 = vmatprep.mubr.bf16.mxu0 %v993_v50  ;;  %v2110_v50 = vrot.slane %v2108_v42, 1  ;;  %v2135_v22 = vor.u32 %v2134_v48, %v2130_v26  ;;  %v6873_v26 = vld [vmem:[%s9123_s6 + $0x140] sm:$0xff]  ;;  %v6874_v48 = vld [vmem:[%s9123_s6 + $0x148] sm:$0x3] }
  0xd8   : > { %8207 = vmatmul.mubr.bf16.gmra.mrb[84].mxu1 %v557_v40  ;;  %v2113_v40 = vshll.u32 %v2054_v58, 16  ;;  %v6863_v58 = vld [vmem:[%s9123_s6 + $0xf0] sm:$0xff] }
  0xd9   : > { %8210 = vmatprep.mubr.bf16.mxu1 %v560_v44  ;;  %v9755_v44 = vpack.c.bf16 %v6849_v35, %v6848_v25  ;;  %v2111_v1 = vor.u32 %v2110_v50, %v2106_v51  ;;  %v9803_v19 = vpack.c.bf16 %v6864_v4, %v6863_v58  ;;  %v6866_v51 = vld [vmem:[%s9123_s6 + $0x108] sm:$0xff]  ;;  %v6867_v50 = vld [vmem:[%s9123_s6 + $0x110] sm:$0xff]  ;;  %v6872_v58 = vld [vmem:[%s9123_s6 + $0x138] sm:$0xff] }
  0xda   : > { %v2115_v47 = vrot.slane %v2113_v40, 1  ;;  %v6868_v40 = vld [vmem:[%s9123_s6 + $0x118] sm:$0x3] }
  0xdb   : > { %v2120_v62 = vshll.u32 %v9755_v44, 16  ;;  %v2118_v30 = vshrl.u32 %v9755_v44, 16 }
  0xdc   : > { %v2116_v11 = vsel %vm280_vm0, %v2111_v1, %v2115_v47  ;;  %v2345_v1 = vrot.slane %v9803_v19, 1  ;;  %v2346_v47 = vrot.slane %v9805_v63, 1 }
  0xdd   : > { %v2122_v7 = vrot.slane %v2120_v62, 1 }
  0xde   : > { %8163 = vmatmul.mubr.bf16.gmra.mrb[88].mxu0 %v996_v2  ;;  %v2330_v2 = vrot.slane %v9755_v44, 1 }
  0xdf   : > { %8166 = vmatprep.mubr.bf16.mxu0 %v999_v24  ;;  %v6854_v24 = vld [vmem:[%s9123_s6 + $0xa8] sm:$0xff]  ;;  %v2123_v52 = vor.u32 %v2122_v7, %v2118_v30  ;;  %v2149_v30 = vshll.u32 %v9775_v36, 16 }
  0xe0   : > { %8211 = vmatmul.mubr.bf16.gmra.mrb[88].mxu1 %v563_v27  ;;  %v6858_v27 = vld [vmem:[%s9123_s6 + $0xc8] sm:$0xff]  ;;  %v2332_v59 = vsel %vm521_vm1, %v2330_v2, %v2331_v12  ;;  %v9773_v61 = vpack.c.bf16 %v6855_v14, %v6854_v24  ;;  %v9815_v2 = vpack.c.bf16 %v6867_v50, %v6866_v51  ;;  %v9817_v12 = vpack.c.bf16 %v6868_v40, %v6868_v40  ;;  %v6871_v24 = vld [vmem:[%s9123_s6 + $0x130] sm:$0x3] }
  0xe1   : > { %8214 = vmatprep.mubr.bf16.mxu1 %v566_v28  ;;  %v6859_v28 = vld [vmem:[%s9123_s6 + $0xd0] sm:$0x3]  ;;  %v9779_v0 = vpack.c.bf16 %v6858_v27, %v6857_v54  ;;  %v2128_v42 = vsel %vm280_vm0, %v2123_v52, %v2127_v31  ;;  %v2347_v31 = vsel %vm521_vm1, %v2345_v1, %v2346_v47  ;;  %v9857_v1 = vpack.c.bf16 %v6873_v26, %v6872_v58 }
  0xe2   : > { %v9859_v47 = vpack.c.bf16 %v6874_v48, %v6874_v48 }
  0xe3   : > { %v2339_v38 = vrot.slane %v9779_v0, 1 }
  0xe6   : > { %8167 = vmatmul.mubr.bf16.gmra.mrb[92].mxu0 %v1002_v21  ;;  %v9781_v21 = vpack.c.bf16 %v6859_v28, %v6859_v28  ;;  %v2142_v28 = vshrl.u32 %v9773_v61, 16 }
  0xe7   : > { %2610 = vmatprep.mubr.bf16.mxu0 %v2092_v46  ;;  %v2336_v46 = vrot.slane %v9773_v61, 1 }
  0xe8   : > { %8215 = vmatmul.mubr.bf16.gmra.mrb[92].mxu1 %v569_v56  ;;  %v2340_v55 = vrot.slane %v9781_v21, 1  ;;  %v6861_v56 = vld [vmem:[%s9123_s6 + $0xe0] sm:$0xff] }
  0xe9   : > { %8234 = vmatprep.mubr.bf16.mxu1 %v2323_v10  ;;  %v6862_v10 = vld [vmem:[%s9123_s6 + $0xe8] sm:$0x3]  ;;  %v9797_v25 = vpack.c.bf16 %v6861_v56, %v6860_v60  ;;  %v2151_v60 = vrot.slane %v2149_v30, 1  ;;  %v2156_v56 = vshll.u32 %v9779_v0, 16  ;;  %v6880_v30 = vld [vmem:[%s9123_s6 + $0x178] sm:$0x3] }
  0xea   : > { %v9799_v35 = vpack.c.bf16 %v6862_v10, %v6862_v10  ;;  %v2341_v13 = vsel %vm521_vm1, %v2339_v38, %v2340_v55  ;;  %v2349_v38 = vrot.slane %v9817_v12, 1 }
  0xec   : > { %v2173_v26 = vshll.u32 %v9799_v35, 16 }
  0xee   : > { %2611 = vmatmul.mubr.bf16.vlgmr.msra.gmra.mrb[96].mxu0 %v9700_v53  ;;  %v2333_v53 = vrot.slane %v9759_v37, 1 }
  0xef   : > { %2618 = vmatprep.mubr.bf16.mxu0 %v2104_v17  ;;  %v2139_v17 = vrot.slane %v2137_v9, 1 }
  0xf0   : > { %8235 = vmatmul.mubr.bf16.vlgmr.msra.gmra.mrb[64].mxu1 %v2326_v43  ;;  %v2335_v45 = vsel %vm521_vm1, %v2333_v53, %v2334_v49  ;;  %v2144_v43 = vshll.u32 %v9773_v61, 16  ;;  %v6869_v53 = vld [vmem:[%s9123_s6 + $0x120] sm:$0xff]  ;;  %v6870_v49 = vld [vmem:[%s9123_s6 + $0x128] sm:$0xff] }
  0xf1   : > { %8238 = vmatprep.mubr.bf16.mxu1 %v2329_v39  ;;  %v2343_v39 = vrot.slane %v9799_v35, 1  ;;  %v2140_v27 = vsel %vm280_vm0, %v2135_v22, %v2139_v17  ;;  %v9834_v29 = vpack.c.bf16 %v6870_v49, %v6869_v53  ;;  %v6876_v22 = vld [vmem:[%s9123_s6 + $0x158] sm:$0xff]  ;;  %v6877_v17 = vld [vmem:[%s9123_s6 + $0x160] sm:$0x3] }
  0xf3   : > { %v2351_v20 = vrot.slane %v9834_v29, 1 }
  0xf6   : > { %2619 = vmatmul.mubr.bf16.gmra.mrb[100].mxu0 %v9722_v5  ;;  %v2337_v5 = vrot.slane %v9775_v36, 1  ;;  %v2348_v36 = vrot.slane %v9815_v2, 1 }
  0xf7   : > { %2626 = vmatprep.mubr.bf16.mxu0 %v2116_v11  ;;  %v2146_v11 = vrot.slane %v2144_v43, 1 }
  0xf8   : > { %8239 = vmatmul.mubr.bf16.gmra.mrb[68].mxu1 %v2332_v59  ;;  %v2338_v18 = vsel %vm521_vm1, %v2336_v46, %v2337_v5  ;;  %v9836_v46 = vpack.c.bf16 %v6871_v24, %v6871_v24 }
  0xf9   : > { %8242 = vmatprep.mubr.bf16.mxu1 %v2335_v45 }
  0xfe   : > { %2627 = vmatmul.mubr.bf16.gmra.mrb[104].mxu0 %v9741_v32  ;;  %v2342_v32 = vrot.slane %v9797_v25, 1 }
  0xff   : > { %2634 = vmatprep.mubr.bf16.mxu0 %v2128_v42  ;;  %v2352_v42 = vrot.slane %v9836_v46, 1 }
 0x100   : > { %8243 = vmatmul.mubr.bf16.gmra.mrb[72].mxu1 %v2338_v18  ;;  %v2344_v33 = vsel %vm521_vm1, %v2342_v32, %v2343_v39  ;;  %v2350_v18 = vsel %vm521_vm1, %v2348_v36, %v2349_v38  ;;  %v2158_v32 = vrot.slane %v2156_v56, 1  ;;  %v2161_v39 = vshll.u32 %v9781_v21, 16 }
 0x101   : > { %v7322_v57 = vpop.f32.mrb[0].mxu0  ;;  %8246 = vmatprep.mubr.bf16.mxu1 %v2341_v13  ;;  %v6875_v13 = vld [vmem:[%s9123_s6 + $0x150] sm:$0xff]  ;;  %v2353_v24 = vsel %vm521_vm1, %v2351_v20, %v2352_v42  ;;  %v2166_v20 = vshrl.u32 %v9797_v25, 16 }
 0x102   : > { %v7323_v16 = vpop.f32.mrb[1].mxu0 }
 0x103   : > { %v7325_v62 = vpop.f32.mrb[2].mxu0  ;;  %v7458_v14 = vpop.f32.mrb[0].mxu1  ;;  %v9822_v23 = vadd.f32 %v7323_v16, %v7322_v57  ;;  %v2154_v57 = vshrl.u32 %v9779_v0, 16 }
 0x104   : > { %v7326_v54 = vpop.f32.mrb[3].mxu0  ;;  %v7459_v7 = vpop.f32.mrb[1].mxu1 }
 0x105   : > { %v9828_v59 = vadd.f32 %v7459_v7, %v7458_v14  ;;  %v7461_v45 = vpop.f32.mrb[2].mxu1  ;;  %v9830_v52 = vadd.f32 %v7326_v54, %v7325_v62  ;;  %v9867_v14 = vpack.c.bf16 %v6876_v22, %v6875_v13  ;;  %v9869_v54 = vpack.c.bf16 %v6877_v17, %v6877_v17 }
 0x106   : > { %2635 = vmatmul.mubr.bf16.gmra.mrb[108].mxu0 %v9755_v44  ;;  %v7462_v5 = vpop.f32.mrb[3].mxu1  ;;  %v2147_v44 = vor.u32 %v2146_v11, %v2142_v28  ;;  %v2159_v28 = vor.u32 %v2158_v32, %v2154_v57  ;;  %v2163_v11 = vrot.slane %v2161_v39, 1  ;;  %v2168_v7 = vshll.u32 %v9797_v25, 16 }
 0x107   : > { %2642 = vmatprep.mubr.bf16.mxu0 %v2140_v27  ;;  %v9840_v55 = vadd.f32 %v7462_v5, %v7461_v45  ;;  %v2355_v45 = vrot.slane %v9859_v47, 1  ;;  %v2357_v5 = vrot.slane %v9867_v14, 1  ;;  %v2358_v36 = vrot.slane %v9869_v54, 1 }
 0x108   : > { %8247 = vmatmul.mubr.bf16.gmra.mrb[76].mxu1 %v2344_v33  ;;  %v2152_v43 = vsel %vm280_vm0, %v2147_v44, %v2151_v60  ;;  %v9879_v44 = vpack.c.bf16 %v6880_v30, %v6880_v30  ;;  %v6883_v60 = vld [vmem:[%s9123_s6 + $0x190] sm:$0x3]  ;;  %v2170_v42 = vrot.slane %v2168_v7, 1  ;;  %v2175_v32 = vrot.slane %v2173_v26, 1 }
 0x109   : > { %v7328_v10 = vpop.f32.mrb[4].mxu0  ;;  %8250 = vmatprep.mubr.bf16.mxu1 %v2347_v31  ;;  %v2359_v17 = vsel %vm521_vm1, %v2357_v5, %v2358_v36  ;;  %v2180_v39 = vshll.u32 %v9803_v19, 16  ;;  %v2185_v36 = vshll.u32 %v9805_v63, 16 }
 0x10a   : > { %v7329_v4 = vpop.f32.mrb[5].mxu0  ;;  %v2361_v35 = vrot.slane %v9879_v44, 1  ;;  %v2171_v57 = vor.u32 %v2170_v42, %v2166_v20 }
 0x10b   : > { %v7331_v9 = vpop.f32.mrb[6].mxu0  ;;  %v7464_v51 = vpop.f32.mrb[4].mxu1  ;;  %v9852_v50 = vadd.f32 %v7329_v4, %v7328_v10  ;;  %v2164_v4 = vsel %vm280_vm0, %v2159_v28, %v2163_v11  ;;  %v6886_v28 = vld [vmem:[%s9123_s6 + $0x1a8] sm:$0x3]  ;;  %v2182_v5 = vrot.slane %v2180_v39, 1 }
 0x10c   : > { %v7332_v40 = vpop.f32.mrb[7].mxu0  ;;  %v7465_v16 = vpop.f32.mrb[5].mxu1  ;;  %v2362_v30 = vsel %vm521_vm1, %v9708_v3, %v2361_v35 }
 0x10d   : > { %v9861_v62 = vadd.f32 %v7465_v16, %v7464_v51  ;;  %v7467_v53 = vpop.f32.mrb[6].mxu1  ;;  %v9863_v49 = vadd.f32 %v7332_v40, %v7331_v9  ;;  %v9894_v51 = vpack.c.bf16 %v6883_v60, %v6883_v60 }
 0x10e   : > { %2643 = vmatmul.mubr.bf16.gmra.mrb[112].mxu0 %v9759_v37  ;;  %v7468_v21 = vpop.f32.mrb[7].mxu1  ;;  %v2354_v37 = vrot.slane %v9857_v1, 1 }
 0x10f   : > { %2650 = vmatprep.mubr.bf16.mxu0 %v2152_v43  ;;  %v9871_v27 = vadd.f32 %v7468_v21, %v7467_v53  ;;  %v2364_v53 = vrot.slane %v9894_v51, 1  ;;  %v6885_v21 = vld [vmem:[%s9123_s6 + $0x1a0] sm:$0xff] }
 0x110   : > { %8251 = vmatmul.mubr.bf16.gmra.mrb[80].mxu1 %v2350_v18  ;;  %v2356_v9 = vsel %vm521_vm1, %v2354_v37, %v2355_v45  ;;  %v2176_v45 = vsel %vm280_vm0, %v2171_v57, %v2175_v32 }
 0x111   : > { %v7334_v33 = vpop.f32.mrb[8].mxu0  ;;  %8254 = vmatprep.mubr.bf16.mxu1 %v2353_v24  ;;  %v6884_v24 = vld [vmem:[%s9123_s6 + $0x198] sm:$0xff]  ;;  %v2365_v20 = vsel %vm521_vm1, %v1000_v34, %v2364_v53  ;;  %v2197_v53 = vshll.u32 %v9817_v12, 16 }
 0x112   : > { %v7335_v31 = vpop.f32.mrb[9].mxu0  ;;  %v9911_v60 = vpack.c.bf16 %v6885_v21, %v6884_v24 }
 0x113   : > { %v7337_v38 = vpop.f32.mrb[10].mxu0  ;;  %v7470_v56 = vpop.f32.mrb[8].mxu1  ;;  %v9882_v10 = vadd.f32 %v7335_v31, %v7334_v33  ;;  %v2178_v31 = vshrl.u32 %v9803_v19, 16 }
 0x114   : > { %v7338_v58 = vpop.f32.mrb[11].mxu0  ;;  %v7471_v48 = vpop.f32.mrb[9].mxu1 }
 0x115   : > { %v9888_v18 = vadd.f32 %v7471_v48, %v7470_v56  ;;  %v7473_v13 = vpop.f32.mrb[10].mxu1  ;;  %v9890_v22 = vadd.f32 %v7338_v58, %v7337_v38  ;;  %v9913_v56 = vpack.c.bf16 %v6886_v28, %v6886_v28  ;;  %v2183_v63 = vor.u32 %v2182_v5, %v2178_v31 }
 0x116   : > { %2651 = vmatmul.mubr.bf16.gmra.mrb[116].mxu0 %v9773_v61  ;;  %v7474_v40 = vpop.f32.mrb[11].mxu1  ;;  %v2187_v48 = vrot.slane %v2185_v36, 1  ;;  %v2199_v31 = vrot.slane %v2197_v53, 1  ;;  %v2204_v5 = vshll.u32 %v9834_v29, 16 }
 0x117   : > { %2658 = vmatprep.mubr.bf16.mxu0 %v2164_v4  ;;  %v9897_v43 = vadd.f32 %v7474_v40, %v7473_v13  ;;  %v2367_v40 = vrot.slane %v9913_v56, 1 }
 0x118   : > { %8255 = vmatmul.mubr.bf16.gmra.mrb[84].mxu1 %v2356_v9  ;;  %v2192_v9 = vshll.u32 %v9815_v2, 16  ;;  %v2188_v39 = vsel %vm280_vm0, %v2183_v63, %v2187_v48  ;;  %v2206_v48 = vrot.slane %v2204_v5, 1 }
 0x119   : > { %v7340_v16 = vpop.f32.mrb[12].mxu0  ;;  %8258 = vmatprep.mubr.bf16.mxu1 %v2359_v17  ;;  %v2366_v17 = vrot.slane %v9911_v60, 1 }
 0x11a   : > { %v7341_v61 = vpop.f32.mrb[13].mxu0 }
 0x11b   : > { %v7343_v11 = vpop.f32.mrb[14].mxu0  ;;  %v7476_v7 = vpop.f32.mrb[12].mxu1  ;;  %v9906_v33 = vadd.f32 %v7341_v61, %v7340_v16  ;;  %v2190_v16 = vshrl.u32 %v9815_v2, 16  ;;  %v2194_v61 = vrot.slane %v2192_v9, 1  ;;  %v2368_v21 = vsel %vm521_vm1, %v2366_v17, %v2367_v40 }
 0x11c   : > { %v7344_v37 = vpop.f32.mrb[15].mxu0  ;;  %v7477_v38 = vpop.f32.mrb[13].mxu1  ;;  %v2209_v9 = vshll.u32 %v9836_v46, 16 }
 0x11d   : > { %v9915_v58 = vadd.f32 %v7477_v38, %v7476_v7  ;;  %v7479_v4 = vpop.f32.mrb[14].mxu1  ;;  %v9917_v3 = vadd.f32 %v7344_v37, %v7343_v11 }
 0x11e   : > { %2659 = vmatmul.mubr.bf16.gmra.mrb[120].mxu0 %v9779_v0  ;;  %v7480_v42 = vpop.f32.mrb[15].mxu1 }
 0x11f   : > { %2666 = vmatprep.mubr.bf16.mxu0 %v2176_v45  ;;  %v9923_v26 = vadd.f32 %v7480_v42, %v7479_v4  ;;  %v2195_v45 = vor.u32 %v2194_v61, %v2190_v16  ;;  %v2216_v16 = vshll.u32 %v9857_v1, 16 }
 0x120   : > { %8259 = vmatmul.mubr.bf16.gmra.mrb[88].mxu1 %v2362_v30 }
 0x121   : > { %v7346_v13 = vpop.f32.mrb[16].mxu0  ;;  %8262 = vmatprep.mubr.bf16.mxu1 %v2365_v20  ;;  %v2200_v63 = vsel %vm280_vm0, %v2195_v45, %v2199_v31  ;;  %v2214_v45 = vshrl.u32 %v9857_v1, 16  ;;  %v2221_v31 = vshll.u32 %v9859_v47, 16 }
 0x122   : > { %v7347_v0 = vpop.f32.mrb[17].mxu0 }
 0x123   : > { %v7349_v35 = vpop.f32.mrb[18].mxu0  ;;  %v7482_v57 = vpop.f32.mrb[16].mxu1  ;;  %v9928_v32 = vadd.f32 %v7347_v0, %v7346_v13 }
 0x124   : > { %v7350_v34 = vpop.f32.mrb[19].mxu0  ;;  %v7483_v24 = vpop.f32.mrb[17].mxu1 }
 0x125   : > { %v9934_v28 = vadd.f32 %v7483_v24, %v7482_v57  ;;  %v7485_v11 = vpop.f32.mrb[18].mxu1  ;;  %v9936_v30 = vadd.f32 %v7350_v34, %v7349_v35 }
 0x126   : > { %2667 = vmatmul.mubr.bf16.gmra.mrb[124].mxu0 %v9797_v25  ;;  %v7486_v7 = vpop.f32.mrb[19].mxu1  ;;  %v2202_v25 = vshrl.u32 %v9834_v29, 16 }
 0x127   : > { %2674 = vmatprep.mubr.bf16.mxu0 %v2188_v39  ;;  %v9939_v37 = vadd.f32 %v7486_v7, %v7485_v11  ;;  %v2211_v39 = vrot.slane %v2209_v9, 1 }
 0x128   : > { %8263 = vmatmul.mubr.bf16.gmra.mrb[92].mxu1 %v2368_v21  ;;  %v2207_v34 = vor.u32 %v2206_v48, %v2202_v25  ;;  %v2223_v25 = vrot.slane %v2221_v31, 1  ;;  %v2228_v48 = vshll.u32 %v9867_v14, 16 }
 0x129   : > { %v7352_v12 = vpop.f32.mrb[20].mxu0 }
 0x12a   : > { %v7353_v36 = vpop.f32.mrb[21].mxu0  ;;  %v2212_v7 = vsel %vm280_vm0, %v2207_v34, %v2211_v39 }
 0x12b   : > { %v7355_v38 = vpop.f32.mrb[22].mxu0  ;;  %v7488_v4 = vpop.f32.mrb[20].mxu1  ;;  %v9942_v20 = vadd.f32 %v7353_v36, %v7352_v12 }
 0x12c   : > { %v7356_v42 = vpop.f32.mrb[23].mxu0  ;;  %v7489_v13 = vpop.f32.mrb[21].mxu1 }
 0x12d   : > { %v9947_v17 = vadd.f32 %v7489_v13, %v7488_v4  ;;  %v7491_v40 = vpop.f32.mrb[22].mxu1  ;;  %v9949_v0 = vadd.f32 %v7356_v42, %v7355_v38 }
 0x12e   : > { %2675 = vmatmul.mubr.bf16.gmra.mrb[128].mxu0 %v9803_v19  ;;  %v7492_v35 = vpop.f32.mrb[23].mxu1  ;;  %v2218_v19 = vrot.slane %v2216_v16, 1  ;;  %v2226_v16 = vshrl.u32 %v9867_v14, 16 }
 0x12f   : > { %2682 = vmatprep.mubr.bf16.mxu0 %v2200_v63  ;;  %v9952_v57 = vadd.f32 %v7492_v35, %v7491_v40 }
 0x130   : > { %v2219_v63 = vor.u32 %v2218_v19, %v2214_v45 }
 0x131   : > { %v7358_v61 = vpop.f32.mrb[24].mxu0 }
 0x132   : > { %v7359_v53 = vpop.f32.mrb[25].mxu0  ;;  %v2224_v39 = vsel %vm280_vm0, %v2219_v63, %v2223_v25 }
 0x133   : > { %v7361_v24 = vpop.f32.mrb[26].mxu0  ;;  %v7494_v46 = vpop.f32.mrb[24].mxu1  ;;  %v9955_v21 = vadd.f32 %v7359_v53, %v7358_v61  ;;  %v2233_v61 = vshll.u32 %v9869_v54, 16 }
 0x134   : > { %v7362_v11 = vpop.f32.mrb[27].mxu0  ;;  %v7495_v5 = vpop.f32.mrb[25].mxu1 }
 0x135   : > { %v9960_v12 = vadd.f32 %v7495_v5, %v7494_v46  ;;  %v7497_v36 = vpop.f32.mrb[26].mxu1  ;;  %v9962_v38 = vadd.f32 %v7362_v11, %v7361_v24  ;;  %v2235_v31 = vrot.slane %v2233_v61, 1 }
 0x136   : > { %2683 = vmatmul.mubr.bf16.gmra.mrb[132].mxu0 %v9815_v2  ;;  %v7498_v4 = vpop.f32.mrb[27].mxu1  ;;  %v2230_v2 = vrot.slane %v2228_v48, 1 }
 0x137   : > { %2690 = vmatprep.mubr.bf16.mxu0 %v2212_v7  ;;  %v9965_v42 = vadd.f32 %v7498_v4, %v7497_v36 }
 0x138   : > { %v2231_v19 = vor.u32 %v2230_v2, %v2226_v16 }
 0x139   : > { %v7364_v9 = vpop.f32.mrb[28].mxu0 }
 0x13a   : > { %v7365_v13 = vpop.f32.mrb[29].mxu0  ;;  %v2236_v48 = vsel %vm280_vm0, %v2231_v19, %v2235_v31  ;;  %v2257_v31 = vshll.u32 %v9894_v51, 16 }
 0x13b   : > { %v7367_v40 = vpop.f32.mrb[30].mxu0  ;;  %v7500_v47 = vpop.f32.mrb[28].mxu1  ;;  %v9968_v35 = vadd.f32 %v7365_v13, %v7364_v9  ;;  %v2245_v9 = vshll.u32 %v9879_v44, 16 }
 0x13c   : > { %v7368_v34 = vpop.f32.mrb[31].mxu0  ;;  %v7501_v53 = vpop.f32.mrb[29].mxu1  ;;  %v2259_v51 = vrot.slane %v2257_v31, 1 }
 0x13d   : > { %v9973_v24 = vadd.f32 %v7501_v53, %v7500_v47  ;;  %v7503_v46 = vpop.f32.mrb[30].mxu1  ;;  %v9975_v11 = vadd.f32 %v7368_v34, %v7367_v40  ;;  %v2247_v16 = vrot.slane %v2245_v9, 1  ;;  %v2264_v9 = vshll.u32 %v9911_v60, 16 }
 0x13e   : > { %2691 = vmatmul.mubr.bf16.gmra.mrb[136].mxu0 %v9834_v29  ;;  %v7504_v7 = vpop.f32.mrb[31].mxu1 }
 0x13f   : > { %2698 = vmatprep.mubr.bf16.mxu0 %v2224_v39  ;;  %v9978_v45 = vadd.f32 %v7504_v7, %v7503_v46  ;;  %v2248_v19 = vsel %vm280_vm0, %v9574_v6, %v2247_v16  ;;  %v8816_v16 = vld [vmem:[%s11617_s2 + $0xc8] sm:$0xff]   ;;  %v2266_v31 = vrot.slane %v2264_v9, 1 }
 0x141   : > { %v7370_v5 = vpop.f32.mrb[32].mxu0 }
 0x142   : > { %v7371_v36 = vpop.f32.mrb[33].mxu0 }
 0x143   : > { %v9980_v4 = vadd.f32 %v7371_v36, %v7370_v5  ;;  %v7373_v63 = vpop.f32.mrb[34].mxu0  ;;  %v7506_v54 = vpop.f32.mrb[32].mxu1 }
 0x144   : > { %v7374_v25 = vpop.f32.mrb[35].mxu0  ;;  %v7507_v13 = vpop.f32.mrb[33].mxu1 }
 0x145   : > { %v9984_v40 = vadd.f32 %v7374_v25, %v7373_v63  ;;  %v9986_v29 = vadd.f32 %v7507_v13, %v7506_v54  ;;  %v7509_v47 = vpop.f32.mrb[34].mxu1  ;;  %v8812_v54 = vld [vmem:[%s11617_s2 + $0x100] sm:$0xff]  }
 0x146   : > { %2699 = vmatmul.mubr.bf16.gmra.mrb[140].mxu0 %v9857_v1  ;;  %v7510_v34 = vpop.f32.mrb[35].mxu1  ;;  %7714 = vmatprep.subr.bf16.mxu0 %v8812_v54  ;;  %v8814_v13 = vld [vmem:[%s11617_s2 + $0x140] sm:$0xff]   ;;  %v8817_v54 = vld [vmem:[%s11617_s2 + $0x148] sm:$0xff]  }
 0x147   : > { %2706 = vmatprep.mubr.bf16.mxu0 %v2236_v48  ;;  %v9989_v39 = vadd.f32 %v7510_v34, %v7509_v47  ;;  %v8813_v48 = vld [vmem:[%s11617_s2 + $0xc0] sm:$0xff]   ;;  %8266 = vmatprep.subr.bf16.mxu1 %v8814_v13 }
 0x148   : > { %7715 = vmatpush3.bf16.msra.mxu0 %v8813_v48  ;;  %8267 = vmatpush3.bf16.msra.mxu1 %v8814_v13 }
 0x149   : > { %v7376_v2 = vpop.f32.mrb[36].mxu0  ;;  %8268 = vmatprep.subr.bf16.mxu1 %v8817_v54 }
 0x14a   : > { %v7377_v61 = vpop.f32.mrb[37].mxu0 }
 0x14b   : > { %v9991_v53 = vadd.f32 %v7377_v61, %v7376_v2  ;;  %v7379_v46 = vpop.f32.mrb[38].mxu0  ;;  %v7512_v7 = vpop.f32.mrb[36].mxu1 }
 0x14c   : > { %v7380_v44 = vpop.f32.mrb[39].mxu0  ;;  %v7513_v5 = vpop.f32.mrb[37].mxu1  ;;  %8269 = vmatpush3.bf16.msra.mxu1 %v8817_v54  ;;  %v8823_v54 = vld [vmem:[%s11617_s2 + $0x158] sm:$0xff]  }
 0x14d   : > { %v9996_v36 = vadd.f32 %v7380_v44, %v7379_v46  ;;  %v9998_v1 = vadd.f32 %v7513_v5, %v7512_v7  ;;  %v7515_v63 = vpop.f32.mrb[38].mxu1  ;;  %v2260_v44 = vsel %vm280_vm0, %v9589_v8, %v2259_v51  ;;  %v2269_v5 = vshll.u32 %v9913_v56, 16  ;;  %v8818_v8 = vld [vmem:[%s11617_s2 + $0x110] sm:$0xff]  }
 0x14e   : > { %2707 = vmatmul.mubr.bf16.gmra.mrb[144].mxu0 %v9867_v14  ;;  %v7516_v25 = vpop.f32.mrb[39].mxu1  ;;  %v8815_v14 = vld [vmem:[%s11617_s2 + $0x108] sm:$0xff]   ;;  %v8819_v56 = vld [vmem:[%s11617_s2 + $0xd0] sm:$0xff]  }
 0x14f   : > { %2714 = vmatprep.mubr.bf16.mxu0 %v2248_v19  ;;  %v10007_v6 = vadd.f32 %v7516_v25, %v7515_v63  ;;  %7716 = vmatprep.subr.bf16.mxu0 %v8815_v14  ;;  %v2262_v19 = vshrl.u32 %v9911_v60, 16  ;;  %v2271_v14 = vrot.slane %v2269_v5, 1 }
 0x150   : > { %7717 = vmatpush3.bf16.msra.mxu0 %v8816_v16 }
 0x151   : > { %v7382_v47 = vpop.f32.mrb[40].mxu0  ;;  %7718 = vmatprep.subr.bf16.mxu0 %v8818_v8 }
 0x152   : > { %v7383_v34 = vpop.f32.mrb[41].mxu0 }
 0x153   : > { %v10019_v2 = vadd.f32 %v7383_v34, %v7382_v47  ;;  %v7385_v61 = vpop.f32.mrb[42].mxu0  ;;  %v7518_v46 = vpop.f32.mrb[40].mxu1  ;;  %v2267_v47 = vor.u32 %v2266_v31, %v2262_v19  ;;  %v8820_v34 = vld [vmem:[%s11617_s2 + $0x150] sm:$0xff]  }
 0x154   : > { %v7386_v7 = vpop.f32.mrb[43].mxu0  ;;  %v7519_v63 = vpop.f32.mrb[41].mxu1  ;;  %7719 = vmatpush3.bf16.msra.mxu0 %v8819_v56  ;;  %8270 = vmatprep.subr.bf16.mxu1 %v8820_v34  ;;  %v8824_v56 = vld [vmem:[%s11617_s2 + $0x120] sm:$0xff]  }
 0x155   : > { %v10028_v25 = vadd.f32 %v7386_v7, %v7385_v61  ;;  %v10030_v48 = vadd.f32 %v7519_v63, %v7518_v46  ;;  %v7521_v13 = vpop.f32.mrb[42].mxu1  ;;  %v8822_v46 = vld [vmem:[%s11617_s2 + $0xd8] sm:$0xff]   ;;  %v2272_v5 = vsel %vm280_vm0, %v2267_v47, %v2271_v14  ;;  %8271 = vmatpush3.bf16.msra.mxu1 %v8820_v34  ;;  %v8825_v47 = vld [vmem:[%s11617_s2 + $0xe0] sm:$0xff]  }
 0x156   : > { %2715 = vmatmul.mubr.bf16.gmra.mrb[148].mxu0 %v9548_v15  ;;  %v7522_v51 = vpop.f32.mrb[43].mxu1  ;;  %v8821_v15 = vld [vmem:[%s11617_s2 + $0x118] sm:$0xff]   ;;  %8272 = vmatprep.subr.bf16.mxu1 %v8823_v54  ;;  %v8826_v34 = vld [vmem:[%s11617_s2 + $0x160] sm:$0xff]  }
 0x157   : > { %2722 = vmatprep.mubr.bf16.mxu0 %v2260_v44  ;;  %v10039_v9 = vadd.f32 %v7522_v51, %v7521_v13  ;;  %7720 = vmatprep.subr.bf16.mxu0 %v8821_v15 }
 0x158   : > { %7721 = vmatpush3.bf16.msra.mxu0 %v8822_v46  ;;  %v8828_v46 = vld [vmem:[%s11617_s2 + $0xe8] sm:$0xff]  }
 0x159   : > { %11622 = vst [vmem:[#allocation3_spill] sm:$0xff] %v10039_v9  ;;  %v7388_v16 = vpop.f32.mrb[44].mxu0  ;;  %7722 = vmatprep.subr.bf16.mxu0 %v8824_v56  ;;  %8273 = vmatpush3.bf16.msra.mxu1 %v8823_v54  ;;  %v8829_v54 = vld [vmem:[%s11617_s2 + $0x168] sm:$0xff]  }
 0x15a   : > { %v7389_v61 = vpop.f32.mrb[45].mxu0  ;;  %8274 = vmatprep.subr.bf16.mxu1 %v8826_v34 }
 0x15b   : > { %v10050_v7 = vadd.f32 %v7389_v61, %v7388_v16  ;;  %v7391_v44 = vpop.f32.mrb[46].mxu0  ;;  %v7524_v19 = vpop.f32.mrb[44].mxu1 }
 0x15c   : > { %v7392_v31 = vpop.f32.mrb[47].mxu0  ;;  %v7525_v63 = vpop.f32.mrb[45].mxu1  ;;  %7723 = vmatpush3.bf16.msra.mxu0 %v8825_v47  ;;  %v8830_v47 = vld [vmem:[%s11617_s2 + $0x130] sm:$0xff]  }
 0x15d   : > { %v10056_v13 = vadd.f32 %v7392_v31, %v7391_v44  ;;  %v10058_v8 = vadd.f32 %v7525_v63, %v7524_v19  ;;  %v7527_v51 = vpop.f32.mrb[46].mxu1  ;;  %8275 = vmatpush3.bf16.msra.mxu1 %v8826_v34  ;;  %v8831_v34 = vld [vmem:[%s11617_s2 + $0xf0] sm:$0xff]  }
 0x15e   : > { %2723 = vmatmul.mubr.bf16.gmra.mrb[152].mxu0 %v9567_v41  ;;  %v7528_v16 = vpop.f32.mrb[47].mxu1  ;;  %v8827_v41 = vld [vmem:[%s11617_s2 + $0x128] sm:$0xff]   ;;  %8276 = vmatprep.subr.bf16.mxu1 %v8829_v54 }
 0x15f   : > { %2730 = vmatprep.mubr.bf16.mxu0 %v2272_v5  ;;  %v10067_v14 = vadd.f32 %v7528_v16, %v7527_v51  ;;  %7724 = vmatprep.subr.bf16.mxu0 %v8827_v41 }
 0x160   : > { %7725 = vmatpush3.bf16.msra.mxu0 %v8828_v46 }
 0x161   : > { %11623 = vst [vmem:[#allocation4_spill] sm:$0xff] %v10067_v14  ;;  %v7394_v15 = vpop.f32.mrb[48].mxu0  ;;  %7726 = vmatprep.subr.bf16.mxu0 %v8830_v47  ;;  %8277 = vmatpush3.bf16.msra.mxu1 %v8829_v54 }
 0x162   : > { %v7395_v61 = vpop.f32.mrb[49].mxu0 }
 0x163   : > { %v10078_v44 = vadd.f32 %v7395_v61, %v7394_v15  ;;  %v7397_v19 = vpop.f32.mrb[50].mxu0  ;;  %v7530_v31 = vpop.f32.mrb[48].mxu1  ;;  %v8832_v61 = vld [vmem:[%s11617_s2 + $0x170] sm:$0xff]  }
 0x164   : > { %v7398_v5 = vpop.f32.mrb[51].mxu0  ;;  %v7531_v63 = vpop.f32.mrb[49].mxu1  ;;  %7727 = vmatpush3.bf16.msra.mxu0 %v8831_v34  ;;  %8278 = vmatprep.subr.bf16.mxu1 %v8832_v61 }
 0x165   : > { %11624 = vst [vmem:[#allocation5_spill] sm:$0xff] %v10078_v44  ;;  %v10083_v51 = vadd.f32 %v7398_v5, %v7397_v19  ;;  %v10085_v56 = vadd.f32 %v7531_v63, %v7530_v31  ;;  %v7533_v16 = vpop.f32.mrb[50].mxu1  ;;  %v8836_v31 = vld [vmem:[%s11617_s2 + $0xf8] sm:$0xff]   ;;  %8279 = vmatpush3.bf16.msra.mxu1 %v8832_v61 }
 0x166   : > { %2731 = vmatmul.mubr.bf16.gmra.mrb[156].mxu0 %v9911_v60  ;;  %v7534_v15 = vpop.f32.mrb[51].mxu1  ;;  %v8835_v60 = vld [vmem:[%s11617_s2 + $0x138] sm:$0xff]  }
 0x167   : > { %11625 = vst [vmem:[#allocation6_spill] sm:$0xff] %v10083_v51  ;;  %11626 = vst [vmem:[#allocation7_spill] sm:$0xff] %v10085_v56  ;;  %v10094_v41 = vadd.f32 %v7534_v15, %v7533_v16  ;;  %7728 = vmatprep.subr.bf16.mxu0 %v8835_v60 }
 0x168   : > { %7729 = vmatpush3.bf16.msra.mxu0 %v8836_v31 }
 0x169   : > { %11627 = vst [vmem:[#allocation8_spill] sm:$0xff] %v10094_v41  ;;  %v7400_v46 = vpop.f32.mrb[52].mxu0 }
 0x16a   : > { %v7401_v19 = vpop.f32.mrb[53].mxu0 }
 0x16b   : > { %v10105_v5 = vadd.f32 %v7401_v19, %v7400_v46  ;;  %v7403_v63 = vpop.f32.mrb[54].mxu0  ;;  %v7536_v54 = vpop.f32.mrb[52].mxu1  ;;  %v8837_v46 = vld [vmem:[%s11617_s2 + $0x178] sm:$0xff]  }
 0x16c   : > { %v7404_v16 = vpop.f32.mrb[55].mxu0  ;;  %v7537_v47 = vpop.f32.mrb[53].mxu1  ;;  %8280 = vmatprep.subr.bf16.mxu1 %v8837_v46 }
 0x16d   : > { %11628 = vst [vmem:[#allocation9_spill] sm:$0xff] %v10105_v5  ;;  %v10107_v15 = vadd.f32 %v7404_v16, %v7403_v63  ;;  %v10109_v34 = vadd.f32 %v7537_v47, %v7536_v54  ;;  %v7539_v41 = vpop.f32.mrb[54].mxu1  ;;  %8281 = vmatpush3.bf16.msra.mxu1 %v8837_v46 }
 0x16e   : > { %v7540_v51 = vpop.f32.mrb[55].mxu1 }
 0x16f   : > { %11629 = vst [vmem:[#allocation10_spill] sm:$0xff] %v10107_v15  ;;  %11630 = vst [vmem:[#allocation11_spill] sm:$0xff] %v10109_v34  ;;  %v10111_v56 = vadd.f32 %v7540_v51, %v7539_v41 }
 0x171   : > { %11631 = vst [vmem:[#allocation12_spill] sm:$0xff] %v10111_v56  ;;  %v7406_v19 = vpop.f32.mrb[56].mxu0 }
 0x172   : > { %v7407_v44 = vpop.f32.mrb[57].mxu0 }
 0x173   : > { %v10116_v60 = vadd.f32 %v7407_v44, %v7406_v19  ;;  %v7409_v5 = vpop.f32.mrb[58].mxu0  ;;  %v7542_v61 = vpop.f32.mrb[56].mxu1 }
 0x174   : > { %v7410_v31 = vpop.f32.mrb[59].mxu0  ;;  %v7543_v63 = vpop.f32.mrb[57].mxu1 }
 0x175   : > { %11632 = vst [vmem:[#allocation13_spill] sm:$0xff] %v10116_v60  ;;  %v10118_v54 = vadd.f32 %v7410_v31, %v7409_v5  ;;  %v10120_v16 = vadd.f32 %v7543_v63, %v7542_v61  ;;  %v7545_v51 = vpop.f32.mrb[58].mxu1 }
 0x176   : > { %v7546_v41 = vpop.f32.mrb[59].mxu1 }
 0x177   : > { %11633 = vst [vmem:[#allocation14_spill] sm:$0xff] %v10118_v54  ;;  %v10122_v47 = vadd.f32 %v7546_v41, %v7545_v51 }
 0x179   : > { %11634 = vst [vmem:[#allocation15_spill] sm:$0xff] %v10122_v47  ;;  %v7412_v56 = vpop.f32.mrb[60].mxu0 }
 0x17a   : > { %v7413_v15 = vpop.f32.mrb[61].mxu0 }
 0x17b   : > { %v10124_v34 = vadd.f32 %v7413_v15, %v7412_v56  ;;  %v7415_v9 = vpop.f32.mrb[62].mxu0  ;;  %v7548_v44 = vpop.f32.mrb[60].mxu1 }
 0x17c   : > { %v7416_v19 = vpop.f32.mrb[63].mxu0  ;;  %v7549_v60 = vpop.f32.mrb[61].mxu1 }
 0x17d   : > { %v10126_v14 = vadd.f32 %v7416_v19, %v7415_v9  ;;  %v10128_v46 = vadd.f32 %v7549_v60, %v7548_v44  ;;  %v7551_v5 = vpop.f32.mrb[62].mxu1 }
 0x17e   : > { %v7552_v31 = vpop.f32.mrb[63].mxu1 }
 0x17f   : > { %v10130_v61 = vadd.f32 %v7552_v31, %v7551_v5 }
 0x181   : > { %v8140_v63 = vpop.f32.mrb[64].mxu0 }
 0x182   : > { %v1416_v51 = vadd.f32 %v8140_v63, %v9852_v50  ;;  %v1407_v41 = vpop.f32.mrb[65].mxu0 }
 0x183   : > { %v1408_v47 = vadd.f32 %v9822_v23, %v1407_v41  ;;  %v8141_v56 = vpop.f32.mrb[66].mxu0 }
 0x184   : > { %v10135_v15 = vadd.f32 %v9861_v62, %v1416_v51  ;;  %v1419_v54 = vadd.f32 %v8141_v56, %v9863_v49  ;;  %v1410_v9 = vpop.f32.mrb[67].mxu0 }
 0x185   : > { %v10139_v60 = vadd.f32 %v9828_v59, %v1408_v47  ;;  %v1411_v44 = vadd.f32 %v9830_v52, %v1410_v9 }
 0x186   : > { %v10143_v19 = vadd.f32 %v9871_v27, %v1419_v54 }
 0x187   : > { %v10146_v50 = vadd.f32 %v9840_v55, %v1411_v44 }
 0x189   : > { %v8144_v5 = vpop.f32.mrb[68].mxu0 }
 0x18a   : > { %v1432_v23 = vadd.f32 %v8144_v5, %v9906_v33  ;;  %v1423_v31 = vpop.f32.mrb[69].mxu0 }
 0x18b   : > { %v1424_v62 = vadd.f32 %v9882_v10, %v1423_v31  ;;  %v8145_v63 = vpop.f32.mrb[70].mxu0 }
 0x18c   : > { %v10151_v49 = vadd.f32 %v9915_v58, %v1432_v23  ;;  %v1435_v59 = vadd.f32 %v8145_v63, %v9917_v3  ;;  %v1426_v47 = vpop.f32.mrb[71].mxu0 }
 0x18d   : > { %v10155_v52 = vadd.f32 %v9888_v18, %v1424_v62  ;;  %v1427_v27 = vadd.f32 %v9890_v22, %v1426_v47 }
 0x18e   : > { %v10159_v55 = vadd.f32 %v9923_v26, %v1435_v59 }
 0x18f   : > { %v10162_v33 = vadd.f32 %v9897_v43, %v1427_v27 }
 0x191   : > { %v8148_v54 = vpop.f32.mrb[72].mxu0 }
 0x192   : > { %v1448_v10 = vadd.f32 %v8148_v54, %v9942_v20  ;;  %v1439_v51 = vpop.f32.mrb[73].mxu0 }
 0x193   : > { %v1440_v58 = vadd.f32 %v9928_v32, %v1439_v51  ;;  %v8149_v41 = vpop.f32.mrb[74].mxu0 }
 0x194   : > { %v10167_v3 = vadd.f32 %v9947_v17, %v1448_v10  ;;  %v1451_v18 = vadd.f32 %v8149_v41, %v9949_v0  ;;  %v1442_v56 = vpop.f32.mrb[75].mxu0 }
 0x195   : > { %v10171_v22 = vadd.f32 %v9934_v28, %v1440_v58  ;;  %v1443_v26 = vadd.f32 %v9936_v30, %v1442_v56  ;;  %v11636_v58 = vld [vmem:[#allocation3_spill] sm:$0xff] }
 0x196   : > { %v10175_v43 = vadd.f32 %v9952_v57, %v1451_v18 }
 0x197   : > { %v10178_v20 = vadd.f32 %v9939_v37, %v1443_v26 }
 0x199   : > { %v8152_v9 = vpop.f32.mrb[76].mxu0 }
 0x19a   : > { %v1464_v32 = vadd.f32 %v8152_v9, %v9968_v35  ;;  %v1455_v44 = vpop.f32.mrb[77].mxu0 }
 0x19b   : > { %v1456_v17 = vadd.f32 %v9955_v21, %v1455_v44  ;;  %v8153_v5 = vpop.f32.mrb[78].mxu0 }
 0x19c   : > { %v10183_v0 = vadd.f32 %v9973_v24, %v1464_v32  ;;  %v1467_v28 = vadd.f32 %v8153_v5, %v9975_v11  ;;  %v1458_v23 = vpop.f32.mrb[79].mxu0 }
 0x19d   : > { %v10187_v30 = vadd.f32 %v9960_v12, %v1456_v17  ;;  %v1459_v57 = vadd.f32 %v9962_v38, %v1458_v23 }
 0x19e   : > { %v10191_v37 = vadd.f32 %v9978_v45, %v1467_v28  ;;  %v11642_v28 = vld [vmem:[#allocation6_spill] sm:$0xff] }
 0x19f   : > { %v10194_v35 = vadd.f32 %v9965_v42, %v1459_v57  ;;  %v11643_v57 = vld [vmem:[#allocation12_spill] sm:$0xff] }
 0x1a1   : > { %v8156_v31 = vpop.f32.mrb[80].mxu0 }
 0x1a2   : > { %v1480_v21 = vadd.f32 %v8156_v31, %v9991_v53  ;;  %v1471_v62 = vpop.f32.mrb[81].mxu0 }
 0x1a3   : > { %v1472_v24 = vadd.f32 %v9980_v4, %v1471_v62  ;;  %v8157_v63 = vpop.f32.mrb[82].mxu0 }
 0x1a4   : > { %v10199_v11 = vadd.f32 %v9998_v1, %v1480_v21  ;;  %v1483_v12 = vadd.f32 %v8157_v63, %v9996_v36  ;;  %v1474_v59 = vpop.f32.mrb[83].mxu0  ;;  %v11644_v21 = vld [vmem:[#allocation8_spill] sm:$0xff]  ;;  %v2932_v63 = vlaneseq }
 0x1a5   : > { %v10203_v38 = vadd.f32 %v9986_v29, %v1472_v24  ;;  %v1475_v45 = vadd.f32 %v9984_v40, %v1474_v59 }
 0x1a6   : > { %v10207_v42 = vadd.f32 %v10007_v6, %v1483_v12 }
 0x1a7   : > { %v10210_v53 = vadd.f32 %v9989_v39, %v1475_v45  ;;  %v11635_v39 = vld [vmem:[#allocation4_spill] sm:$0xff]  ;;  %v11645_v45 = vld [vmem:[#allocation13_spill] sm:$0xff] }
 0x1a9   : > { %v8160_v47 = vpop.f32.mrb[84].mxu0 }
 0x1aa   : > { %v1496_v4 = vadd.f32 %v8160_v47, %v10050_v7  ;;  %v1487_v27 = vpop.f32.mrb[85].mxu0 }
 0x1ab   : > { %v1488_v1 = vadd.f32 %v10019_v2, %v1487_v27  ;;  %v8161_v54 = vpop.f32.mrb[86].mxu0  ;;  %v11637_v2 = vld [vmem:[#allocation9_spill] sm:$0xff] }
 0x1ac   : > { %v10215_v36 = vadd.f32 %v10058_v8, %v1496_v4  ;;  %v1499_v29 = vadd.f32 %v8161_v54, %v10056_v13  ;;  %v1490_v10 = vpop.f32.mrb[87].mxu0  ;;  %v11638_v8 = vld [vmem:[#allocation5_spill] sm:$0xff]  ;;  %v11639_v13 = vld [vmem:[#allocation11_spill] sm:$0xff] }
 0x1ad   : > { %v10219_v40 = vadd.f32 %v10030_v48, %v1488_v1  ;;  %v1491_v6 = vadd.f32 %v10028_v25, %v1490_v10  ;;  %v11640_v48 = vld [vmem:[#allocation10_spill] sm:$0xff]  ;;  %v11641_v25 = vld [vmem:[#allocation7_spill] sm:$0xff] }
 0x1ae   : > { %v10223_v51 = vadd.f32 %v11635_v39, %v1499_v29  ;;  %v10253_v29 = vld [vmem:[%s11617_s2 + $0x80] sm:$0xff]   ;;  %v10259_v39 = vshrl.u32 %v2932_v63, 7 }
 0x1af   : > { %v10226_v7 = vadd.f32 %v11636_v58, %v1491_v6  ;;  %v11647_v6 = vld [vmem:[#allocation14_spill] sm:$0xff]  ;;  %8314 = vmatprep.subr.bf16.mxu1 %v10253_v29 }
 0x1b0   : > { %11648 = vst [vmem:[#allocation3_spill] sm:$0xff] %v10259_v39 }
 0x1b1   : > { %v8164_v41 = vpop.f32.mrb[88].mxu0 }
 0x1b2   : > { %v1512_v18 = vadd.f32 %v8164_v41, %v11637_v2  ;;  %v1503_v56 = vpop.f32.mrb[89].mxu0  ;;  %v2934_v2 = vsub.s32 0, %v10259_v39 }
 0x1b3   : > { %v1504_v26 = vadd.f32 %v11638_v8, %v1503_v56  ;;  %v8165_v9 = vpop.f32.mrb[90].mxu0 }
 0x1b4   : > { %v10231_v32 = vadd.f32 %v11639_v13, %v1512_v18  ;;  %v1515_v44 = vadd.f32 %v8165_v9, %v11640_v48  ;;  %v1506_v17 = vpop.f32.mrb[91].mxu0  ;;  %v2970_v9 = vsub.s32 1, %v10259_v39 }
 0x1b5   : > { %v10235_v5 = vadd.f32 %v11641_v25, %v1504_v26  ;;  %v1507_v23 = vadd.f32 %v11642_v28, %v1506_v17 }
 0x1b6   : > { %v10239_v31 = vadd.f32 %v11643_v57, %v1515_v44 }
 0x1b7   : > { %v10242_v62 = vadd.f32 %v11644_v21, %v1507_v23 }
 0x1b9   : > { %v8168_v24 = vpop.f32.mrb[92].mxu0 }
 0x1ba   : > { %v1528_v12 = vadd.f32 %v8168_v24, %v10124_v34  ;;  %v1519_v59 = vpop.f32.mrb[93].mxu0 }
 0x1bb   : > { %v1520_v47 = vadd.f32 %v11645_v45, %v1519_v59  ;;  %v8169_v4 = vpop.f32.mrb[94].mxu0 }
 0x1bc   : > { %v10247_v27 = vadd.f32 %v10128_v46, %v1528_v12  ;;  %v1531_v1 = vadd.f32 %v8169_v4, %v10126_v14  ;;  %v1522_v54 = vpop.f32.mrb[95].mxu0  ;;  %v11650_v46 = vld [vmem:[#allocation15_spill] sm:$0xff] }
 0x1bd   : > { %v10256_v10 = vadd.f32 %v10120_v16, %v1520_v47  ;;  %v1523_v34 = vadd.f32 %v11647_v6, %v1522_v54  ;;  %v199_v16 = vld [vmem:[%s11618_s3] sm:$0xff] }
 0x1be   : > { %11646 = vst [vmem:[#allocation4_spill] sm:$0xff] %v10247_v27  ;;  %v10262_v58 = vadd.f32 %v10130_v61, %v1531_v1  ;;  %v10274_v44 = vrot.slane %v199_v16, %v2934_v2  ;;  %v10276_v57 = vrot.slane %v199_v16, %v2970_v9 }
 0x1bf   : > { %v10266_v14 = vadd.f32 %v11650_v46, %v1523_v34 }
 0x1c0   : > { %11649 = vst [vmem:[#allocation9_spill] sm:$0xff] %v10262_v58 }
 0x1c1   : > { %11651 = vst [vmem:[#allocation5_spill] sm:$0xff] %v10266_v14  ;;  %v7594_v41 = vpop.f32.mrb[96].mxu0 }
 0x1c2   : > { %v7595_v18 = vpop.f32.mrb[97].mxu0 }
 0x1c3   : > { %v7596_v56 = vadd.f32 %v7595_v18, %v7594_v41  ;;  %v8236_v8 = vpop.f32.mrb[64].mxu1  ;;  %v7597_v26 = vpop.f32.mrb[98].mxu0 }
 0x1c4   : > { %v2773_v61 = vpop.f32.mrb[65].mxu1  ;;  %v7598_v13 = vpop.f32.mrb[99].mxu0 }
 0x1c5   : > { %v8416_v48 = vadd.f32 %v7596_v56, %v10139_v60  ;;  %v7599_v17 = vadd.f32 %v7598_v13, %v7597_v26  ;;  %v8237_v25 = vpop.f32.mrb[66].mxu1 }
 0x1c6   : > { %v2776_v28 = vpop.f32.mrb[67].mxu1 }
 0x1c7   : > { %v8417_v23 = vadd.f32 %v8416_v48, %v2773_v61  ;;  %v8424_v21 = vadd.f32 %v7599_v17, %v10146_v50 }
 0x1c9   : > { %v2936_v24 = vmul.f32 %v8417_v23, %v10274_v44  ;;  %v8425_v63 = vadd.f32 %v8424_v21, %v2776_v28  ;;  %v7600_v12 = vpop.f32.mrb[100].mxu0 }
 0x1ca   : > { %v7601_v59 = vpop.f32.mrb[101].mxu0 }
 0x1cb   : > { %v2972_v45 = vadd.f32 %v10276_v57, %v2936_v24  ;;  %v2937_v47 = vmul.f32 %v8425_v63, %v10274_v44  ;;  %v7602_v60 = vadd.f32 %v7601_v59, %v7600_v12  ;;  %v10282_v4 = vpop.f32.mrb[68].mxu1  ;;  %v7603_v1 = vpop.f32.mrb[102].mxu0 }
 0x1cc   : > { %v2789_v54 = vpop.f32.mrb[69].mxu1  ;;  %v7604_v6 = vpop.f32.mrb[103].mxu0 }
 0x1cd   : > { %v2973_v34 = vadd.f32 %v10276_v57, %v2937_v47  ;;  %v8412_v46 = vadd.f32 %v7602_v60, %v10135_v15  ;;  %v7605_v50 = vadd.f32 %v7604_v6, %v7603_v1  ;;  %v10286_v41 = vpop.f32.mrb[70].mxu1  ;;  %v3004_v18 = vmax.f32 %v2972_v45, 0.0  ;;  %v8867_v1 = vld [vmem:[%s11617_s2 + $0x40] sm:$0xff]  }
 0x1ce   : > { %v2792_v2 = vpop.f32.mrb[71].mxu1  ;;  %7850 = vmatprep.subr.bf16.mxu0 %v8867_v1 }
 0x1cf   : > { %v3005_v16 = vmax.f32 %v2973_v34, 0.0  ;;  %v8413_v56 = vadd.f32 %v8412_v46, %v8236_v8  ;;  %v8420_v26 = vadd.f32 %v7605_v50, %v10143_v19 }
 0x1d1   : > { %v3036_v9 = vpack.c.bf16 %v3005_v16, %v3004_v18  ;;  %v2938_v61 = vmul.f32 %v8413_v56, %v10274_v44  ;;  %v8421_v13 = vadd.f32 %v8420_v26, %v8237_v25  ;;  %v7606_v48 = vpop.f32.mrb[104].mxu0 }
 0x1d2   : > { %v7607_v17 = vpop.f32.mrb[105].mxu0 }
 0x1d3   : > { %v3060_v28 = vshrl.u32 %v3036_v9, 16  ;;  %v2974_v15 = vadd.f32 %v10276_v57, %v2938_v61  ;;  %v2939_v23 = vmul.f32 %v8421_v13, %v10274_v44  ;;  %v10292_v21 = vpop.f32.mrb[72].mxu1  ;;  %v7609_v24 = vpop.f32.mrb[106].mxu0  ;;  %v7608_v19 = vadd.f32 %v7607_v17, %v7606_v48 }
 0x1d4   : > { %v10298_v63 = vpop.f32.mrb[73].mxu1  ;;  %v7610_v12 = vpop.f32.mrb[107].mxu0  ;;  %v3063_v25 = vshll.u32 %v3036_v9, 16 }
 0x1d5   : > { %v3062_v59 = vrot.slane %v3060_v28, 7  ;;  %v2975_v45 = vadd.f32 %v10276_v57, %v2939_v23  ;;  %v7611_v47 = vadd.f32 %v7610_v12, %v7609_v24  ;;  %v10301_v60 = vpop.f32.mrb[74].mxu1  ;;  %v3006_v6 = vmax.f32 %v2974_v15, 0.0 }
 0x1d6   : > { %v8432_v34 = vadd.f32 %v7608_v19, %v10155_v52  ;;  %v10307_v46 = vpop.f32.mrb[75].mxu1 }
 0x1d7   : > { %v3065_v50 = vor.u32 %v3063_v25, %v3062_v59  ;;  %v3222_v18 = vsel %vm10294_vm4, %v3062_v59, 0  ;;  %v3007_v16 = vmax.f32 %v2975_v45, 0.0  ;;  %v8440_v56 = vadd.f32 %v7611_v47, %v10162_v33 }
 0x1d8   : > { %v6961_v26 = vcombine.low %v3222_v18, %v3222_v18  ;;  %v8433_v9 = vadd.f32 %v8432_v34, %v2789_v54 }
 0x1d9   : > { %v3206_v61 = vsel %vm10294_vm4, 0, %v3065_v50  ;;  %v3037_v13 = vpack.c.bf16 %v3007_v16, %v3006_v6  ;;  %v8441_v48 = vadd.f32 %v8440_v56, %v2792_v2  ;;  %v7612_v17 = vpop.f32.mrb[108].mxu0 }
 0x1da   : > { %v6959_v28 = vcombine.low %v3206_v61, %v3206_v61  ;;  %v6960_v52 = vcombine.high %v3206_v61, %v3206_v61  ;;  %3417 = vst [vmem:[#allocation2 + $0x14] sm:$0x1] %v6961_v26  ;;  %v2940_v15 = vmul.f32 %v8433_v9, %v10274_v44  ;;  %v7613_v23 = vpop.f32.mrb[109].mxu0 }
 0x1db   : > { %v3067_v24 = vshrl.u32 %v3037_v13, 16  ;;  %v2941_v19 = vmul.f32 %v8441_v48, %v10274_v44  ;;  %v7614_v12 = vadd.f32 %v7613_v23, %v7612_v17  ;;  %v10316_v33 = vpop.f32.mrb[76].mxu1  ;;  %v7615_v59 = vpop.f32.mrb[110].mxu0  ;;  %v3070_v54 = vshll.u32 %v3037_v13, 16 }
 0x1dc   : > { %3415 = vst [vmem:[#allocation2 + $0xc] sm:$0xf] %v6959_v28  ;;  %3416 = vst [vmem:[#allocation2 + $0x10] sm:$0xf] %v6960_v52  ;;  %v2976_v25 = vadd.f32 %v10276_v57, %v2940_v15  ;;  %v10319_v2 = vpop.f32.mrb[77].mxu1  ;;  %v7616_v45 = vpop.f32.mrb[111].mxu0 }
 0x1dd   : > { %v3069_v47 = vrot.slane %v3067_v24, 7  ;;  %v2977_v1 = vadd.f32 %v10276_v57, %v2941_v19  ;;  %v8428_v6 = vadd.f32 %v7614_v12, %v10151_v49  ;;  %v7617_v34 = vadd.f32 %v7616_v45, %v7615_v59  ;;  %v10323_v50 = vpop.f32.mrb[78].mxu1 }
 0x1de   : > { %v3008_v18 = vmax.f32 %v2976_v25, 0.0  ;;  %v10325_v16 = vpop.f32.mrb[79].mxu1 }
 0x1df   : > { %v3072_v56 = vor.u32 %v3070_v54, %v3069_v47  ;;  %v3223_v26 = vsel %vm10294_vm4, %v3069_v47, 0  ;;  %v3009_v9 = vmax.f32 %v2977_v1, 0.0  ;;  %v8429_v61 = vadd.f32 %v8428_v6, %v10282_v4 }
 0x1e0   : > { %v6964_v13 = vcombine.low %v3223_v26, %v3223_v26  ;;  %v8436_v48 = vadd.f32 %v7617_v34, %v10159_v55 }
 0x1e1   : > { %v3207_v17 = vsel %vm10294_vm4, 0, %v3072_v56  ;;  %v3038_v49 = vpack.c.bf16 %v3009_v9, %v3008_v18  ;;  %v2942_v28 = vmul.f32 %v8429_v61, %v10274_v44  ;;  %v7618_v52 = vpop.f32.mrb[112].mxu0  ;;  %v8834_v12 = vld [vmem:[#allocation2 + $0x14] ss:$0 sps:$4 sm:$0x11]  }
 0x1e2   : > { %v6962_v15 = vcombine.low %v3207_v17, %v3207_v17  ;;  %v6963_v23 = vcombine.high %v3207_v17, %v3207_v17  ;;  %3420 = vst [vmem:[#allocation2 + $0x20] sm:$0x1] %v6964_v13  ;;  %v8437_v24 = vadd.f32 %v8436_v48, %v10286_v41  ;;  %v7619_v19 = vpop.f32.mrb[113].mxu0  ;;  %v4376_v41 = vrot.slane %v8834_v12, 1 }
 0x1e3   : > { %v3074_v59 = vshrl.u32 %v3038_v49, 16  ;;  %v3077_v54 = vshll.u32 %v3038_v49, 16  ;;  %v2978_v4 = vadd.f32 %v10276_v57, %v2942_v28  ;;  %v7620_v25 = vadd.f32 %v7619_v19, %v7618_v52  ;;  %v10336_v55 = vpop.f32.mrb[80].mxu1  ;;  %v7621_v45 = vpop.f32.mrb[114].mxu0  ;;  %v10341_v34 = vld [vmem:[#allocation2 + $0xc] sm:$0xff]  }
 0x1e4   : > { %3418 = vst [vmem:[#allocation2 + $0x18] sm:$0xf] %v6962_v15  ;;  %3419 = vst [vmem:[#allocation2 + $0x1c] sm:$0xf] %v6963_v23  ;;  %v2943_v47 = vmul.f32 %v8437_v24, %v10274_v44  ;;  %v10339_v1 = vpop.f32.mrb[81].mxu1  ;;  %v7622_v6 = vpop.f32.mrb[115].mxu0 }
 0x1e5   : > { %v3076_v18 = vrot.slane %v3074_v59, 7  ;;  %v3010_v56 = vmax.f32 %v2978_v4, 0.0  ;;  %v8448_v26 = vadd.f32 %v7620_v25, %v10171_v22  ;;  %v7623_v9 = vadd.f32 %v7622_v6, %v7621_v45  ;;  %v10344_v61 = vpop.f32.mrb[82].mxu1 }
 0x1e6   : > { %v2979_v13 = vadd.f32 %v10276_v57, %v2943_v47  ;;  %v10347_v48 = vpop.f32.mrb[83].mxu1  ;;  %v4375_v17 = vrot.slane %v10341_v34, 1  ;;  %v4168_v49 = vshrl.u32 %v10341_v34, 16  ;;  %v4170_v28 = vshll.u32 %v10341_v34, 16 }
 0x1e7   : > { %v3079_v52 = vor.u32 %v3077_v54, %v3076_v18  ;;  %v3224_v15 = vsel %vm10294_vm4, %v3076_v18, 0  ;;  %v8449_v23 = vadd.f32 %v8448_v26, %v10298_v63  ;;  %v8456_v22 = vadd.f32 %v7623_v9, %v10178_v20 }
 0x1e8   : > { %v6967_v24 = vcombine.low %v3224_v15, %v3224_v15  ;;  %v3011_v19 = vmax.f32 %v2979_v13, 0.0  ;;  %v4377_v59 = vsel %vm521_vm1, %v4375_v17, %v4376_v41  ;;  %v4172_v4 = vrot.slane %v4170_v28, 1 }
 0x1e9   : > { %v3208_v25 = vsel %vm10294_vm4, 0, %v3079_v52  ;;  %v2944_v45 = vmul.f32 %v8449_v23, %v10274_v44  ;;  %v8457_v47 = vadd.f32 %v8456_v22, %v10307_v46  ;;  %v7624_v54 = vpop.f32.mrb[116].mxu0  ;;  %8282 = vmatprep.mubr.bf16.mxu1 %v4377_v59  ;;  %v4175_v6 = vshll.u32 %v8834_v12, 16  ;;  %v10361_v9 = vld [vmem:[#allocation2 + $0x20] ss:$0 sps:$4 sm:$0x11]  }
 0x1ea   : > { %v6965_v18 = vcombine.low %v3208_v25, %v3208_v25  ;;  %v6966_v39 = vcombine.high %v3208_v25, %v3208_v25  ;;  %3423 = vst [vmem:[#allocation2 + $0x2c] sm:$0x1] %v6967_v24  ;;  %v3039_v63 = vpack.c.bf16 %v3011_v19, %v3010_v56  ;;  %v7625_v20 = vpop.f32.mrb[117].mxu0  ;;  %v4173_v26 = vor.u32 %v4172_v4, %v4168_v49  ;;  %v10378_v25 = vld [vmem:[%s11617_s2 + $0x88] sm:$0xff]  }
 0x1eb   : > { %v2980_v41 = vadd.f32 %v10276_v57, %v2944_v45  ;;  %v2945_v13 = vmul.f32 %v8457_v47, %v10274_v44  ;;  %v7626_v17 = vadd.f32 %v7625_v20, %v7624_v54  ;;  %v10365_v28 = vpop.f32.mrb[84].mxu1  ;;  %v7627_v52 = vpop.f32.mrb[118].mxu0  ;;  %v4177_v46 = vrot.slane %v4175_v6, 1  ;;  %v10367_v15 = vld [vmem:[#allocation2 + $0x18] sm:$0xff]  }
 0x1ec   : > { %3421 = vst [vmem:[#allocation2 + $0x24] sm:$0xf] %v6965_v18  ;;  %3422 = vst [vmem:[#allocation2 + $0x28] sm:$0xf] %v6966_v39  ;;  %v3081_v12 = vshrl.u32 %v3039_v63, 16  ;;  %v3084_v23 = vshll.u32 %v3039_v63, 16 }
 0x1ed   : > { %v10369_v56 = vpop.f32.mrb[85].mxu1  ;;  %v7628_v49 = vpop.f32.mrb[119].mxu0  ;;  %v3012_v22 = vmax.f32 %v2980_v41, 0.0  ;;  %v2981_v24 = vadd.f32 %v10276_v57, %v2945_v13  ;;  %v8444_v19 = vadd.f32 %v7626_v17, %v10167_v3  ;;  %v4178_v47 = vsel %vm280_vm0, %v4173_v26, %v4177_v46  ;;  %v8868_v3 = vld [vmem:[%s11617_s2] sm:$0xff]   ;;  %v8872_v18 = vld [vmem:[%s11617_s2 + $0x48] sm:$0xff]  }
 0x1ee   : > { %v7629_v59 = vadd.f32 %v7628_v49, %v7627_v52  ;;  %v10373_v4 = vpop.f32.mrb[86].mxu1  ;;  %v3083_v45 = vrot.slane %v3081_v12, 7  ;;  %v4378_v54 = vrot.slane %v10367_v15, 1  ;;  %v4379_v6 = vrot.slane %v10361_v9, 1  ;;  %4664 = vmatprep.mubr.bf16.mxu0 %v4178_v47  ;;  %v8873_v12 = vld [vmem:[%s11617_s2 + $0x8] sm:$0xff]  }
 0x1ef   : > { %v10380_v39 = vpop.f32.mrb[87].mxu1  ;;  %v3013_v63 = vmax.f32 %v2981_v24, 0.0  ;;  %v8445_v20 = vadd.f32 %v8444_v19, %v10292_v21  ;;  %v4180_v26 = vshrl.u32 %v10367_v15, 16  ;;  %4665 = vmatmul.mubr.bf16.vlgmr.msra.gmra.mrb[160].mxu0 %v10341_v34  ;;  %v4182_v46 = vshll.u32 %v10367_v15, 16  ;;  %v10409_v34 = vld [vmem:[%s11617_s2 + $0x90] sm:$0xff]  }
 0x1f0   : > { %v8452_v41 = vadd.f32 %v7629_v59, %v10175_v43  ;;  %v3086_v13 = vor.u32 %v3084_v23, %v3083_v45  ;;  %v3225_v17 = vsel %vm10294_vm4, %v3083_v45, 0  ;;  %v4380_v52 = vsel %vm521_vm1, %v4378_v54, %v4379_v6  ;;  %7851 = vmatpush3.bf16.msra.mxu0 %v8868_v3 }
 0x1f1   : > { %v6970_v21 = vcombine.low %v3225_v17, %v3225_v17  ;;  %v3040_v49 = vpack.c.bf16 %v3013_v63, %v3012_v22  ;;  %v2946_v43 = vmul.f32 %v8445_v20, %v10274_v44  ;;  %v7630_v23 = vpop.f32.mrb[120].mxu0  ;;  %8283 = vmatmul.mubr.bf16.vlgmr.msra.gmra.mrb[96].mxu1 %v4380_v52  ;;  %v10404_v19 = vld [vmem:[#allocation2 + $0x2c] ss:$0 sps:$4 sm:$0x11]   ;;  %v4184_v47 = vrot.slane %v4182_v46, 1  ;;  %7852 = vmatprep.subr.bf16.mxu0 %v8872_v18 }
 0x1f2   : > { %v8453_v24 = vadd.f32 %v8452_v41, %v10301_v60  ;;  %v3209_v59 = vsel %vm10294_vm4, 0, %v3086_v13  ;;  %v7631_v45 = vpop.f32.mrb[121].mxu0  ;;  %v4187_v22 = vshll.u32 %v10361_v9, 16  ;;  %8315 = vmatpush3.bf16.msra.mxu1 %v10253_v29  ;;  %v8874_v60 = vld [vmem:[%s11617_s2 + $0x50] sm:$0xff]   ;;  %v8989_v13 = vmov 0  }
 0x1f3   : > { %v6968_v54 = vcombine.low %v3209_v59, %v3209_v59  ;;  %v6969_v6 = vcombine.high %v3209_v59, %v3209_v59  ;;  %3426 = vst [vmem:[#allocation2 + $0x38] sm:$0x1] %v6970_v21  ;;  %v3088_v63 = vshrl.u32 %v3040_v49, 16  ;;  %v3091_v20 = vshll.u32 %v3040_v49, 16  ;;  %v10418_v41 = vpop.f32.mrb[88].mxu1  ;;  %v7633_v17 = vpop.f32.mrb[122].mxu0  ;;  %8316 = vmatprep.subr.bf16.mxu1 %v10378_v25 }
 0x1f4   : > { %3052 = vst [vmem:[#allocation2] sm:$0xf] %v8989_v13  ;;  %3053 = vst [vmem:[#allocation2 + $0x4] sm:$0xf] %v8989_v13  ;;  %v2982_v29 = vadd.f32 %v10276_v57, %v2946_v43  ;;  %v2947_v9 = vmul.f32 %v8453_v24, %v10274_v44  ;;  %v7632_v3 = vadd.f32 %v7631_v45, %v7630_v23  ;;  %v10423_v52 = vpop.f32.mrb[89].mxu1  ;;  %v7634_v46 = vpop.f32.mrb[123].mxu0  ;;  %7853 = vmatpush3.bf16.msra.mxu0 %v8873_v12 }
 0x1f5   : > { %3054 = vst [vmem:[#allocation2 + $0x8] sm:$0x1] %v8989_v13  ;;  %3056 = vst [vmem:[#allocation2 + $0xcc] sm:$0xf] %v8989_v13  ;;  %v4185_v21 = vor.u32 %v4184_v47, %v4180_v26  ;;  %v10425_v49 = vld [vmem:[#allocation2 + $0x24] sm:$0xff]   ;;  %v3090_v18 = vrot.slane %v3088_v63, 7  ;;  %v7635_v59 = vadd.f32 %v7634_v46, %v7633_v17  ;;  %7854 = vmatprep.subr.bf16.mxu0 %v8874_v60 }
 0x1f6   : > { %3057 = vst [vmem:[#allocation2 + $0xd0] sm:$0xf] %v8989_v13  ;;  %3058 = vst [vmem:[#allocation2 + $0xd4] sm:$0x1] %v8989_v13  ;;  %v10427_v58 = vpop.f32.mrb[90].mxu1  ;;  %v4189_v27 = vrot.slane %v4187_v22, 1  ;;  %v2983_v43 = vadd.f32 %v10276_v57, %v2947_v9  ;;  %v8464_v24 = vadd.f32 %v7632_v3, %v10187_v30  ;;  %8317 = vmatpush3.bf16.msra.mxu1 %v10378_v25 }
 0x1f7   : > { %3424 = vst [vmem:[#allocation2 + $0x30] sm:$0xf] %v6968_v54  ;;  %3425 = vst [vmem:[#allocation2 + $0x34] sm:$0xf] %v6969_v6  ;;  %v4382_v13 = vrot.slane %v10404_v19, 1  ;;  %v3014_v14 = vmax.f32 %v2982_v29, 0.0  ;;  %v3093_v45 = vor.u32 %v3091_v20, %v3090_v18  ;;  %v8472_v22 = vadd.f32 %v7635_v59, %v10194_v35  ;;  %8318 = vmatprep.subr.bf16.mxu1 %v10409_v34 }
 0x1f8   : > { %v10432_v23 = vpop.f32.mrb[91].mxu1  ;;  %v4381_v26 = vrot.slane %v10425_v49, 1  ;;  %v3226_v47 = vsel %vm10294_vm4, %v3090_v18, 0  ;;  %v4190_v54 = vsel %vm280_vm0, %v4185_v21, %v4189_v27  ;;  %v8863_v30 = vld [vmem:[%s11617_s2 + $0x98] sm:$0xff]   ;;  %v8875_v25 = vld [vmem:[%s11617_s2 + $0x10] sm:$0xff]   ;;  %v3015_v6 = vmax.f32 %v2983_v43, 0.0 }
 0x1f9   : > { %v6973_v12 = vcombine.low %v3226_v47, %v3226_v47  ;;  %v8465_v63 = vadd.f32 %v8464_v24, %v10319_v2  ;;  %4672 = vmatprep.mubr.bf16.mxu0 %v4190_v54  ;;  %v8879_v27 = vld [vmem:[%s11617_s2 + $0x58] sm:$0xff]   ;;  %v3210_v20 = vsel %vm10294_vm4, 0, %v3093_v45  ;;  %v8473_v60 = vadd.f32 %v8472_v22, %v10325_v16  ;;  %v7636_v17 = vpop.f32.mrb[124].mxu0  ;;  %v10461_v9 = vld [vmem:[%s11617_s2 + $0xa0] sm:$0xff]   ;;  %7855 = vmatpush3.bf16.msra.mxu0 %v8875_v25 }
 0x1fa   : > { %v4383_v35 = vsel %vm521_vm1, %v4381_v26, %v4382_v13  ;;  %4673 = vmatmul.mubr.bf16.gmra.mrb[164].mxu0 %v10367_v15  ;;  %v4192_v29 = vshrl.u32 %v10425_v49, 16  ;;  %v4194_v2 = vshll.u32 %v10425_v49, 16  ;;  %v8880_v3 = vld [vmem:[%s11617_s2 + $0x18] sm:$0xff]   ;;  %v6971_v46 = vcombine.low %v3210_v20, %v3210_v20  ;;  %v7637_v18 = vpop.f32.mrb[125].mxu0  ;;  %8319 = vmatpush3.bf16.msra.mxu1 %v10409_v34  ;;  %v8881_v13 = vld [vmem:[%s11617_s2 + $0x60] sm:$0xff]  }
 0x1fb   : > { %8286 = vmatprep.mubr.bf16.mxu1 %v4383_v35  ;;  %v6972_v21 = vcombine.high %v3210_v20, %v3210_v20  ;;  %3429 = vst [vmem:[#allocation2 + $0x44] sm:$0x1] %v6973_v12  ;;  %v3041_v16 = vpack.c.bf16 %v3015_v6, %v3014_v14  ;;  %v2948_v15 = vmul.f32 %v8465_v63, %v10274_v44  ;;  %v10467_v59 = vld [vmem:[#allocation2 + $0x38] ss:$0 sps:$4 sm:$0x11]   ;;  %v10474_v26 = vpop.f32.mrb[92].mxu1 }
 0x1fc   : > { %v2949_v43 = vmul.f32 %v8473_v60, %v10274_v44  ;;  %v7638_v24 = vadd.f32 %v7637_v18, %v7636_v17  ;;  %v7639_v45 = vpop.f32.mrb[126].mxu0  ;;  %v4196_v47 = vrot.slane %v4194_v2, 1  ;;  %v4199_v14 = vshll.u32 %v10404_v19, 16  ;;  %8320 = vmatprep.subr.bf16.mxu1 %v8863_v30  ;;  %3427 = vst [vmem:[#allocation2 + $0x3c] sm:$0xf] %v6971_v46  ;;  %v10478_v12 = vpop.f32.mrb[93].mxu1  ;;  %7856 = vmatprep.subr.bf16.mxu0 %v8879_v27 }
 0x1fd   : > { %3428 = vst [vmem:[#allocation2 + $0x40] sm:$0xf] %v6972_v21  ;;  %v3095_v22 = vshrl.u32 %v3041_v16, 16  ;;  %v3098_v54 = vshll.u32 %v3041_v16, 16  ;;  %v2984_v34 = vadd.f32 %v10276_v57, %v2948_v15  ;;  %v7640_v6 = vpop.f32.mrb[127].mxu0  ;;  %v10482_v60 = vpop.f32.mrb[94].mxu1  ;;  %7857 = vmatpush3.bf16.msra.mxu0 %v8880_v3 }
 0x1fe   : > { %v2985_v63 = vadd.f32 %v10276_v57, %v2949_v43  ;;  %v8460_v35 = vadd.f32 %v7638_v24, %v10183_v0  ;;  %v7641_v20 = vadd.f32 %v7640_v6, %v7639_v45  ;;  %v4197_v19 = vor.u32 %v4196_v47, %v4192_v29  ;;  %v10484_v17 = vld [vmem:[#allocation2 + $0x30] sm:$0xff]   ;;  %v10486_v46 = vpop.f32.mrb[95].mxu1  ;;  %8321 = vmatpush3.bf16.msra.mxu1 %v8863_v30  ;;  %v8871_v27 = vld [vmem:[%s11617_s2 + $0xa8] sm:$0xff]  }
 0x1ff   : > { %v3097_v25 = vrot.slane %v3095_v22, 7  ;;  %v3016_v2 = vmax.f32 %v2984_v34, 0.0  ;;  %v4201_v21 = vrot.slane %v4199_v14, 1  ;;  %v4385_v16 = vrot.slane %v10467_v59, 1  ;;  %8322 = vmatprep.subr.bf16.mxu1 %v10461_v9  ;;  %7858 = vmatprep.subr.bf16.mxu0 %v8881_v13  ;;  %v10513_v13 = vld [vmem:[%s11617_s2 + $0xb0] sm:$0xff]  }
 0x200   : > { %v3017_v15 = vmax.f32 %v2985_v63, 0.0  ;;  %v8461_v0 = vadd.f32 %v8460_v35, %v10316_v33  ;;  %v8468_v18 = vadd.f32 %v7641_v20, %v10191_v37  ;;  %v4384_v29 = vrot.slane %v10484_v17, 1  ;;  %v8882_v33 = vld [vmem:[%s11617_s2 + $0x20] sm:$0xff]   ;;  %v8886_v37 = vld [vmem:[%s11617_s2 + $0x68] sm:$0xff]  }
 0x201   : > { %v3100_v43 = vor.u32 %v3098_v54, %v3097_v25  ;;  %v3227_v24 = vsel %vm10294_vm4, %v3097_v25, 0  ;;  %v4202_v30 = vsel %vm280_vm0, %v4197_v19, %v4201_v21  ;;  %v4204_v45 = vshrl.u32 %v10484_v17, 16  ;;  %v7642_v54 = vpop.f32.mrb[128].mxu0  ;;  %v8887_v19 = vld [vmem:[%s11617_s2 + $0x28] sm:$0xff]   ;;  %7859 = vmatpush3.bf16.msra.mxu0 %v8882_v33 }
 0x202   : > { %v6976_v47 = vcombine.low %v3227_v24, %v3227_v24  ;;  %v3042_v14 = vpack.c.bf16 %v3017_v15, %v3016_v2  ;;  %v2950_v3 = vmul.f32 %v8461_v0, %v10274_v44  ;;  %v8469_v22 = vadd.f32 %v8468_v18, %v10323_v50  ;;  %4680 = vmatprep.mubr.bf16.mxu0 %v4202_v30  ;;  %v10508_v34 = vld [vmem:[#allocation2 + $0x44] ss:$0 sps:$4 sm:$0x11]   ;;  %v7643_v35 = vpop.f32.mrb[129].mxu0 }
 0x203   : > { %v3211_v6 = vsel %vm10294_vm4, 0, %v3100_v43  ;;  %4681 = vmatmul.mubr.bf16.gmra.mrb[168].mxu0 %v10425_v49  ;;  %v4386_v63 = vsel %vm521_vm1, %v4384_v29, %v4385_v16  ;;  %v4206_v20 = vshll.u32 %v10484_v17, 16  ;;  %v4211_v50 = vshll.u32 %v10467_v59, 16  ;;  %8323 = vmatpush3.bf16.msra.mxu1 %v10461_v9  ;;  %v7645_v49 = vpop.f32.mrb[130].mxu0 }
 0x204   : > { %v6974_v25 = vcombine.low %v3211_v6, %v3211_v6  ;;  %v6975_v2 = vcombine.high %v3211_v6, %v3211_v6  ;;  %3432 = vst [vmem:[#allocation2 + $0x50] sm:$0x1] %v6976_v47  ;;  %v3102_v21 = vshrl.u32 %v3042_v14, 16  ;;  %v3105_v15 = vshll.u32 %v3042_v14, 16  ;;  %8287 = vmatmul.mubr.bf16.gmra.mrb[100].mxu1 %v4386_v63  ;;  %v10525_v0 = vld [vmem:[#allocation2 + $0x3c] sm:$0xff]   ;;  %8324 = vmatprep.subr.bf16.mxu1 %v8871_v27  ;;  %v7646_v9 = vpop.f32.mrb[131].mxu0 }
 0x205   : > { %v2986_v16 = vadd.f32 %v10276_v57, %v2950_v3  ;;  %v2951_v59 = vmul.f32 %v8469_v22, %v10274_v44  ;;  %v7644_v18 = vadd.f32 %v7643_v35, %v7642_v54  ;;  %v4208_v29 = vrot.slane %v4206_v20, 1  ;;  %7860 = vmatprep.subr.bf16.mxu0 %v8886_v37  ;;  %v8888_v14 = vld [vmem:[%s11617_s2 + $0x70] sm:$0xff]  }
 0x206   : > { %3430 = vst [vmem:[#allocation2 + $0x48] sm:$0xf] %v6974_v25  ;;  %3431 = vst [vmem:[#allocation2 + $0x4c] sm:$0xf] %v6975_v2  ;;  %v3104_v43 = vrot.slane %v3102_v21, 7  ;;  %v7647_v24 = vadd.f32 %v7646_v9, %v7645_v49  ;;  %v4213_v30 = vrot.slane %v4211_v50, 1  ;;  %7861 = vmatpush3.bf16.msra.mxu0 %v8887_v19 }
 0x207   : > { %v4387_v47 = vrot.slane %v10525_v0, 1  ;;  %v3018_v6 = vmax.f32 %v2986_v16, 0.0  ;;  %v2987_v3 = vadd.f32 %v10276_v57, %v2951_v59  ;;  %v8480_v22 = vadd.f32 %v7644_v18, %v10203_v38  ;;  %8325 = vmatpush3.bf16.msra.mxu1 %v8871_v27  ;;  %v8885_v38 = vld [vmem:[%s11617_s2 + $0xb8] sm:$0xff]   ;;  %v8889_v27 = vld [vmem:[%s11617_s2 + $0x30] sm:$0xff]   ;;  %7862 = vmatprep.subr.bf16.mxu0 %v8888_v14 }
 0x208   : > { %v4209_v54 = vor.u32 %v4208_v29, %v4204_v45  ;;  %v3107_v33 = vor.u32 %v3105_v15, %v3104_v43  ;;  %v3228_v63 = vsel %vm10294_vm4, %v3104_v43, 0  ;;  %v8488_v35 = vadd.f32 %v7647_v24, %v10210_v53  ;;  %8326 = vmatprep.subr.bf16.mxu1 %v10513_v13  ;;  %v8895_v15 = vld [vmem:[%s11617_s2 + $0x78] sm:$0xff]  }
 0x209   : > { %v4388_v20 = vrot.slane %v10508_v34, 1  ;;  %v6979_v37 = vcombine.low %v3228_v63, %v3228_v63  ;;  %v3019_v50 = vmax.f32 %v2987_v3, 0.0  ;;  %v8481_v25 = vadd.f32 %v8480_v22, %v10339_v1  ;;  %v7648_v21 = vpop.f32.mrb[132].mxu0 }
 0x20a   : > { %v4214_v2 = vsel %vm280_vm0, %v4209_v54, %v4213_v30  ;;  %v3212_v53 = vsel %vm10294_vm4, 0, %v3107_v33  ;;  %v8489_v45 = vadd.f32 %v8488_v35, %v10347_v48  ;;  %v7649_v18 = vpop.f32.mrb[133].mxu0  ;;  %v8894_v48 = vld [vmem:[%s11617_s2 + $0x1c0] sm:$0xff]   ;;  %v4216_v30 = vshrl.u32 %v10525_v0, 16  ;;  %7863 = vmatpush3.bf16.msra.mxu0 %v8889_v27 }
 0x20b   : > { %4688 = vmatprep.mubr.bf16.mxu0 %v4214_v2  ;;  %v4389_v1 = vsel %vm521_vm1, %v4387_v47, %v4388_v20  ;;  %v6977_v49 = vcombine.low %v3212_v53, %v3212_v53  ;;  %v6978_v19 = vcombine.high %v3212_v53, %v3212_v53  ;;  %3435 = vst [vmem:[#allocation2 + $0x5c] sm:$0x1] %v6979_v37  ;;  %v10557_v9 = vld [vmem:[#allocation2 + $0x50] ss:$0 sps:$4 sm:$0x11]   ;;  %v7651_v24 = vpop.f32.mrb[134].mxu0 }
 0x20c   : > { %v3043_v16 = vpack.c.bf16 %v3019_v50, %v3018_v6  ;;  %v2952_v59 = vmul.f32 %v8481_v25, %v10274_v44  ;;  %4689 = vmatmul.mubr.bf16.gmra.mrb[172].mxu0 %v10484_v17  ;;  %v2953_v29 = vmul.f32 %v8489_v45, %v10274_v44  ;;  %8290 = vmatprep.mubr.bf16.mxu1 %v4389_v1  ;;  %v4218_v47 = vshll.u32 %v10525_v0, 16  ;;  %v8899_v17 = vld [vmem:[%s11617_s2 + $0x38] sm:$0xff]   ;;  %v7652_v3 = vpop.f32.mrb[135].mxu0 }
 0x20d   : > { %v7650_v43 = vadd.f32 %v7649_v18, %v7648_v21  ;;  %8327 = vmatpush3.bf16.msra.mxu1 %v10513_v13  ;;  %3433 = vst [vmem:[#allocation2 + $0x54] sm:$0xf] %v6977_v49  ;;  %3434 = vst [vmem:[#allocation2 + $0x58] sm:$0xf] %v6978_v19  ;;  %v4223_v22 = vshll.u32 %v10508_v34, 16  ;;  %v10571_v54 = vld [vmem:[#allocation2 + $0x48] sm:$0xff]   ;;  %v7653_v63 = vadd.f32 %v7652_v3, %v7651_v24  ;;  %7864 = vmatprep.subr.bf16.mxu0 %v8895_v15 }
 0x20e   : > { %v3109_v14 = vshrl.u32 %v3043_v16, 16  ;;  %v2988_v6 = vadd.f32 %v10276_v57, %v2952_v59  ;;  %8328 = vmatprep.subr.bf16.mxu1 %v8885_v38  ;;  %v2989_v33 = vadd.f32 %v10276_v57, %v2953_v29  ;;  %v4220_v35 = vrot.slane %v4218_v47, 1  ;;  %7865 = vmatpush3.bf16.msra.mxu0 %v8899_v17 }
 0x20f   : > { %v8476_v13 = vadd.f32 %v7650_v43, %v10199_v11  ;;  %v3112_v37 = vshll.u32 %v3043_v16, 16  ;;  %v4390_v25 = vrot.slane %v10571_v54, 1  ;;  %v8484_v34 = vadd.f32 %v7653_v63, %v10207_v42 }
 0x210   : > { %v3111_v20 = vrot.slane %v3109_v14, 7  ;;  %v3020_v50 = vmax.f32 %v2988_v6, 0.0  ;;  %v3021_v2 = vmax.f32 %v2989_v33, 0.0  ;;  %v4221_v45 = vor.u32 %v4220_v35, %v4216_v30 }
 0x211   : > { %v8477_v53 = vadd.f32 %v8476_v13, %v10336_v55  ;;  %8329 = vmatpush3.bf16.msra.mxu1 %v8885_v38  ;;  %v4225_v11 = vrot.slane %v4223_v22, 1  ;;  %v4391_v1 = vrot.slane %v10557_v9, 1  ;;  %v8485_v16 = vadd.f32 %v8484_v34, %v10344_v61  ;;  %v7654_v55 = vpop.f32.mrb[136].mxu0 }
 0x212   : > { %v3114_v27 = vor.u32 %v3112_v37, %v3111_v20  ;;  %v3229_v21 = vsel %vm10294_vm4, %v3111_v20, 0  ;;  %7986 = vmatprep.subr.bf16.mxu1 %v8894_v48  ;;  %v3044_v49 = vpack.c.bf16 %v3021_v2, %v3020_v50  ;;  %v7655_v18 = vpop.f32.mrb[137].mxu0  ;;  %v4230_v29 = vshll.u32 %v10571_v54, 16  ;;  %v8849_v17 = vld [vmem:[#allocation2 + $0x5c] ss:$0 sps:$4 sm:$0x11]  }
 0x213   : > { %v6982_v15 = vcombine.low %v3229_v21, %v3229_v21  ;;  %v2954_v19 = vmul.f32 %v8477_v53, %v10274_v44  ;;  %v4226_v38 = vsel %vm280_vm0, %v4221_v45, %v4225_v11  ;;  %v4392_v59 = vsel %vm521_vm1, %v4390_v25, %v4391_v1  ;;  %v7657_v30 = vpop.f32.mrb[138].mxu0 }
 0x214   : > { %v3213_v42 = vsel %vm10294_vm4, 0, %v3114_v27  ;;  %v3116_v24 = vshrl.u32 %v3044_v49, 16  ;;  %4696 = vmatprep.mubr.bf16.mxu0 %v4226_v38  ;;  %8291 = vmatmul.mubr.bf16.gmra.mrb[104].mxu1 %v4392_v59  ;;  %v4228_v61 = vshrl.u32 %v10571_v54, 16  ;;  %v10589_v47 = vld [vmem:[#allocation2 + $0x54] sm:$0xff]   ;;  %v2955_v6 = vmul.f32 %v8485_v16, %v10274_v44  ;;  %v7658_v22 = vpop.f32.mrb[139].mxu0 }
 0x215   : > { %v6980_v43 = vcombine.low %v3213_v42, %v3213_v42  ;;  %v6981_v48 = vcombine.high %v3213_v42, %v3213_v42  ;;  %3438 = vst [vmem:[#allocation2 + $0x68] sm:$0x1] %v6982_v15  ;;  %v2990_v14 = vadd.f32 %v10276_v57, %v2954_v19  ;;  %4697 = vmatmul.mubr.bf16.gmra.mrb[176].mxu0 %v10525_v0  ;;  %v4232_v33 = vrot.slane %v4230_v29, 1 }
 0x216   : > { %v7656_v3 = vadd.f32 %v7655_v18, %v7654_v55  ;;  %v3118_v13 = vrot.slane %v3116_v24, 7  ;;  %v3119_v63 = vshll.u32 %v3044_v49, 16  ;;  %v7659_v35 = vadd.f32 %v7658_v22, %v7657_v30 }
 0x217   : > { %3436 = vst [vmem:[#allocation2 + $0x60] sm:$0xf] %v6980_v43  ;;  %3437 = vst [vmem:[#allocation2 + $0x64] sm:$0xf] %v6981_v48  ;;  %v4235_v20 = vshll.u32 %v10557_v9, 16  ;;  %v2991_v37 = vadd.f32 %v10276_v57, %v2955_v6  ;;  %v4233_v25 = vor.u32 %v4232_v33, %v4228_v61  ;;  %v4393_v2 = vrot.slane %v10589_v47, 1 }
 0x218   : > { %v8496_v50 = vadd.f32 %v7656_v3, %v10219_v40  ;;  %v3121_v53 = vor.u32 %v3119_v63, %v3118_v13  ;;  %v3230_v0 = vsel %vm10294_vm4, %v3118_v13, 0  ;;  %v8504_v34 = vadd.f32 %v7659_v35, %v10226_v7 }
 0x219   : > { %v4237_v45 = vrot.slane %v4235_v20, 1  ;;  %v6985_v27 = vcombine.low %v3230_v0, %v3230_v0  ;;  %v3022_v21 = vmax.f32 %v2990_v14, 0.0  ;;  %v3023_v11 = vmax.f32 %v2991_v37, 0.0  ;;  %v7660_v49 = vpop.f32.mrb[140].mxu0 }
 0x21a   : > { %v8497_v1 = vadd.f32 %v8496_v50, %v10369_v56  ;;  %v3214_v9 = vsel %vm10294_vm4, 0, %v3121_v53  ;;  %v8505_v40 = vadd.f32 %v8504_v34, %v10380_v39  ;;  %v4394_v19 = vrot.slane %v8849_v17, 1  ;;  %v7661_v38 = vpop.f32.mrb[141].mxu0 }
 0x21b   : > { %v4238_v15 = vsel %vm280_vm0, %v4233_v25, %v4237_v45  ;;  %v6983_v16 = vcombine.low %v3214_v9, %v3214_v9  ;;  %v6984_v55 = vcombine.high %v3214_v9, %v3214_v9  ;;  %3441 = vst [vmem:[#allocation2 + $0x74] sm:$0x1] %v6985_v27  ;;  %v3045_v42 = vpack.c.bf16 %v3023_v11, %v3022_v21  ;;  %v7663_v39 = vpop.f32.mrb[142].mxu0 }
 0x21c   : > { %v2956_v7 = vmul.f32 %v8497_v1, %v10274_v44  ;;  %4704 = vmatprep.mubr.bf16.mxu0 %v4238_v15  ;;  %v10607_v59 = vld [vmem:[#allocation2 + $0x68] ss:$0 sps:$4 sm:$0x11]   ;;  %v2957_v56 = vmul.f32 %v8505_v40, %v10274_v44  ;;  %v4395_v18 = vsel %vm521_vm1, %v4393_v2, %v4394_v19  ;;  %v7662_v29 = vadd.f32 %v7661_v38, %v7660_v49  ;;  %v7664_v30 = vpop.f32.mrb[143].mxu0 }
 0x21d   : > { %v4242_v43 = vshll.u32 %v10589_v47, 16  ;;  %3439 = vst [vmem:[#allocation2 + $0x6c] sm:$0xf] %v6983_v16  ;;  %3440 = vst [vmem:[#allocation2 + $0x70] sm:$0xf] %v6984_v55  ;;  %v3123_v48 = vshrl.u32 %v3045_v42, 16  ;;  %4705 = vmatmul.mubr.bf16.gmra.mrb[180].mxu0 %v10571_v54  ;;  %8294 = vmatprep.mubr.bf16.mxu1 %v4395_v18  ;;  %v7665_v22 = vadd.f32 %v7664_v30, %v7663_v39 }
 0x21e   : > { %v2992_v24 = vadd.f32 %v10276_v57, %v2956_v7  ;;  %v4240_v61 = vshrl.u32 %v10589_v47, 16  ;;  %v4247_v14 = vshll.u32 %v8849_v17, 16  ;;  %v2993_v6 = vadd.f32 %v10276_v57, %v2957_v56  ;;  %v10617_v13 = vld [vmem:[#allocation2 + $0x60] sm:$0xff]  }
 0x21f   : > { %v8492_v3 = vadd.f32 %v7662_v29, %v10215_v36  ;;  %v4244_v33 = vrot.slane %v4242_v43, 1  ;;  %v3125_v63 = vrot.slane %v3123_v48, 7  ;;  %v3126_v35 = vshll.u32 %v3045_v42, 16 }
 0x220   : > { %v3024_v20 = vmax.f32 %v2992_v24, 0.0  ;;  %v4249_v37 = vrot.slane %v4247_v14, 1  ;;  %v3025_v50 = vmax.f32 %v2993_v6, 0.0  ;;  %v8500_v25 = vadd.f32 %v7665_v22, %v10223_v51 }
 0x221   : > { %v8493_v54 = vadd.f32 %v8492_v3, %v10365_v28  ;;  %v4245_v2 = vor.u32 %v4244_v33, %v4240_v61  ;;  %v3128_v53 = vor.u32 %v3126_v35, %v3125_v63  ;;  %v3231_v17 = vsel %vm10294_vm4, %v3125_v63, 0  ;;  %v7666_v11 = vpop.f32.mrb[144].mxu0 }
 0x222   : > { %v4396_v36 = vrot.slane %v10617_v13, 1  ;;  %v4397_v0 = vrot.slane %v10607_v59, 1  ;;  %v6988_v34 = vcombine.low %v3231_v17, %v3231_v17  ;;  %v3046_v45 = vpack.c.bf16 %v3025_v50, %v3024_v20  ;;  %v7667_v9 = vpop.f32.mrb[145].mxu0  ;;  %v8853_v42 = vld [vmem:[#allocation2 + $0x74] ss:$0 sps:$4 sm:$0x11]  }
 0x223   : > { %v2958_v27 = vmul.f32 %v8493_v54, %v10274_v44  ;;  %v8501_v21 = vadd.f32 %v8500_v25, %v10373_v4  ;;  %v3215_v28 = vsel %vm10294_vm4, 0, %v3128_v53  ;;  %v4250_v51 = vsel %vm280_vm0, %v4245_v2, %v4249_v37  ;;  %v7669_v16 = vpop.f32.mrb[146].mxu0 }
 0x224   : > { %v4398_v1 = vsel %vm521_vm1, %v4396_v36, %v4397_v0  ;;  %v4254_v40 = vshll.u32 %v10617_v13, 16  ;;  %v6986_v15 = vcombine.low %v3215_v28, %v3215_v28  ;;  %v6987_v49 = vcombine.high %v3215_v28, %v3215_v28  ;;  %3444 = vst [vmem:[#allocation2 + $0x80] sm:$0x1] %v6988_v34  ;;  %4712 = vmatprep.mubr.bf16.mxu0 %v4250_v51  ;;  %v10633_v55 = vld [vmem:[#allocation2 + $0x6c] sm:$0xff]   ;;  %v7670_v18 = vpop.f32.mrb[147].mxu0 }
 0x225   : > { %v3130_v19 = vshrl.u32 %v3046_v45, 16  ;;  %8295 = vmatmul.mubr.bf16.gmra.mrb[108].mxu1 %v4398_v1  ;;  %v4252_v4 = vshrl.u32 %v10617_v13, 16  ;;  %v2994_v7 = vadd.f32 %v10276_v57, %v2958_v27  ;;  %v2959_v38 = vmul.f32 %v8501_v21, %v10274_v44  ;;  %4713 = vmatmul.mubr.bf16.gmra.mrb[184].mxu0 %v10589_v47 }
 0x226   : > { %v7668_v56 = vadd.f32 %v7667_v9, %v7666_v11  ;;  %v4256_v29 = vrot.slane %v4254_v40, 1  ;;  %3442 = vst [vmem:[#allocation2 + $0x78] sm:$0xf] %v6986_v15  ;;  %3443 = vst [vmem:[#allocation2 + $0x7c] sm:$0xf] %v6987_v49  ;;  %v3133_v43 = vshll.u32 %v3046_v45, 16  ;;  %v7671_v48 = vadd.f32 %v7670_v18, %v7669_v16 }
 0x227   : > { %v3132_v39 = vrot.slane %v3130_v19, 7  ;;  %v4259_v24 = vshll.u32 %v10607_v59, 16  ;;  %v2995_v30 = vadd.f32 %v10276_v57, %v2959_v38  ;;  %v4399_v6 = vrot.slane %v10633_v55, 1 }
 0x228   : > { %v8512_v61 = vadd.f32 %v7668_v56, %v10235_v5  ;;  %v4257_v14 = vor.u32 %v4256_v29, %v4252_v4  ;;  %v8520_v22 = vadd.f32 %v7671_v48, %v10242_v62  ;;  %v3026_v35 = vmax.f32 %v2994_v7, 0.0 }
 0x229   : > { %v3135_v3 = vor.u32 %v3133_v43, %v3132_v39  ;;  %v3232_v47 = vsel %vm10294_vm4, %v3132_v39, 0  ;;  %v4261_v33 = vrot.slane %v4259_v24, 1  ;;  %v3027_v20 = vmax.f32 %v2995_v30, 0.0  ;;  %v7672_v54 = vpop.f32.mrb[148].mxu0 }
 0x22a   : > { %v6991_v63 = vcombine.low %v3232_v47, %v3232_v47  ;;  %v8513_v37 = vadd.f32 %v8512_v61, %v10423_v52  ;;  %v8521_v5 = vadd.f32 %v8520_v22, %v10432_v23  ;;  %v4400_v25 = vrot.slane %v8853_v42, 1  ;;  %v7673_v36 = vpop.f32.mrb[149].mxu0 }
 0x22b   : > { %v3216_v59 = vsel %vm10294_vm4, 0, %v3135_v3  ;;  %v4262_v50 = vsel %vm280_vm0, %v4257_v14, %v4261_v33  ;;  %v3047_v17 = vpack.c.bf16 %v3027_v20, %v3026_v35  ;;  %v10651_v0 = vld [vmem:[#allocation2 + $0x80] ss:$0 sps:$4 sm:$0x11]   ;;  %v7674_v45 = vadd.f32 %v7673_v36, %v7672_v54  ;;  %v7675_v23 = vpop.f32.mrb[150].mxu0 }
 0x22c   : > { %v6989_v2 = vcombine.low %v3216_v59, %v3216_v59  ;;  %v6990_v53 = vcombine.high %v3216_v59, %v3216_v59  ;;  %3447 = vst [vmem:[#allocation2 + $0x8c] sm:$0x1] %v6991_v63  ;;  %v2960_v62 = vmul.f32 %v8513_v37, %v10274_v44  ;;  %4720 = vmatprep.mubr.bf16.mxu0 %v4262_v50  ;;  %v4266_v27 = vshll.u32 %v10633_v55, 16  ;;  %v7676_v28 = vpop.f32.mrb[151].mxu0 }
 0x22d   : > { %v2961_v52 = vmul.f32 %v8521_v5, %v10274_v44  ;;  %v4401_v34 = vsel %vm521_vm1, %v4399_v6, %v4400_v25  ;;  %v3137_v21 = vshrl.u32 %v3047_v17, 16  ;;  %4721 = vmatmul.mubr.bf16.gmra.mrb[188].mxu0 %v10617_v13  ;;  %v4264_v51 = vshrl.u32 %v10633_v55, 16  ;;  %v10661_v19 = vld [vmem:[#allocation2 + $0x78] sm:$0xff]  }
 0x22e   : > { %3445 = vst [vmem:[#allocation2 + $0x84] sm:$0xf] %v6989_v2  ;;  %3446 = vst [vmem:[#allocation2 + $0x88] sm:$0xf] %v6990_v53  ;;  %v2996_v11 = vadd.f32 %v10276_v57, %v2960_v62  ;;  %8298 = vmatprep.mubr.bf16.mxu1 %v4401_v34  ;;  %v4271_v1 = vshll.u32 %v8853_v42, 16  ;;  %v8508_v40 = vadd.f32 %v7674_v45, %v10231_v32  ;;  %v4268_v49 = vrot.slane %v4266_v27, 1 }
 0x22f   : > { %v2997_v9 = vadd.f32 %v10276_v57, %v2961_v52  ;;  %v7677_v15 = vadd.f32 %v7676_v28, %v7675_v23  ;;  %v3139_v16 = vrot.slane %v3137_v21, 7  ;;  %v3140_v4 = vshll.u32 %v3047_v17, 16  ;;  %v11654_v27 = vld [vmem:[#allocation5_spill] sm:$0xff] }
 0x230   : > { %v3028_v7 = vmax.f32 %v2996_v11, 0.0  ;;  %v4273_v38 = vrot.slane %v4271_v1, 1  ;;  %v8509_v13 = vadd.f32 %v8508_v40, %v10418_v41  ;;  %v4269_v29 = vor.u32 %v4268_v49, %v4264_v51 }
 0x231   : > { %v3029_v56 = vmax.f32 %v2997_v9, 0.0  ;;  %v8516_v18 = vadd.f32 %v7677_v15, %v10239_v31  ;;  %v3142_v39 = vor.u32 %v3140_v4, %v3139_v16  ;;  %v3233_v42 = vsel %vm10294_vm4, %v3139_v16, 0  ;;  %v7678_v14 = vpop.f32.mrb[152].mxu0 }
 0x232   : > { %v4402_v32 = vrot.slane %v10661_v19, 1  ;;  %v4403_v43 = vrot.slane %v10651_v0, 1  ;;  %v6994_v48 = vcombine.low %v3233_v42, %v3233_v42  ;;  %v2962_v30 = vmul.f32 %v8509_v13, %v10274_v44  ;;  %v7679_v3 = vpop.f32.mrb[153].mxu0 }
 0x233   : > { %v3048_v24 = vpack.c.bf16 %v3029_v56, %v3028_v7  ;;  %v8517_v61 = vadd.f32 %v8516_v18, %v10427_v58  ;;  %v3217_v41 = vsel %vm10294_vm4, 0, %v3142_v39  ;;  %v4274_v31 = vsel %vm280_vm0, %v4269_v29, %v4273_v38  ;;  %v7681_v35 = vpop.f32.mrb[154].mxu0  ;;  %v8859_v37 = vld [vmem:[#allocation2 + $0x8c] ss:$0 sps:$4 sm:$0x11]  }
 0x234   : > { %v4404_v6 = vsel %vm521_vm1, %v4402_v32, %v4403_v43  ;;  %v4278_v47 = vshll.u32 %v10661_v19, 16  ;;  %v6992_v22 = vcombine.low %v3217_v41, %v3217_v41  ;;  %v6993_v33 = vcombine.high %v3217_v41, %v3217_v41  ;;  %3450 = vst [vmem:[#allocation2 + $0x98] sm:$0x1] %v6994_v48  ;;  %4728 = vmatprep.mubr.bf16.mxu0 %v4274_v31  ;;  %v7682_v54 = vpop.f32.mrb[155].mxu0 }
 0x235   : > { %v3144_v63 = vshrl.u32 %v3048_v24, 16  ;;  %8299 = vmatmul.mubr.bf16.gmra.mrb[112].mxu1 %v4404_v6  ;;  %v4276_v58 = vshrl.u32 %v10661_v19, 16  ;;  %v10677_v20 = vld [vmem:[#allocation2 + $0x84] sm:$0xff]   ;;  %v2998_v59 = vadd.f32 %v10276_v57, %v2962_v30  ;;  %v2963_v5 = vmul.f32 %v8517_v61, %v10274_v44  ;;  %4729 = vmatmul.mubr.bf16.gmra.mrb[192].mxu0 %v10633_v55 }
 0x236   : > { %v7680_v50 = vadd.f32 %v7679_v3, %v7678_v14  ;;  %v4280_v25 = vrot.slane %v4278_v47, 1  ;;  %3448 = vst [vmem:[#allocation2 + $0x90] sm:$0xf] %v6992_v22  ;;  %3449 = vst [vmem:[#allocation2 + $0x94] sm:$0xf] %v6993_v33  ;;  %v3147_v53 = vshll.u32 %v3048_v24, 16  ;;  %v7683_v17 = vadd.f32 %v7682_v54, %v7681_v35 }
 0x237   : > { %v3146_v2 = vrot.slane %v3144_v63, 7  ;;  %v4283_v62 = vshll.u32 %v10651_v0, 16  ;;  %v2999_v36 = vadd.f32 %v10276_v57, %v2963_v5  ;;  %v4405_v45 = vrot.slane %v10677_v20, 1  ;;  %v11655_v61 = vld [vmem:[#allocation4_spill] sm:$0xff]  ;;  %v11656_v35 = vld [vmem:[#allocation9_spill] sm:$0xff] }
 0x238   : > { %v8528_v52 = vadd.f32 %v7680_v50, %v10256_v10  ;;  %v4281_v34 = vor.u32 %v4280_v25, %v4276_v58  ;;  %v8536_v21 = vadd.f32 %v7683_v17, %v11654_v27  ;;  %v3030_v51 = vmax.f32 %v2998_v59, 0.0 }
 0x239   : > { %v3149_v23 = vor.u32 %v3147_v53, %v3146_v2  ;;  %v3234_v55 = vsel %vm10294_vm4, %v3146_v2, 0  ;;  %v4285_v11 = vrot.slane %v4283_v62, 1  ;;  %v3031_v1 = vmax.f32 %v2999_v36, 0.0  ;;  %v7684_v15 = vpop.f32.mrb[156].mxu0 }
 0x23a   : > { %v6997_v28 = vcombine.low %v3234_v55, %v3234_v55  ;;  %v8529_v9 = vadd.f32 %v8528_v52, %v10478_v12  ;;  %v8537_v10 = vadd.f32 %v8536_v21, %v10486_v46  ;;  %v4406_v49 = vrot.slane %v8859_v37, 1  ;;  %v7685_v56 = vpop.f32.mrb[157].mxu0 }
 0x23b   : > { %v3218_v0 = vsel %vm10294_vm4, 0, %v3149_v23  ;;  %v4286_v40 = vsel %vm280_vm0, %v4281_v34, %v4285_v11  ;;  %v3049_v7 = vpack.c.bf16 %v3031_v1, %v3030_v51  ;;  %v8862_v13 = vld [vmem:[#allocation2 + $0x98] ss:$0 sps:$4 sm:$0x11]   ;;  %v7686_v29 = vadd.f32 %v7685_v56, %v7684_v15  ;;  %v7687_v39 = vpop.f32.mrb[158].mxu0 }
 0x23c   : > { %v6995_v16 = vcombine.low %v3218_v0, %v3218_v0  ;;  %v6996_v4 = vcombine.high %v3218_v0, %v3218_v0  ;;  %3453 = vst [vmem:[#allocation2 + $0xa4] sm:$0x1] %v6997_v28  ;;  %v2964_v38 = vmul.f32 %v8529_v9, %v10274_v44  ;;  %4736 = vmatprep.mubr.bf16.mxu0 %v4286_v40  ;;  %v4290_v46 = vshll.u32 %v10677_v20, 16  ;;  %v7688_v43 = vpop.f32.mrb[159].mxu0 }
 0x23d   : > { %v2965_v12 = vmul.f32 %v8537_v10, %v10274_v44  ;;  %v4407_v18 = vsel %vm521_vm1, %v4405_v45, %v4406_v49  ;;  %v3151_v42 = vshrl.u32 %v3049_v7, 16  ;;  %4737 = vmatmul.mubr.bf16.gmra.mrb[196].mxu0 %v10661_v19  ;;  %v4288_v48 = vshrl.u32 %v10677_v20, 16  ;;  %v10703_v6 = vld [vmem:[#allocation2 + $0x90] sm:$0xff]  }
 0x23e   : > { %3451 = vst [vmem:[#allocation2 + $0x9c] sm:$0xf] %v6995_v16  ;;  %3452 = vst [vmem:[#allocation2 + $0xa0] sm:$0xf] %v6996_v4  ;;  %v3000_v32 = vadd.f32 %v10276_v57, %v2964_v38  ;;  %8302 = vmatprep.mubr.bf16.mxu1 %v4407_v18  ;;  %v4295_v24 = vshll.u32 %v8859_v37, 16  ;;  %v8524_v14 = vadd.f32 %v7686_v29, %v11655_v61  ;;  %v4292_v31 = vrot.slane %v4290_v46, 1 }
 0x23f   : > { %v3001_v30 = vadd.f32 %v10276_v57, %v2965_v12  ;;  %v7689_v41 = vadd.f32 %v7688_v43, %v7687_v39  ;;  %v3153_v3 = vrot.slane %v3151_v42, 7  ;;  %v3154_v47 = vshll.u32 %v3049_v7, 16 }
 0x240   : > { %v3032_v22 = vmax.f32 %v3000_v32, 0.0  ;;  %v4297_v33 = vrot.slane %v4295_v24, 1  ;;  %v8525_v19 = vadd.f32 %v8524_v14, %v10474_v26  ;;  %v4293_v59 = vor.u32 %v4292_v31, %v4288_v48 }
 0x241   : > { %v3033_v63 = vmax.f32 %v3001_v30, 0.0  ;;  %v8532_v58 = vadd.f32 %v7689_v41, %v11656_v35  ;;  %v3156_v5 = vor.u32 %v3154_v47, %v3153_v3  ;;  %v3235_v37 = vsel %vm10294_vm4, %v3153_v3, 0 }
 0x242   : > { %v4408_v50 = vrot.slane %v10703_v6, 1  ;;  %v4409_v54 = vrot.slane %v8862_v13, 1  ;;  %v7000_v25 = vcombine.low %v3235_v37, %v3235_v37  ;;  %v2966_v53 = vmul.f32 %v8525_v19, %v10274_v44 }
 0x243   : > { %v3050_v2 = vpack.c.bf16 %v3033_v63, %v3032_v22  ;;  %v8533_v17 = vadd.f32 %v8532_v58, %v10482_v60  ;;  %v8865_v62 = vld [vmem:[#allocation2 + $0xa4] ss:$0 sps:$4 sm:$0x11]   ;;  %v3219_v26 = vsel %vm10294_vm4, 0, %v3156_v5  ;;  %v4298_v36 = vsel %vm280_vm0, %v4293_v59, %v4297_v33 }
 0x244   : > { %v4410_v52 = vsel %vm521_vm1, %v4408_v50, %v4409_v54  ;;  %v4302_v34 = vshll.u32 %v10703_v6, 16  ;;  %v6998_v45 = vcombine.low %v3219_v26, %v3219_v26  ;;  %v6999_v23 = vcombine.high %v3219_v26, %v3219_v26  ;;  %3456 = vst [vmem:[#allocation2 + $0xb0] sm:$0x1] %v7000_v25  ;;  %4744 = vmatprep.mubr.bf16.mxu0 %v4298_v36 }
 0x245   : > { %v3158_v55 = vshrl.u32 %v3050_v2, 16  ;;  %8303 = vmatmul.mubr.bf16.gmra.mrb[116].mxu1 %v4410_v52  ;;  %v4300_v27 = vshrl.u32 %v10703_v6, 16  ;;  %v3002_v60 = vadd.f32 %v10276_v57, %v2966_v53  ;;  %v2967_v21 = vmul.f32 %v8533_v17, %v10274_v44  ;;  %4745 = vmatmul.mubr.bf16.gmra.mrb[200].mxu0 %v10677_v20  ;;  %v8864_v51 = vld [vmem:[#allocation2 + $0x9c] sm:$0xff]   ;;  %v8891_v52 = vld [vmem:[#allocation2 + $0x8] ss:$0 sps:$4 sm:$0x11]  }
 0x246   : > { %v4304_v11 = vrot.slane %v4302_v34, 1  ;;  %v4307_v28 = vshll.u32 %v8862_v13, 16  ;;  %3454 = vst [vmem:[#allocation2 + $0xa8] sm:$0xf] %v6998_v45  ;;  %3455 = vst [vmem:[#allocation2 + $0xac] sm:$0xf] %v6999_v23 }
 0x247   : > { %v3160_v1 = vrot.slane %v3158_v55, 7  ;;  %v3161_v9 = vshll.u32 %v3050_v2, 16  ;;  %v4412_v0 = vrot.slane %v8865_v62, 1  ;;  %v3003_v10 = vadd.f32 %v10276_v57, %v2967_v21  ;;  %v10737_v23 = vld [vmem:[#allocation2] sm:$0xff]  }
 0x248   : > { %v4305_v40 = vor.u32 %v4304_v11, %v4300_v27  ;;  %v4309_v15 = vrot.slane %v4307_v28, 1  ;;  %v4319_v49 = vshll.u32 %v8865_v62, 16  ;;  %v3034_v44 = vmax.f32 %v3002_v60, 0.0 }
 0x249   : > { %v3163_v16 = vor.u32 %v3161_v9, %v3160_v1  ;;  %v3236_v4 = vsel %vm10294_vm4, %v3160_v1, 0  ;;  %v4411_v7 = vrot.slane %v8864_v51, 1  ;;  %v3035_v38 = vmax.f32 %v3003_v10, 0.0 }
 0x24a   : > { %v7003_v20 = vcombine.low %v3236_v4, %v3236_v4  ;;  %v4310_v56 = vsel %vm280_vm0, %v4305_v40, %v4309_v15  ;;  %v4314_v13 = vshll.u32 %v8864_v51, 16  ;;  %v4312_v18 = vshrl.u32 %v8864_v51, 16 }
 0x24b   : > { %v3220_v12 = vsel %vm10294_vm4, 0, %v3163_v16  ;;  %4752 = vmatprep.mubr.bf16.mxu0 %v4310_v56  ;;  %v4413_v57 = vsel %vm521_vm1, %v4411_v7, %v4412_v0  ;;  %v3051_v46 = vpack.c.bf16 %v3035_v38, %v3034_v44  ;;  %v8870_v32 = vld [vmem:[#allocation2 + $0xb0] ss:$0 sps:$4 sm:$0x11]   ;;  %v4321_v24 = vrot.slane %v4319_v49, 1 }
 0x24c   : > { %v7001_v29 = vcombine.low %v3220_v12, %v3220_v12  ;;  %v7002_v39 = vcombine.high %v3220_v12, %v3220_v12  ;;  %3459 = vst [vmem:[#allocation2 + $0xbc] sm:$0x1] %v7003_v20  ;;  %8306 = vmatprep.mubr.bf16.mxu1 %v4413_v57  ;;  %v4316_v42 = vrot.slane %v4314_v13, 1  ;;  %v4415_v3 = vrot.slane %v8870_v32, 1  ;;  %v10743_v49 = vld [vmem:[#allocation2 + $0xc] sm:$0xff]   ;;  %v10746_v20 = vld [vmem:[#allocation2 + $0x18] sm:$0xff]  }
 0x24d   : > { %v3165_v43 = vshrl.u32 %v3051_v46, 16  ;;  %4753 = vmatmul.mubr.bf16.gmra.mrb[204].mxu0 %v10703_v6  ;;  %v8869_v30 = vld [vmem:[#allocation2 + $0xa8] sm:$0xff]   ;;  %v3168_v14 = vshll.u32 %v3051_v46, 16  ;;  %v4331_v22 = vshll.u32 %v8870_v32, 16  ;;  %v3863_v11 = vrot.slane %v10737_v23, 1  ;;  %v8898_v32 = vld [vmem:[%s11617_s2 + $0x180] sm:$0xff]  }
 0x24e   : > { %3457 = vst [vmem:[#allocation2 + $0xb4] sm:$0xf] %v7001_v29  ;;  %3458 = vst [vmem:[#allocation2 + $0xb8] sm:$0xf] %v7002_v39  ;;  %v4317_v48 = vor.u32 %v4316_v42, %v4312_v18  ;;  %v4414_v31 = vrot.slane %v8869_v30, 1  ;;  %v4326_v47 = vshll.u32 %v8869_v30, 16 }
 0x24f   : > { %v3167_v61 = vrot.slane %v3165_v43, 7  ;;  %v4324_v19 = vshrl.u32 %v8869_v30, 16  ;;  %v4333_v25 = vrot.slane %v4331_v22, 1  ;;  %v3864_v28 = vrot.slane %v8891_v52, 1 }
 0x250   : > { %v4322_v41 = vsel %vm280_vm0, %v4317_v48, %v4321_v24  ;;  %v4416_v6 = vsel %vm521_vm1, %v4414_v31, %v4415_v3  ;;  %v4328_v58 = vrot.slane %v4326_v47, 1  ;;  %v3658_v1 = vshll.u32 %v10737_v23, 16  ;;  %v8893_v7 = vld [vmem:[#allocation2 + $0x14] ss:$0 sps:$4 sm:$0x11]  }
 0x251   : > { %4760 = vmatprep.mubr.bf16.mxu0 %v4322_v41  ;;  %v3170_v33 = vor.u32 %v3168_v14, %v3167_v61  ;;  %v3237_v63 = vsel %vm10294_vm4, %v3167_v61, 0  ;;  %8307 = vmatmul.mubr.bf16.gmra.mrb[120].mxu1 %v4416_v6  ;;  %v3865_v15 = vsel %vm521_vm1, %v3863_v11, %v3864_v28  ;;  %v3656_v38 = vshrl.u32 %v10737_v23, 16  ;;  %v10749_v12 = vld [vmem:[#allocation2 + $0x20] ss:$0 sps:$4 sm:$0x11]   ;;  %v10763_v41 = vld [vmem:[#allocation2 + $0x24] sm:$0xff]  }
 0x252   : > { %v7006_v35 = vcombine.low %v3237_v63, %v3237_v63  ;;  %v4329_v54 = vor.u32 %v4328_v58, %v4324_v19  ;;  %v3660_v57 = vrot.slane %v3658_v1, 1  ;;  %v3663_v18 = vshll.u32 %v8891_v52, 16  ;;  %v10765_v31 = vld [vmem:[#allocation2 + $0x2c] ss:$0 sps:$4 sm:$0x11]   ;;  %v10768_v47 = vld [vmem:[#allocation2 + $0x30] sm:$0xff]  }
 0x253   : > { %v8877_v59 = vld [vmem:[#allocation2 + $0xbc] ss:$0 sps:$4 sm:$0x11]   ;;  %v3221_v5 = vsel %vm10294_vm4, 0, %v3170_v33  ;;  %v3866_v39 = vrot.slane %v10743_v49, 1  ;;  %v3869_v46 = vrot.slane %v10746_v20, 1 }
 0x254   : > { %v7004_v37 = vcombine.low %v3221_v5, %v3221_v5  ;;  %v7005_v50 = vcombine.high %v3221_v5, %v3221_v5  ;;  %3462 = vst [vmem:[#allocation2 + $0xc8] sm:$0x1] %v7006_v35  ;;  %v4418_v53 = vrot.slane %v8877_v59, 1  ;;  %v4334_v17 = vsel %vm280_vm0, %v4329_v54, %v4333_v25  ;;  %v8905_v33 = vld [vmem:[%s11617_s2 + $0x188] sm:$0xff]   ;;  %v8908_v19 = vld [vmem:[%s11617_s2 + $0x1d0] sm:$0xff]   ;;  %v8914_v25 = vld [vmem:[%s11617_s2 + $0x1d8] sm:$0xff]  }
 0x255   : > { %v8876_v2 = vld [vmem:[#allocation2 + $0xb4] sm:$0xff]   ;;  %4761 = vmatmul.mubr.bf16.gmra.mrb[208].mxu0 %v8864_v51  ;;  %v4343_v36 = vshll.u32 %v8877_v59, 16  ;;  %v3867_v42 = vrot.slane %v8893_v7, 1  ;;  %v3661_v43 = vor.u32 %v3660_v57, %v3656_v38  ;;  %v3665_v48 = vrot.slane %v3663_v18, 1  ;;  %v10797_v52 = vld [vmem:[#allocation2 + $0x48] sm:$0xff]  }
 0x256   : > { %3460 = vst [vmem:[#allocation2 + $0xc0] sm:$0xf] %v7004_v37  ;;  %3461 = vst [vmem:[#allocation2 + $0xc4] sm:$0xf] %v7005_v50  ;;  %v4417_v62 = vrot.slane %v8876_v2, 1  ;;  %v4338_v26 = vshll.u32 %v8876_v2, 16  ;;  %4768 = vmatprep.mubr.bf16.mxu0 %v4334_v17 }
 0x257   : > { %v4336_v34 = vshrl.u32 %v8876_v2, 16  ;;  %v4345_v27 = vrot.slane %v4343_v36, 1  ;;  %v3870_v24 = vrot.slane %v10749_v12, 1  ;;  %v3868_v61 = vsel %vm521_vm1, %v3866_v39, %v3867_v42  ;;  %v10774_v63 = vld [vmem:[#allocation2 + $0x38] ss:$0 sps:$4 sm:$0x11]  }
 0x258   : > { %v4419_v8 = vsel %vm521_vm1, %v4417_v62, %v4418_v53  ;;  %v4340_v45 = vrot.slane %v4338_v26, 1  ;;  %v3670_v14 = vshll.u32 %v10743_v49, 16  ;;  %v3666_v22 = vsel %vm280_vm0, %v3661_v43, %v3665_v48  ;;  %v8911_v50 = vld [vmem:[%s11617_s2 + $0x190] sm:$0xff]   ;;  %v10792_v62 = vld [vmem:[#allocation2 + $0x3c] sm:$0xff]  }
 0x259   : > { %8310 = vmatprep.mubr.bf16.mxu1 %v4419_v8  ;;  %v3871_v3 = vsel %vm521_vm1, %v3869_v46, %v3870_v24  ;;  %v3872_v6 = vrot.slane %v10763_v41, 1  ;;  %v3875_v58 = vrot.slane %v10768_v47, 1  ;;  %v3668_v59 = vshrl.u32 %v10743_v49, 16  ;;  %v10795_v36 = vld [vmem:[#allocation2 + $0x44] ss:$0 sps:$4 sm:$0x11]  }
 0x25a   : > { %v4341_v55 = vor.u32 %v4340_v45, %v4336_v34  ;;  %v3672_v35 = vrot.slane %v3670_v14, 1  ;;  %v3675_v5 = vshll.u32 %v8893_v7, 16  ;;  %v3873_v37 = vrot.slane %v10765_v31, 1  ;;  %v8917_v8 = vld [vmem:[%s11617_s2 + $0x198] sm:$0xff]   ;;  %v8935_v43 = vld [vmem:[%s11617_s2 + $0x1b0] sm:$0xff]  }
 0x25b   : > { %v8884_v60 = vld [vmem:[#allocation2 + $0xc8] ss:$0 sps:$4 sm:$0x11]   ;;  %v3876_v54 = vrot.slane %v10774_v63, 1  ;;  %v3682_v17 = vshll.u32 %v10746_v20, 16  ;;  %v3881_v11 = vrot.slane %v10797_v52, 1 }
 0x25c   : > { %v4346_v21 = vsel %vm280_vm0, %v4341_v55, %v4345_v27  ;;  %v4421_v0 = vrot.slane %v8884_v60, 1  ;;  %v4355_v40 = vshll.u32 %v8884_v60, 16  ;;  %v3874_v53 = vsel %vm521_vm1, %v3872_v6, %v3873_v37  ;;  %v10802_v45 = vld [vmem:[#allocation2 + $0x50] ss:$0 sps:$4 sm:$0x11]   ;;  %v8920_v55 = vld [vmem:[%s11617_s2 + $0x1e0] sm:$0xff]  }
 0x25d   : > { %4769 = vmatmul.mubr.bf16.gmra.mrb[212].mxu0 %v8869_v30  ;;  %v8883_v51 = vld [vmem:[#allocation2 + $0xc0] sm:$0xff]   ;;  %v8902_v30 = vld [vmem:[%s11617_s2 + $0x1c8] sm:$0xff]   ;;  %v3877_v26 = vsel %vm521_vm1, %v3875_v58, %v3876_v54  ;;  %v3677_v34 = vrot.slane %v3675_v5, 1  ;;  %v3684_v60 = vrot.slane %v3682_v17, 1  ;;  %v3680_v28 = vshrl.u32 %v10746_v20, 16  ;;  %v8938_v48 = vld [vmem:[%s11617_s2 + $0x1f8] sm:$0xff]  }
 0x25e   : > { %4776 = vmatprep.mubr.bf16.mxu0 %v4346_v21  ;;  %v4420_v9 = vrot.slane %v8883_v51, 1  ;;  %v4350_v10 = vshll.u32 %v8883_v51, 16  ;;  %v4348_v4 = vshrl.u32 %v8883_v51, 16  ;;  %v4357_v13 = vrot.slane %v4355_v40, 1  ;;  %v10854_v14 = vld [vmem:[#allocation2 + $0x6c] sm:$0xff]   ;;  %v10869_v6 = vld [vmem:[%s11617_s2 + $0x200] sm:$0xff]  }
 0x25f   : > { %v3878_v21 = vrot.slane %v10792_v62, 1  ;;  %v3879_v1 = vrot.slane %v10795_v36, 1  ;;  %v10828_v38 = vld [vmem:[#allocation2 + $0x5c] ss:$0 sps:$4 sm:$0x11]   ;;  %v3692_v46 = vshrl.u32 %v10763_v41, 16 }
 0x260   : > { %v4422_v16 = vsel %vm521_vm1, %v4420_v9, %v4421_v0  ;;  %v4352_v44 = vrot.slane %v4350_v10, 1  ;;  %v8923_v9 = vld [vmem:[%s11617_s2 + $0x1a0] sm:$0xff]   ;;  %v8926_v0 = vld [vmem:[%s11617_s2 + $0x1e8] sm:$0xff]   ;;  %v3685_v10 = vor.u32 %v3684_v60, %v3680_v28  ;;  %v3699_v42 = vshll.u32 %v10765_v31, 16 }
 0x261   : > { %8311 = vmatmul.mubr.bf16.gmra.mrb[124].mxu1 %v4422_v16  ;;  %v3880_v40 = vsel %vm521_vm1, %v3878_v21, %v3879_v1  ;;  %v10823_v16 = vld [vmem:[#allocation2 + $0x54] sm:$0xff]   ;;  %v3890_v5 = vrot.slane %v10854_v14, 1  ;;  %v3711_v54 = vshll.u32 %v10774_v63, 16  ;;  %v3718_v17 = vshll.u32 %v10792_v62, 16 }
 0x262   : > { %v4353_v56 = vor.u32 %v4352_v44, %v4348_v4  ;;  %8330 = vmatprep.mubr.bf16.mxu1 %v3865_v15  ;;  %v3694_v15 = vshll.u32 %v10763_v41, 16  ;;  %v10826_v44 = vld [vmem:[#allocation2 + $0x60] sm:$0xff]   ;;  %v3723_v1 = vshll.u32 %v10795_v36, 16 }
 0x263   : > { %v3887_v39 = vrot.slane %v10826_v44, 1  ;;  %v3713_v63 = vrot.slane %v3711_v54, 1  ;;  %v3720_v21 = vrot.slane %v3718_v17, 1 }
 0x264   : > { %v4358_v29 = vsel %vm280_vm0, %v4353_v56, %v4357_v13  ;;  %v8929_v56 = vld [vmem:[%s11617_s2 + $0x1a8] sm:$0xff]   ;;  %v3696_v18 = vrot.slane %v3694_v15, 1  ;;  %v3725_v36 = vrot.slane %v3723_v1, 1 }
 0x265   : > { %4777 = vmatmul.mubr.bf16.gmra.mrb[216].mxu0 %v8876_v2  ;;  %v3673_v2 = vor.u32 %v3672_v35, %v3668_v59  ;;  %v10833_v13 = vld [vmem:[#allocation2 + $0x68] ss:$0 sps:$4 sm:$0x11]   ;;  %v10864_v35 = vld [vmem:[#allocation2 + $0x80] ss:$0 sps:$4 sm:$0x11]  }
 0x266   : > { %4784 = vmatprep.mubr.bf16.mxu0 %v4358_v29  ;;  %v3884_v29 = vrot.slane %v10823_v16, 1  ;;  %v3697_v24 = vor.u32 %v3696_v18, %v3692_v46  ;;  %v10911_v18 = vld [vmem:[#allocation2 + $0xb0] ss:$0 sps:$4 sm:$0x11]   ;;  %v10915_v46 = vld [vmem:[#allocation2 + $0x24] sm:$0xff]  }
 0x267   : > { %v3678_v27 = vsel %vm280_vm0, %v3673_v2, %v3677_v34  ;;  %v3894_v2 = vrot.slane %v10864_v35, 1  ;;  %v10885_v34 = vld [vmem:[#allocation2 + $0x90] sm:$0xff]  }
 0x268   : > { %v3899_v28 = vrot.slane %v10885_v34, 1 }
 0x269   : > { %8331 = vmatmul.mubr.bf16.vlgmr.msra.gmra.mrb[96].mxu1 %v3868_v61  ;;  %v3706_v61 = vshll.u32 %v10768_v47, 16 }
 0x26a   : > { %8334 = vmatprep.mubr.bf16.mxu1 %v3871_v3  ;;  %7987 = vmatpush3.bf16.msra.mxu1 %v8898_v32  ;;  %v3885_v32 = vrot.slane %v10828_v38, 1  ;;  %v10857_v3 = vld [vmem:[#allocation2 + $0x78] sm:$0xff]  }
 0x26b   : > { %7988 = vmatprep.subr.bf16.mxu1 %v8902_v30  ;;  %v3708_v59 = vrot.slane %v3706_v61, 1  ;;  %v3893_v37 = vrot.slane %v10857_v3, 1  ;;  %v3906_v61 = vrot.slane %v10911_v18, 1 }
 0x26c   : > { %v3886_v30 = vsel %vm521_vm1, %v3884_v29, %v3885_v32 }
 0x26d   : > { %4785 = vmatmul.mubr.bf16.gmra.mrb[220].mxu0 %v8883_v51  ;;  %v3687_v51 = vshll.u32 %v10749_v12, 16  ;;  %v8932_v12 = vld [vmem:[%s11617_s2 + $0x1f0] sm:$0xff]  }
 0x26e   : > { %5130 = vmatprep.mubr.bf16.mxu0 %v3666_v22  ;;  %7989 = vmatpush3.bf16.msra.mxu1 %v8905_v33  ;;  %v3701_v22 = vrot.slane %v3699_v42, 1  ;;  %v10859_v33 = vld [vmem:[#allocation2 + $0x74] ss:$0 sps:$4 sm:$0x11]  }
 0x26f   : > { %7990 = vmatprep.subr.bf16.mxu1 %v8908_v19  ;;  %v3689_v7 = vrot.slane %v3687_v51, 1  ;;  %v8939_v19 = vld [vmem:[%s11617_s2 + $0x1b8] sm:$0xff]   ;;  %v3716_v51 = vshrl.u32 %v10792_v62, 16  ;;  %v8944_v42 = vld [vmem:[#allocation2 + $0x2c] ss:$0 sps:$4 sm:$0x11]  }
 0x270   : > { %v3702_v58 = vsel %vm280_vm0, %v3697_v24, %v3701_v22  ;;  %v3735_v24 = vshll.u32 %v10802_v45, 16 }
 0x271   : > { %8335 = vmatmul.mubr.bf16.gmra.mrb[100].mxu1 %v3874_v53  ;;  %v3690_v57 = vsel %vm280_vm0, %v3685_v10, %v3689_v7  ;;  %v3721_v10 = vor.u32 %v3720_v21, %v3716_v51  ;;  %v10906_v7 = vld [vmem:[#allocation2 + $0xa8] sm:$0xff]   ;;  %v5628_v21 = vshll.u32 %v10915_v46, 16 }
 0x272   : > { %8338 = vmatprep.mubr.bf16.mxu1 %v3877_v26  ;;  %7991 = vmatpush3.bf16.msra.mxu1 %v8911_v50  ;;  %v3704_v50 = vshrl.u32 %v10768_v47, 16  ;;  %v10882_v26 = vld [vmem:[#allocation2 + $0x84] sm:$0xff]   ;;  %v3737_v54 = vrot.slane %v3735_v24, 1 }
 0x273   : > { %7992 = vmatprep.subr.bf16.mxu1 %v8914_v25  ;;  %v3891_v25 = vrot.slane %v10859_v33, 1  ;;  %v3726_v29 = vsel %vm280_vm0, %v3721_v10, %v3725_v36  ;;  %v5626_v36 = vshrl.u32 %v10915_v46, 16 }
 0x275   : > { %5131 = vmatmul.mubr.bf16.vlgmr.msra.gmra.mrb[224].mxu0 %v10737_v23  ;;  %v3882_v23 = vrot.slane %v10802_v45, 1  ;;  %v3892_v53 = vsel %vm521_vm1, %v3890_v5, %v3891_v25  ;;  %v5825_v5 = vrot.slane %v8944_v42, 1  ;;  %v10933_v25 = vld [vmem:[#allocation2 + $0xbc] ss:$0 sps:$4 sm:$0x11]  }
 0x276   : > { %5138 = vmatprep.mubr.bf16.mxu0 %v3678_v27  ;;  %7993 = vmatpush3.bf16.msra.mxu1 %v8917_v8  ;;  %v3895_v8 = vsel %vm521_vm1, %v3893_v37, %v3894_v2  ;;  %v10889_v27 = vld [vmem:[#allocation2 + $0x98] ss:$0 sps:$4 sm:$0x11]   ;;  %v3909_v51 = vrot.slane %v10933_v25, 1 }
 0x277   : > { %7994 = vmatprep.subr.bf16.mxu1 %v8920_v55  ;;  %v3883_v4 = vsel %vm521_vm1, %v3881_v11, %v3882_v23  ;;  %v10887_v55 = vld [vmem:[#allocation2 + $0x8c] ss:$0 sps:$4 sm:$0x11]   ;;  %v3896_v11 = vrot.slane %v10882_v26, 1  ;;  %v3900_v23 = vrot.slane %v10889_v27, 1 }
 0x279   : > { %8339 = vmatmul.mubr.bf16.gmra.mrb[104].mxu1 %v3880_v40  ;;  %v3730_v40 = vshll.u32 %v10797_v52, 16  ;;  %v3901_v15 = vsel %vm521_vm1, %v3899_v28, %v3900_v23  ;;  %v3747_v28 = vshll.u32 %v10828_v38, 16 }
 0x27a   : > { %8342 = vmatprep.mubr.bf16.mxu1 %v3883_v4  ;;  %7995 = vmatpush3.bf16.msra.mxu1 %v8923_v9  ;;  %v3897_v9 = vrot.slane %v10887_v55, 1  ;;  %v10904_v4 = vld [vmem:[#allocation2 + $0xa4] ss:$0 sps:$4 sm:$0x11]  }
 0x27b   : > { %7996 = vmatprep.subr.bf16.mxu1 %v8926_v0  ;;  %v10899_v0 = vld [vmem:[#allocation2 + $0x9c] sm:$0xff]   ;;  %v3903_v32 = vrot.slane %v10904_v4, 1 }
 0x27d   : > { %5139 = vmatmul.mubr.bf16.gmra.mrb[228].mxu0 %v10743_v49  ;;  %v3888_v49 = vrot.slane %v10833_v13, 1 }
 0x27e   : > { %5146 = vmatprep.mubr.bf16.mxu0 %v3690_v57  ;;  %7997 = vmatpush3.bf16.msra.mxu1 %v8929_v56  ;;  %v10908_v56 = vld [vmem:[#allocation2 + $0x18] sm:$0xff]   ;;  %v3902_v57 = vrot.slane %v10899_v0, 1 }
 0x27f   : > { %7998 = vmatprep.subr.bf16.mxu1 %v8932_v12  ;;  %v3889_v31 = vsel %vm521_vm1, %v3887_v39, %v3888_v49  ;;  %v8941_v12 = vld [vmem:[#allocation2 + $0x20] ss:$0 sps:$4 sm:$0x11]   ;;  %v3732_v39 = vrot.slane %v3730_v40, 1  ;;  %v5616_v49 = vshll.u32 %v10908_v56, 16  ;;  %v10949_v40 = vld [vmem:[#allocation2 + $0x30] sm:$0xff]  }
 0x281   : > { %8343 = vmatmul.mubr.bf16.gmra.mrb[108].mxu1 %v3886_v30  ;;  %v5821_v30 = vrot.slane %v10908_v56, 1 }
 0x282   : > { %8346 = vmatprep.mubr.bf16.mxu1 %v3889_v31  ;;  %7999 = vmatpush3.bf16.msra.mxu1 %v8935_v43  ;;  %v3905_v43 = vrot.slane %v10906_v7, 1  ;;  %v5822_v31 = vrot.slane %v8941_v12, 1 }
 0x283   : > { %8000 = vmatprep.subr.bf16.mxu1 %v8938_v48  ;;  %v3728_v48 = vshrl.u32 %v10797_v52, 16 }
 0x284   : > { %v3907_v37 = vsel %vm521_vm1, %v3905_v43, %v3906_v61  ;;  %v10931_v45 = vsel %vm521_vm1, %v5821_v30, %v5822_v31  ;;  %v3759_v43 = vshll.u32 %v10833_v13, 16  ;;  %v10965_v61 = vld [vmem:[#allocation2 + $0x3c] sm:$0xff]   ;;  %v5638_v13 = vshrl.u32 %v10949_v40, 16 }
 0x285   : > { %5147 = vmatmul.mubr.bf16.gmra.mrb[232].mxu0 %v10746_v20  ;;  %v3709_v20 = vor.u32 %v3708_v59, %v3704_v50  ;;  %v3733_v22 = vor.u32 %v3732_v39, %v3728_v48  ;;  %v5824_v59 = vrot.slane %v10915_v46, 1  ;;  %v5618_v50 = vrot.slane %v5616_v49, 1  ;;  %v10957_v48 = vld [vmem:[#allocation2 + $0x38] ss:$0 sps:$4 sm:$0x11]  }
 0x286   : > { %5154 = vmatprep.mubr.bf16.mxu0 %v3702_v58  ;;  %8001 = vmatpush3.bf16.msra.mxu1 %v8939_v19  ;;  %v3742_v19 = vshll.u32 %v10823_v16, 16  ;;  %v10926_v58 = vld [vmem:[#allocation2 + $0xb4] sm:$0xff]   ;;  %v5640_v39 = vshll.u32 %v10949_v40, 16  ;;  %v3761_v31 = vrot.slane %v3759_v43, 1 }
 0x287   : > { %8362 = vmatprep.subr.bf16.mxu1 %v10869_v6  ;;  %v3714_v60 = vsel %vm280_vm0, %v3709_v20, %v3713_v63  ;;  %v10936_v2 = vsel %vm521_vm1, %v5824_v59, %v5825_v5  ;;  %v5614_v20 = vshrl.u32 %v10908_v56, 16  ;;  %v3738_v17 = vsel %vm280_vm0, %v3733_v22, %v3737_v54 }
 0x288   : > { %v3908_v63 = vrot.slane %v10926_v58, 1  ;;  %v5645_v22 = vshll.u32 %v10957_v48, 16 }
 0x289   : > { %8347 = vmatmul.mubr.bf16.gmra.mrb[112].mxu1 %v3892_v53  ;;  %v5621_v53 = vshll.u32 %v8941_v12, 16  ;;  %v5633_v12 = vshll.u32 %v8944_v42, 16  ;;  %v8947_v42 = vld [vmem:[%s11617_s2 + $0x208] sm:$0xff]  }
 0x28a   : > { %8350 = vmatprep.mubr.bf16.mxu1 %v3895_v8  ;;  %v3744_v8 = vrot.slane %v3742_v19, 1  ;;  %v3910_v23 = vsel %vm521_vm1, %v3908_v63, %v3909_v51  ;;  %v8952_v19 = vld [vmem:[%s11617_s2 + $0x210] sm:$0xff]   ;;  %v5647_v54 = vrot.slane %v5645_v22, 1  ;;  %v3802_v22 = vshll.u32 %v10885_v34, 16 }
 0x28b   : > { %v5623_v1 = vrot.slane %v5621_v53, 1  ;;  %v5635_v49 = vrot.slane %v5633_v12, 1 }
 0x28d   : > { %5155 = vmatmul.mubr.bf16.gmra.mrb[236].mxu0 %v10763_v41  ;;  %v3898_v41 = vsel %vm521_vm1, %v3896_v11, %v3897_v9  ;;  %v3740_v11 = vshrl.u32 %v10823_v16, 16 }
 0x28e   : > { %5162 = vmatprep.mubr.bf16.mxu0 %v3714_v60  ;;  %v5619_v60 = vor.u32 %v5618_v50, %v5614_v20  ;;  %v3771_v50 = vshll.u32 %v10859_v33, 16  ;;  %v10978_v20 = vld [vmem:[#allocation2 + $0x44] ss:$0 sps:$4 sm:$0x11]  }
 0x28f   : > { %v3745_v9 = vor.u32 %v3744_v8, %v3740_v11  ;;  %v5657_v11 = vshll.u32 %v10978_v20, 16 }
 0x290   : > { %v5624_v10 = vsel %vm280_vm0, %v5619_v60, %v5623_v1  ;;  %v10986_v60 = vld [vmem:[#allocation2 + $0x48] sm:$0xff]   ;;  %v3773_v33 = vrot.slane %v3771_v50, 1 }
 0x291   : > { %8351 = vmatmul.mubr.bf16.gmra.mrb[116].mxu1 %v3898_v41  ;;  %v5630_v41 = vrot.slane %v5628_v21, 1  ;;  %v5650_v21 = vshrl.u32 %v10965_v61, 16 }
 0x292   : > { %8354 = vmatprep.mubr.bf16.mxu1 %v3901_v15  ;;  %v3749_v15 = vrot.slane %v3747_v28, 1  ;;  %v8962_v28 = vld [vmem:[%s11617_s2 + $0x220] sm:$0xff]  }
 0x294   : > { %v3750_v38 = vsel %vm280_vm0, %v3745_v9, %v3749_v15  ;;  %v5664_v9 = vshll.u32 %v10986_v60, 16 }
 0x295   : > { %5163 = vmatmul.mubr.bf16.gmra.mrb[240].mxu0 %v10768_v47  ;;  %v3904_v47 = vsel %vm521_vm1, %v3902_v57, %v3903_v32  ;;  %v3752_v32 = vshrl.u32 %v10826_v44, 16 }
 0x296   : > { %5170 = vmatprep.mubr.bf16.mxu0 %v3726_v29  ;;  %v5631_v29 = vor.u32 %v5630_v41, %v5626_v36  ;;  %v10998_v41 = vld [vmem:[#allocation2 + $0x50] ss:$0 sps:$4 sm:$0x11]   ;;  %v3790_v36 = vshll.u32 %v10882_v26, 16 }
 0x298   : > { %v5636_v30 = vsel %vm280_vm0, %v5631_v29, %v5635_v49  ;;  %v5662_v29 = vshrl.u32 %v10986_v60, 16  ;;  %v3792_v49 = vrot.slane %v3790_v36, 1 }
 0x299   : > { %8355 = vmatmul.mubr.bf16.gmra.mrb[120].mxu1 %v3904_v47  ;;  %v5642_v47 = vrot.slane %v5640_v39, 1  ;;  %v5669_v39 = vshll.u32 %v10998_v41, 16 }
 0x29a   : > { %8358 = vmatprep.mubr.bf16.mxu1 %v3907_v37  ;;  %v5652_v37 = vshll.u32 %v10965_v61, 16 }
 0x29b   : > { %v5643_v5 = vor.u32 %v5642_v47, %v5638_v13  ;;  %v5671_v47 = vrot.slane %v5669_v39, 1 }
 0x29c   : > { %v5654_v63 = vrot.slane %v5652_v37, 1 }
 0x29d   : > { %5171 = vmatmul.mubr.bf16.gmra.mrb[244].mxu0 %v10792_v62  ;;  %v3754_v62 = vshll.u32 %v10826_v44, 16  ;;  %v5648_v8 = vsel %vm280_vm0, %v5643_v5, %v5647_v54 }
 0x29e   : > { %5178 = vmatprep.mubr.bf16.mxu0 %v3738_v17  ;;  %v3778_v17 = vshll.u32 %v10857_v3, 16  ;;  %v5655_v1 = vor.u32 %v5654_v63, %v5650_v21  ;;  %v3800_v21 = vshrl.u32 %v10885_v34, 16 }
 0x29f   : > { %v3756_v57 = vrot.slane %v3754_v62, 1  ;;  %v3783_v62 = vshll.u32 %v10864_v35, 16 }
 0x2a0   : > { %v3780_v51 = vrot.slane %v3778_v17, 1 }
 0x2a1   : > { %8359 = vmatmul.mubr.bf16.gmra.mrb[124].mxu1 %v3910_v23  ;;  %v3757_v24 = vor.u32 %v3756_v57, %v3752_v32  ;;  %v3776_v23 = vshrl.u32 %v10857_v3, 16  ;;  %v11006_v57 = vld [vmem:[#allocation2 + $0x54] sm:$0xff]   ;;  %v3785_v35 = vrot.slane %v3783_v62, 1  ;;  %v11044_v62 = vld [vmem:[#allocation2 + $0x6c] sm:$0xff]  }
 0x2a2   : > { %6110 = vmatprep.mubr.bf16.mxu1 %v5624_v10  ;;  %v5659_v10 = vrot.slane %v5657_v11, 1  ;;  %v8972_v32 = vld [vmem:[%s11617_s2 + $0x230] sm:$0xff]   ;;  %v5674_v37 = vshrl.u32 %v11006_v57, 16  ;;  %v3807_v11 = vshll.u32 %v10889_v27, 16 }
 0x2a3   : > { %v3781_v15 = vor.u32 %v3780_v51, %v3776_v23 }
 0x2a4   : > { %v5660_v12 = vsel %vm280_vm0, %v5655_v1, %v5659_v10  ;;  %v3814_v1 = vshll.u32 %v10899_v0, 16  ;;  %v3809_v10 = vrot.slane %v3807_v11, 1 }
 0x2a5   : > { %5179 = vmatmul.mubr.bf16.gmra.mrb[248].mxu0 %v10797_v52  ;;  %v3766_v52 = vshll.u32 %v10854_v14, 16  ;;  %v3786_v43 = vsel %vm280_vm0, %v3781_v15, %v3785_v35 }
 0x2a6   : > { %5186 = vmatprep.mubr.bf16.mxu0 %v3750_v38  ;;  %v5666_v38 = vrot.slane %v5664_v9, 1 }
 0x2a7   : > { %v3768_v59 = vrot.slane %v3766_v52, 1  ;;  %v3788_v52 = vshrl.u32 %v10882_v26, 16 }
 0x2a9   : > { %6111 = vmatmul.mubr.bf16.vlgmr.msra.gmra.mrb[128].mxu1 %v10908_v56  ;;  %v3762_v56 = vsel %vm280_vm0, %v3757_v24, %v3761_v31  ;;  %v5676_v24 = vshll.u32 %v11006_v57, 16  ;;  %v11018_v31 = vld [vmem:[#allocation2 + $0x5c] ss:$0 sps:$4 sm:$0x11]   ;;  %v3793_v13 = vor.u32 %v3792_v49, %v3788_v52  ;;  %v3819_v49 = vshll.u32 %v10904_v4, 16 }
 0x2aa   : > { %6118 = vmatprep.mubr.bf16.mxu1 %v5636_v30  ;;  %8363 = vmatpush3.bf16.msra.mxu1 %v10869_v6  ;;  %v3764_v6 = vshrl.u32 %v10854_v14, 16  ;;  %v3795_v30 = vshll.u32 %v10887_v55, 16  ;;  %v11055_v52 = vld [vmem:[#allocation2 + $0x74] ss:$0 sps:$4 sm:$0x11]   ;;  %v5698_v4 = vshrl.u32 %v11044_v62, 16 }
 0x2ab   : > { %8364 = vmatprep.subr.bf16.mxu1 %v8947_v42 }
 0x2ac   : > { %v3769_v53 = vor.u32 %v3768_v59, %v3764_v6  ;;  %v11026_v59 = vld [vmem:[#allocation2 + $0x60] sm:$0xff]   ;;  %v3797_v55 = vrot.slane %v3795_v30, 1  ;;  %v5681_v6 = vshll.u32 %v11018_v31, 16 }
 0x2ad   : > { %5187 = vmatmul.mubr.bf16.gmra.mrb[252].mxu0 %v10823_v16  ;;  %v8957_v16 = vld [vmem:[%s11617_s2 + $0x218] sm:$0xff]   ;;  %v5688_v63 = vshll.u32 %v11026_v59, 16  ;;  %v5686_v27 = vshrl.u32 %v11026_v59, 16 }
 0x2ae   : > { %5194 = vmatprep.mubr.bf16.mxu0 %v3762_v56  ;;  %8365 = vmatpush3.bf16.msra.mxu1 %v8947_v42  ;;  %v5667_v42 = vor.u32 %v5666_v38, %v5662_v29  ;;  %v5678_v56 = vrot.slane %v5676_v24, 1  ;;  %v3798_v50 = vsel %vm280_vm0, %v3793_v13, %v3797_v55  ;;  %v5700_v29 = vshll.u32 %v11044_v62, 16 }
 0x2af   : > { %8366 = vmatprep.subr.bf16.mxu1 %v8952_v19  ;;  %v5690_v23 = vrot.slane %v5688_v63, 1 }
 0x2b0   : > { %v5702_v13 = vrot.slane %v5700_v29, 1  ;;  %v3836_v29 = vshrl.u32 %v10926_v58, 16 }
 0x2b1   : > { %6119 = vmatmul.mubr.bf16.gmra.mrb[132].mxu1 %v10915_v46  ;;  %v3774_v46 = vsel %vm280_vm0, %v3769_v53, %v3773_v33  ;;  %v5691_v35 = vor.u32 %v5690_v23, %v5686_v27  ;;  %v11080_v23 = vld [vmem:[#allocation2 + $0x84] sm:$0xff]  }
 0x2b2   : > { %6126 = vmatprep.mubr.bf16.mxu1 %v5648_v8  ;;  %8367 = vmatpush3.bf16.msra.mxu1 %v8952_v19  ;;  %v5672_v19 = vsel %vm280_vm0, %v5667_v42, %v5671_v47  ;;  %v5679_v8 = vor.u32 %v5678_v56, %v5674_v37  ;;  %v3826_v47 = vshll.u32 %v10906_v7, 16  ;;  %v5705_v56 = vshll.u32 %v11055_v52, 16 }
 0x2b3   : > { %8368 = vmatprep.subr.bf16.mxu1 %v8957_v16 }
 0x2b5   : > { %5195 = vmatmul.mubr.bf16.gmra.mrb[0].mxu0 %v10826_v44  ;;  %v8967_v44 = vld [vmem:[%s11617_s2 + $0x228] sm:$0xff]  }
 0x2b6   : > { %5202 = vmatprep.mubr.bf16.mxu0 %v3774_v46  ;;  %8369 = vmatpush3.bf16.msra.mxu1 %v8957_v16  ;;  %v3804_v16 = vrot.slane %v3802_v22, 1  ;;  %v11039_v46 = vld [vmem:[#allocation2 + $0x68] ss:$0 sps:$4 sm:$0x11]   ;;  %v11062_v22 = vld [vmem:[#allocation2 + $0x78] sm:$0xff]  }
 0x2b7   : > { %8370 = vmatprep.subr.bf16.mxu1 %v8962_v28 }
 0x2b8   : > { %v3805_v51 = vor.u32 %v3804_v16, %v3800_v21  ;;  %v3824_v16 = vshrl.u32 %v10906_v7, 16  ;;  %v11073_v21 = vld [vmem:[#allocation2 + $0x80] ss:$0 sps:$4 sm:$0x11]  }
 0x2b9   : > { %6127 = vmatmul.mubr.bf16.gmra.mrb[136].mxu1 %v10949_v40  ;;  %v5717_v27 = vshll.u32 %v11073_v21, 16 }
 0x2ba   : > { %6134 = vmatprep.mubr.bf16.mxu1 %v5660_v12  ;;  %8371 = vmatpush3.bf16.msra.mxu1 %v8962_v28  ;;  %v3810_v15 = vsel %vm280_vm0, %v3805_v51, %v3809_v10  ;;  %v3816_v12 = vrot.slane %v3814_v1, 1  ;;  %v5710_v10 = vshrl.u32 %v11062_v22, 16 }
 0x2bb   : > { %8372 = vmatprep.subr.bf16.mxu1 %v8967_v44 }
 0x2bd   : > { %5203 = vmatmul.mubr.bf16.gmra.mrb[4].mxu0 %v10854_v14  ;;  %v8977_v14 = vld [vmem:[%s11617_s2 + $0x238] sm:$0xff]  }
 0x2be   : > { %5210 = vmatprep.mubr.bf16.mxu0 %v3786_v43  ;;  %8373 = vmatpush3.bf16.msra.mxu1 %v8967_v44  ;;  %v5693_v44 = vshll.u32 %v11039_v46, 16  ;;  %v3812_v43 = vshrl.u32 %v10899_v0, 16 }
 0x2bf   : > { %8374 = vmatprep.subr.bf16.mxu1 %v8972_v32 }
 0x2c0   : > { %v5695_v24 = vrot.slane %v5693_v44, 1  ;;  %v3817_v30 = vor.u32 %v3816_v12, %v3812_v43 }
 0x2c1   : > { %6135 = vmatmul.mubr.bf16.gmra.mrb[140].mxu1 %v10965_v61 }
 0x2c2   : > { %6142 = vmatprep.mubr.bf16.mxu1 %v5672_v19  ;;  %8375 = vmatpush3.bf16.msra.mxu1 %v8972_v32  ;;  %v7730_v5 = vpop.f32.mrb[160].mxu0  ;;  %v3821_v19 = vrot.slane %v3819_v49, 1 }
 0x2c3   : > { %8376 = vmatprep.subr.bf16.mxu1 %v8977_v14  ;;  %v7731_v54 = vpop.f32.mrb[161].mxu0 }
 0x2c4   : > { %v11032_v53 = vadd.f32 %v7731_v54, %v7730_v5  ;;  %v7733_v17 = vpop.f32.mrb[162].mxu0  ;;  %v3822_v55 = vsel %vm280_vm0, %v3817_v30, %v3821_v19  ;;  %v3828_v5 = vrot.slane %v3826_v47, 1  ;;  %v11097_v19 = vld [vmem:[#allocation2 + $0x90] sm:$0xff]  }
 0x2c5   : > { %5211 = vmatmul.mubr.bf16.gmra.mrb[8].mxu0 %v10857_v3  ;;  %v7734_v33 = vpop.f32.mrb[163].mxu0  ;;  %v5683_v3 = vrot.slane %v5681_v6, 1  ;;  %v5703_v6 = vor.u32 %v5702_v13, %v5698_v4 }
 0x2c6   : > { %5218 = vmatprep.mubr.bf16.mxu0 %v3798_v50  ;;  %8377 = vmatpush3.bf16.msra.mxu1 %v8977_v14  ;;  %v11037_v28 = vadd.f32 %v7734_v33, %v7733_v17  ;;  %v5696_v14 = vsel %vm280_vm0, %v5691_v35, %v5695_v24  ;;  %v5712_v50 = vshll.u32 %v11062_v22, 16  ;;  %v3831_v17 = vshll.u32 %v10911_v18, 16  ;;  %v11091_v24 = vld [vmem:[#allocation2 + $0x8c] ss:$0 sps:$4 sm:$0x11]  }
 0x2c7   : > { %v5684_v9 = vsel %vm280_vm0, %v5679_v8, %v5683_v3  ;;  %v5707_v33 = vrot.slane %v5705_v56, 1  ;;  %v3829_v11 = vor.u32 %v3828_v5, %v3824_v16  ;;  %v3838_v3 = vshll.u32 %v10926_v58, 16 }
 0x2c8   : > { %v3833_v18 = vrot.slane %v3831_v17, 1  ;;  %v5729_v56 = vshll.u32 %v11091_v24, 16 }
 0x2c9   : > { %6143 = vmatmul.mubr.bf16.gmra.mrb[144].mxu1 %v10986_v60  ;;  %v5708_v1 = vsel %vm280_vm0, %v5703_v6, %v5707_v33 }
 0x2ca   : > { %6150 = vmatprep.mubr.bf16.mxu1 %v5684_v9  ;;  %v5714_v9 = vrot.slane %v5712_v50, 1  ;;  %v3834_v44 = vsel %vm280_vm0, %v3829_v11, %v3833_v18  ;;  %v5731_v50 = vrot.slane %v5729_v56, 1 }
 0x2cc   : > { %v5715_v12 = vor.u32 %v5714_v9, %v5710_v10 }
 0x2cd   : > { %5219 = vmatmul.mubr.bf16.gmra.mrb[12].mxu0 %v10882_v26  ;;  %v7736_v36 = vpop.f32.mrb[164].mxu0 }
 0x2ce   : > { %5226 = vmatprep.mubr.bf16.mxu0 %v3810_v15  ;;  %v7737_v38 = vpop.f32.mrb[165].mxu0  ;;  %v3840_v15 = vrot.slane %v3838_v3, 1 }
 0x2cf   : > { %v11051_v39 = vadd.f32 %v7737_v38, %v7736_v36  ;;  %v7739_v32 = vpop.f32.mrb[166].mxu0  ;;  %v5724_v38 = vshll.u32 %v11080_v23, 16 }
 0x2d0   : > { %v7740_v42 = vpop.f32.mrb[167].mxu0  ;;  %v3841_v30 = vor.u32 %v3840_v15, %v3836_v29  ;;  %v11118_v15 = vld [vmem:[#allocation2 + $0xa4] ss:$0 sps:$4 sm:$0x11]  }
 0x2d1   : > { %v11057_v26 = vadd.f32 %v7740_v42, %v7739_v32  ;;  %6151 = vmatmul.mubr.bf16.gmra.mrb[148].mxu1 %v11006_v57  ;;  %v3843_v32 = vshll.u32 %v10933_v25, 16  ;;  %v5719_v42 = vrot.slane %v5717_v27, 1  ;;  %v5726_v13 = vrot.slane %v5724_v38, 1 }
 0x2d2   : > { %6158 = vmatprep.mubr.bf16.mxu1 %v5696_v14  ;;  %v5722_v25 = vshrl.u32 %v11080_v23, 16 }
 0x2d3   : > { %v5720_v14 = vsel %vm280_vm0, %v5715_v12, %v5719_v42  ;;  %v3845_v4 = vrot.slane %v3843_v32, 1  ;;  %v11124_v32 = vld [vmem:[#allocation2 + $0xa8] sm:$0xff]  }
 0x2d4   : > { %v5727_v5 = vor.u32 %v5726_v13, %v5722_v25  ;;  %v11131_v25 = vld [vmem:[#allocation2 + $0xb0] ss:$0 sps:$4 sm:$0x11]  }
 0x2d5   : > { %5227 = vmatmul.mubr.bf16.gmra.mrb[16].mxu0 %v10885_v34 }
 0x2d6   : > { %5234 = vmatprep.mubr.bf16.mxu0 %v3822_v55  ;;  %v7742_v37 = vpop.f32.mrb[168].mxu0  ;;  %v3846_v55 = vsel %vm280_vm0, %v3841_v30, %v3845_v4  ;;  %v5732_v33 = vsel %vm280_vm0, %v5727_v5, %v5731_v50  ;;  %v11137_v50 = vld [vmem:[#allocation2 + $0xb4] sm:$0xff]  }
 0x2d7   : > { %v7743_v54 = vpop.f32.mrb[169].mxu0 }
 0x2d8   : > { %v11071_v8 = vadd.f32 %v7743_v54, %v7742_v37  ;;  %v7745_v63 = vpop.f32.mrb[170].mxu0  ;;  %v5736_v37 = vshll.u32 %v11097_v19, 16  ;;  %v11104_v54 = vld [vmem:[#allocation2 + $0x98] ss:$0 sps:$4 sm:$0x11]  }
 0x2d9   : > { %v7746_v34 = vpop.f32.mrb[171].mxu0  ;;  %6159 = vmatmul.mubr.bf16.gmra.mrb[152].mxu1 %v11026_v59  ;;  %v5741_v9 = vshll.u32 %v11104_v54, 16 }
 0x2da   : > { %v11076_v51 = vadd.f32 %v7746_v34, %v7745_v63  ;;  %6166 = vmatprep.mubr.bf16.mxu1 %v5708_v1  ;;  %v5738_v34 = vrot.slane %v5736_v37, 1  ;;  %v5734_v1 = vshrl.u32 %v11097_v19, 16 }
 0x2dc   : > { %v5739_v18 = vor.u32 %v5738_v34, %v5734_v1  ;;  %v5765_v34 = vshll.u32 %v11131_v25, 16  ;;  %v5772_v1 = vshll.u32 %v11137_v50, 16 }
 0x2dd   : > { %5235 = vmatmul.mubr.bf16.gmra.mrb[20].mxu0 %v10899_v0 }
 0x2de   : > { %5242 = vmatprep.mubr.bf16.mxu0 %v3834_v44  ;;  %v5743_v44 = vrot.slane %v5741_v9, 1 }
 0x2df   : > { %v7748_v36 = vpop.f32.mrb[172].mxu0 }
 0x2e0   : > { %v7749_v35 = vpop.f32.mrb[173].mxu0 }
 0x2e1   : > { %v11089_v43 = vadd.f32 %v7749_v35, %v7748_v36  ;;  %v7751_v49 = vpop.f32.mrb[174].mxu0  ;;  %6167 = vmatmul.mubr.bf16.gmra.mrb[156].mxu1 %v11044_v62  ;;  %v5744_v35 = vsel %vm280_vm0, %v5739_v18, %v5743_v44  ;;  %v5767_v18 = vrot.slane %v5765_v34, 1 }
 0x2e2   : > { %v7752_v0 = vpop.f32.mrb[175].mxu0  ;;  %6174 = vmatprep.mubr.bf16.mxu1 %v5720_v14  ;;  %v5760_v14 = vshll.u32 %v11124_v32, 16 }
 0x2e3   : > { %v11093_v47 = vadd.f32 %v7752_v0, %v7751_v49  ;;  %v5753_v0 = vshll.u32 %v11118_v15, 16 }
 0x2e5   : > { %5243 = vmatmul.mubr.bf16.gmra.mrb[24].mxu0 %v10906_v7  ;;  %v11110_v7 = vld [vmem:[#allocation2 + $0x9c] sm:$0xff]   ;;  %v5755_v4 = vrot.slane %v5753_v0, 1  ;;  %v5770_v0 = vshrl.u32 %v11137_v50, 16 }
 0x2e6   : > { %5250 = vmatprep.mubr.bf16.mxu0 %v3846_v55  ;;  %v5748_v10 = vshll.u32 %v11110_v7, 16  ;;  %v5746_v42 = vshrl.u32 %v11110_v7, 16 }
 0x2e8   : > { %v7754_v6 = vpop.f32.mrb[176].mxu0  ;;  %v5750_v29 = vrot.slane %v5748_v10, 1  ;;  %v11144_v10 = vld [vmem:[#allocation2 + $0xbc] ss:$0 sps:$4 sm:$0x11]  }
 0x2e9   : > { %v7755_v16 = vpop.f32.mrb[177].mxu0  ;;  %6175 = vmatmul.mubr.bf16.gmra.mrb[160].mxu1 %v11062_v22 }
 0x2ea   : > { %v11106_v17 = vadd.f32 %v7755_v16, %v7754_v6  ;;  %v7757_v63 = vpop.f32.mrb[178].mxu0  ;;  %6182 = vmatprep.mubr.bf16.mxu1 %v5732_v33  ;;  %v5751_v30 = vor.u32 %v5750_v29, %v5746_v42  ;;  %v5762_v6 = vrot.slane %v5760_v14, 1  ;;  %v5758_v33 = vshrl.u32 %v11124_v32, 16  ;;  %v11150_v29 = vld [vmem:[#allocation2 + $0xc0] sm:$0xff]  }
 0x2eb   : > { %v7758_v11 = vpop.f32.mrb[179].mxu0 }
 0x2ec   : > { %v11112_v3 = vadd.f32 %v7758_v11, %v7757_v63  ;;  %v5756_v37 = vsel %vm280_vm0, %v5751_v30, %v5755_v4  ;;  %v5763_v11 = vor.u32 %v5762_v6, %v5758_v33  ;;  %v5777_v30 = vshll.u32 %v11144_v10, 16 }
 0x2ed   : > { %5251 = vmatmul.mubr.bf16.gmra.mrb[28].mxu0 %v10926_v58 }
 0x2f0   : > { %v7760_v27 = vpop.f32.mrb[180].mxu0 }
 0x2f1   : > { %v7761_v36 = vpop.f32.mrb[181].mxu0  ;;  %6183 = vmatmul.mubr.bf16.gmra.mrb[164].mxu1 %v11080_v23 }
 0x2f2   : > { %v11120_v12 = vadd.f32 %v7761_v36, %v7760_v27  ;;  %v7763_v38 = vpop.f32.mrb[182].mxu0  ;;  %6190 = vmatprep.mubr.bf16.mxu1 %v5744_v35  ;;  %v5774_v35 = vrot.slane %v5772_v1, 1 }
 0x2f3   : > { %v7764_v49 = vpop.f32.mrb[183].mxu0 }
 0x2f4   : > { %v11126_v58 = vadd.f32 %v7764_v49, %v7763_v38  ;;  %v5768_v38 = vsel %vm280_vm0, %v5763_v11, %v5767_v18  ;;  %v5775_v14 = vor.u32 %v5774_v35, %v5770_v0  ;;  %v5782_v18 = vshrl.u32 %v11150_v29, 16 }
 0x2f8   : > { %v7766_v13 = vpop.f32.mrb[184].mxu0 }
 0x2f9   : > { %v7767_v56 = vpop.f32.mrb[185].mxu0  ;;  %6191 = vmatmul.mubr.bf16.gmra.mrb[168].mxu1 %v11097_v19 }
 0x2fa   : > { %v11133_v55 = vadd.f32 %v7767_v56, %v7766_v13  ;;  %v7769_v5 = vpop.f32.mrb[186].mxu0  ;;  %6198 = vmatprep.mubr.bf16.mxu1 %v5756_v37  ;;  %v5784_v13 = vshll.u32 %v11150_v29, 16  ;;  %v5779_v56 = vrot.slane %v5777_v30, 1  ;;  %v11159_v37 = vld [vmem:[#allocation2 + $0xcc] sm:$0xff]  }
 0x2fb   : > { %v7770_v16 = vpop.f32.mrb[187].mxu0  ;;  %v5794_v30 = vshrl.u32 %v11159_v37, 16 }
 0x2fc   : > { %v11139_v63 = vadd.f32 %v7770_v16, %v7769_v5  ;;  %v11157_v5 = vld [vmem:[#allocation2 + $0xc8] ss:$0 sps:$4 sm:$0x11]   ;;  %v5780_v34 = vsel %vm280_vm0, %v5775_v14, %v5779_v56  ;;  %v5786_v11 = vrot.slane %v5784_v13, 1 }
 0x2fe   : > { %v5787_v35 = vor.u32 %v5786_v11, %v5782_v18 }
 0x300   : > { %v7772_v9 = vpop.f32.mrb[188].mxu0 }
 0x301   : > { %v7773_v27 = vpop.f32.mrb[189].mxu0  ;;  %6199 = vmatmul.mubr.bf16.gmra.mrb[172].mxu1 %v11110_v7 }
 0x302   : > { %v11146_v44 = vadd.f32 %v7773_v27, %v7772_v9  ;;  %v7775_v36 = vpop.f32.mrb[190].mxu0  ;;  %6206 = vmatprep.mubr.bf16.mxu1 %v5768_v38  ;;  %v5789_v27 = vshll.u32 %v11157_v5, 16  ;;  %v5796_v38 = vshll.u32 %v11159_v37, 16 }
 0x303   : > { %v7776_v49 = vpop.f32.mrb[191].mxu0 }
 0x304   : > { %v11152_v42 = vadd.f32 %v7776_v49, %v7775_v36  ;;  %v11169_v36 = vld [vmem:[#allocation2 + $0xd4] ss:$0 sps:$4 sm:$0x11]   ;;  %v5791_v0 = vrot.slane %v5789_v27, 1 }
 0x305   : > { %v5801_v14 = vshll.u32 %v11169_v36, 16 }
 0x306   : > { %11657 = vst [vmem:[#allocation11_spill] sm:$0xff] %v11152_v42 }
 0x307   : > { %v5803_v18 = vrot.slane %v5801_v14, 1  ;;  %v5827_v14 = vrot.slane %v10949_v40, 1  ;;  %v5831_v40 = vrot.slane %v10978_v20, 1  ;;  %v5839_v20 = vrot.slane %v11026_v59, 1 }
 0x308   : > { %v7778_v4 = vpop.f32.mrb[192].mxu0  ;;  %v5843_v59 = vrot.slane %v11055_v52, 1  ;;  %v5851_v52 = vrot.slane %v11097_v19, 1  ;;  %v5854_v19 = vrot.slane %v11110_v7, 1 }
 0x309   : > { %v7779_v6 = vpop.f32.mrb[193].mxu0  ;;  %6207 = vmatmul.mubr.bf16.gmra.mrb[176].mxu1 %v11124_v32 }
 0x30a   : > { %v11161_v16 = vadd.f32 %v7779_v6, %v7778_v4  ;;  %v7781_v33 = vpop.f32.mrb[194].mxu0  ;;  %6214 = vmatprep.mubr.bf16.mxu1 %v5780_v34  ;;  %v5798_v4 = vrot.slane %v5796_v38, 1 }
 0x30b   : > { %v7782_v1 = vpop.f32.mrb[195].mxu0 }
 0x30c   : > { %11658 = vst [vmem:[#allocation10_spill] sm:$0xff] %v11161_v16  ;;  %v11165_v9 = vadd.f32 %v7782_v1, %v7781_v33  ;;  %v5792_v33 = vsel %vm280_vm0, %v5787_v35, %v5791_v0  ;;  %v5799_v11 = vor.u32 %v5798_v4, %v5794_v30 }
 0x30e   : > { %11659 = vst [vmem:[#allocation7_spill] sm:$0xff] %v11165_v9  ;;  %v5804_v9 = vsel %vm280_vm0, %v5799_v11, %v5803_v18  ;;  %v5828_v11 = vrot.slane %v10957_v48, 1  ;;  %v5834_v48 = vrot.slane %v10998_v41, 1 }
 0x310   : > { %v7784_v49 = vpop.f32.mrb[196].mxu0 }
 0x311   : > { %v7785_v13 = vpop.f32.mrb[197].mxu0  ;;  %6215 = vmatmul.mubr.bf16.gmra.mrb[180].mxu1 %v11137_v50 }
 0x312   : > { %v11174_v56 = vadd.f32 %v7785_v13, %v7784_v49  ;;  %v7787_v6 = vpop.f32.mrb[198].mxu0  ;;  %6222 = vmatprep.mubr.bf16.mxu1 %v5792_v33 }
 0x313   : > { %v7788_v34 = vpop.f32.mrb[199].mxu0 }
 0x314   : > { %v11178_v1 = vadd.f32 %v7788_v34, %v7787_v6 }
 0x318   : > { %v7790_v27 = vpop.f32.mrb[200].mxu0 }
 0x319   : > { %v7791_v38 = vpop.f32.mrb[201].mxu0  ;;  %6223 = vmatmul.mubr.bf16.gmra.mrb[184].mxu1 %v11150_v29 }
 0x31a   : > { %v11181_v16 = vadd.f32 %v7791_v38, %v7790_v27  ;;  %v7793_v42 = vpop.f32.mrb[202].mxu0  ;;  %6230 = vmatprep.mubr.bf16.mxu1 %v5804_v9  ;;  %v5829_v27 = vsel %vm521_vm1, %v5827_v14, %v5828_v11 }
 0x31b   : > { %v7794_v49 = vpop.f32.mrb[203].mxu0 }
 0x31c   : > { %v11184_v13 = vadd.f32 %v7794_v49, %v7793_v42 }
 0x320   : > { %v7796_v35 = vpop.f32.mrb[204].mxu0 }
 0x321   : > { %v7797_v0 = vpop.f32.mrb[205].mxu0  ;;  %6231 = vmatmul.mubr.bf16.gmra.mrb[188].mxu1 %v11159_v37 }
 0x322   : > { %v11186_v33 = vadd.f32 %v7797_v0, %v7796_v35  ;;  %v7799_v6 = vpop.f32.mrb[206].mxu0  ;;  %8378 = vmatprep.mubr.bf16.mxu1 %v10931_v45  ;;  %v5830_v45 = vrot.slane %v10965_v61, 1  ;;  %v5833_v35 = vrot.slane %v10986_v60, 1  ;;  %v5836_v61 = vrot.slane %v11006_v57, 1 }
 0x323   : > { %v7800_v30 = vpop.f32.mrb[207].mxu0  ;;  %v5837_v60 = vrot.slane %v11018_v31, 1  ;;  %v5842_v57 = vrot.slane %v11044_v62, 1  ;;  %v5845_v31 = vrot.slane %v11062_v22, 1  ;;  %v5848_v62 = vrot.slane %v11080_v23, 1 }
 0x324   : > { %v11190_v4 = vadd.f32 %v7800_v30, %v7799_v6  ;;  %v5832_v30 = vsel %vm521_vm1, %v5830_v45, %v5831_v40  ;;  %v5835_v14 = vsel %vm521_vm1, %v5833_v35, %v5834_v48  ;;  %v5849_v22 = vrot.slane %v11091_v24, 1 }
 0x328   : > { %v7802_v34 = vpop.f32.mrb[208].mxu0 }
 0x329   : > { %v7803_v9 = vpop.f32.mrb[209].mxu0  ;;  %8379 = vmatmul.mubr.bf16.vlgmr.msra.gmra.mrb[96].mxu1 %v10936_v2 }
 0x32a   : > { %v11194_v42 = vadd.f32 %v7803_v9, %v7802_v34  ;;  %v7805_v18 = vpop.f32.mrb[210].mxu0  ;;  %8382 = vmatprep.mubr.bf16.mxu1 %v5829_v27 }
 0x32b   : > { %v7806_v38 = vpop.f32.mrb[211].mxu0 }
 0x32c   : > { %v11198_v49 = vadd.f32 %v7806_v38, %v7805_v18  ;;  %v5840_v18 = vrot.slane %v11039_v46, 1  ;;  %v5838_v38 = vsel %vm521_vm1, %v5836_v61, %v5837_v60 }
 0x32e   : > { %v5841_v35 = vsel %vm521_vm1, %v5839_v20, %v5840_v18 }
 0x330   : > { %v7808_v0 = vpop.f32.mrb[212].mxu0 }
 0x331   : > { %v7809_v6 = vpop.f32.mrb[213].mxu0  ;;  %8383 = vmatmul.mubr.bf16.gmra.mrb[100].mxu1 %v5832_v30 }
 0x332   : > { %v11205_v34 = vadd.f32 %v7809_v6, %v7808_v0  ;;  %v7811_v2 = vpop.f32.mrb[214].mxu0  ;;  %8386 = vmatprep.mubr.bf16.mxu1 %v5835_v14  ;;  %v5846_v6 = vrot.slane %v11073_v21, 1 }
 0x333   : > { %v7812_v11 = vpop.f32.mrb[215].mxu0 }
 0x334   : > { %v11208_v9 = vadd.f32 %v7812_v11, %v7811_v2  ;;  %v5844_v2 = vsel %vm521_vm1, %v5842_v57, %v5843_v59  ;;  %v5847_v61 = vsel %vm521_vm1, %v5845_v31, %v5846_v6  ;;  %v5855_v31 = vrot.slane %v11118_v15, 1 }
 0x338   : > { %v7814_v41 = vpop.f32.mrb[216].mxu0 }
 0x339   : > { %v7815_v27 = vpop.f32.mrb[217].mxu0  ;;  %8387 = vmatmul.mubr.bf16.gmra.mrb[104].mxu1 %v5838_v38 }
 0x33a   : > { %v11215_v45 = vadd.f32 %v7815_v27, %v7814_v41  ;;  %v7817_v40 = vpop.f32.mrb[218].mxu0  ;;  %8390 = vmatprep.mubr.bf16.mxu1 %v5841_v35  ;;  %v5852_v41 = vrot.slane %v11104_v54, 1  ;;  %v5850_v27 = vsel %vm521_vm1, %v5848_v62, %v5849_v22  ;;  %v5857_v54 = vrot.slane %v11124_v32, 1 }
 0x33b   : > { %v7818_v0 = vpop.f32.mrb[219].mxu0  ;;  %v5860_v32 = vrot.slane %v11137_v50, 1  ;;  %v5867_v50 = vrot.slane %v11169_v36, 1 }
 0x33c   : > { %v11218_v48 = vadd.f32 %v7818_v0, %v7817_v40  ;;  %v5853_v35 = vsel %vm521_vm1, %v5851_v52, %v5852_v41  ;;  %v5864_v52 = vrot.slane %v11157_v5, 1 }
 0x340   : > { %v7820_v46 = vpop.f32.mrb[220].mxu0 }
 0x341   : > { %v7821_v30 = vpop.f32.mrb[221].mxu0  ;;  %8391 = vmatmul.mubr.bf16.gmra.mrb[108].mxu1 %v5844_v2 }
 0x342   : > { %v11225_v14 = vadd.f32 %v7821_v30, %v7820_v46  ;;  %v7823_v11 = vpop.f32.mrb[222].mxu0  ;;  %8394 = vmatprep.mubr.bf16.mxu1 %v5847_v61  ;;  %v5858_v46 = vrot.slane %v11131_v25, 1  ;;  %v5856_v30 = vsel %vm521_vm1, %v5854_v19, %v5855_v31  ;;  %v5863_v25 = vrot.slane %v11150_v29, 1 }
 0x343   : > { %v7824_v20 = vpop.f32.mrb[223].mxu0 }
 0x344   : > { %v11228_v60 = vadd.f32 %v7824_v20, %v7823_v11  ;;  %v5861_v20 = vrot.slane %v11144_v10, 1 }
 0x348   : > { %v7866_v21 = vpop.f32.mrb[224].mxu0 }
 0x349   : > { %v7867_v18 = vpop.f32.mrb[225].mxu0  ;;  %8395 = vmatmul.mubr.bf16.gmra.mrb[112].mxu1 %v5850_v27 }
 0x34a   : > { %v7868_v38 = vadd.f32 %v7867_v18, %v7866_v21  ;;  %v7869_v40 = vpop.f32.mrb[226].mxu0  ;;  %8398 = vmatprep.mubr.bf16.mxu1 %v5853_v35  ;;  %v5862_v21 = vsel %vm521_vm1, %v5860_v32, %v5861_v20 }
 0x34b   : > { %v7870_v0 = vpop.f32.mrb[227].mxu0 }
 0x34c   : > { %v11237_v57 = vadd.f32 %v7868_v38, %v11032_v53  ;;  %v7871_v23 = vadd.f32 %v7870_v0, %v7869_v40  ;;  %v5859_v53 = vsel %vm521_vm1, %v5857_v54, %v5858_v46 }
 0x34e   : > { %v11241_v24 = vadd.f32 %v7871_v23, %v11037_v28 }
 0x350   : > { %v7872_v59 = vpop.f32.mrb[228].mxu0 }
 0x351   : > { %v7873_v6 = vpop.f32.mrb[229].mxu0  ;;  %8399 = vmatmul.mubr.bf16.gmra.mrb[116].mxu1 %v5856_v30 }
 0x352   : > { %v7874_v2 = vadd.f32 %v7873_v6, %v7872_v59  ;;  %v7875_v11 = vpop.f32.mrb[230].mxu0  ;;  %8402 = vmatprep.mubr.bf16.mxu1 %v5859_v53 }
 0x353   : > { %v7876_v61 = vpop.f32.mrb[231].mxu0 }
 0x354   : > { %v11249_v28 = vadd.f32 %v7874_v2, %v11051_v39  ;;  %v7877_v7 = vadd.f32 %v7876_v61, %v7875_v11  ;;  %v5865_v39 = vsel %vm521_vm1, %v5863_v25, %v5864_v52 }
 0x356   : > { %v11253_v15 = vadd.f32 %v7877_v7, %v11057_v26  ;;  %v5866_v26 = vrot.slane %v11159_v37, 1 }
 0x358   : > { %v7878_v62 = vpop.f32.mrb[232].mxu0  ;;  %v5868_v38 = vsel %vm521_vm1, %v5866_v26, %v5867_v50 }
 0x359   : > { %v7879_v22 = vpop.f32.mrb[233].mxu0  ;;  %8403 = vmatmul.mubr.bf16.gmra.mrb[120].mxu1 %v5862_v21 }
 0x35a   : > { %v7880_v41 = vadd.f32 %v7879_v22, %v7878_v62  ;;  %v7881_v18 = vpop.f32.mrb[234].mxu0  ;;  %8406 = vmatprep.mubr.bf16.mxu1 %v5865_v39 }
 0x35b   : > { %v7882_v27 = vpop.f32.mrb[235].mxu0 }
 0x35c   : > { %v11263_v29 = vadd.f32 %v7880_v41, %v11071_v8  ;;  %v7883_v10 = vadd.f32 %v7882_v27, %v7881_v18 }
 0x35e   : > { %v11266_v5 = vadd.f32 %v7883_v10, %v11076_v51 }
 0x360   : > { %v7884_v40 = vpop.f32.mrb[236].mxu0 }
 0x361   : > { %v7885_v35 = vpop.f32.mrb[237].mxu0  ;;  %8407 = vmatmul.mubr.bf16.gmra.mrb[124].mxu1 %v5868_v38 }
 0x362   : > { %v7886_v0 = vadd.f32 %v7885_v35, %v7884_v40  ;;  %v7887_v23 = vpop.f32.mrb[238].mxu0 }
 0x363   : > { %v7888_v19 = vpop.f32.mrb[239].mxu0 }
 0x364   : > { %v11270_v54 = vadd.f32 %v7886_v0, %v11089_v43  ;;  %v7889_v37 = vadd.f32 %v7888_v19, %v7887_v23  ;;  %v11660_v19 = vld [vmem:[#allocation11_spill] sm:$0xff] }
 0x366   : > { %v11273_v36 = vadd.f32 %v7889_v37, %v11093_v47 }
 0x368   : > { %v7890_v8 = vpop.f32.mrb[240].mxu0 }
 0x369   : > { %v7891_v31 = vpop.f32.mrb[241].mxu0 }
 0x36a   : > { %v7892_v59 = vadd.f32 %v7891_v31, %v7890_v8  ;;  %v7893_v51 = vpop.f32.mrb[242].mxu0 }
 0x36b   : > { %v7894_v46 = vpop.f32.mrb[243].mxu0 }
 0x36c   : > { %v11276_v6 = vadd.f32 %v7892_v59, %v11106_v17  ;;  %v7895_v30 = vadd.f32 %v7894_v46, %v7893_v51 }
 0x36e   : > { %v11279_v2 = vadd.f32 %v7895_v30, %v11112_v3 }
 0x370   : > { %v7896_v11 = vpop.f32.mrb[244].mxu0 }
 0x371   : > { %v7897_v53 = vpop.f32.mrb[245].mxu0 }
 0x372   : > { %v7898_v43 = vadd.f32 %v7897_v53, %v7896_v11  ;;  %v7899_v61 = vpop.f32.mrb[246].mxu0 }
 0x373   : > { %v7900_v7 = vpop.f32.mrb[247].mxu0 }
 0x374   : > { %v11282_v47 = vadd.f32 %v7898_v43, %v11120_v12  ;;  %v7901_v32 = vadd.f32 %v7900_v7, %v7899_v61 }
 0x376   : > { %v11285_v25 = vadd.f32 %v7901_v32, %v11126_v58 }
 0x378   : > { %v7902_v20 = vpop.f32.mrb[248].mxu0 }
 0x379   : > { %v7903_v62 = vpop.f32.mrb[249].mxu0 }
 0x37a   : > { %v7904_v17 = vadd.f32 %v7903_v62, %v7902_v20  ;;  %v7905_v52 = vpop.f32.mrb[250].mxu0  ;;  %v11661_v20 = vld [vmem:[#allocation10_spill] sm:$0xff] }
 0x37b   : > { %v7906_v22 = vpop.f32.mrb[251].mxu0 }
 0x37c   : > { %v11288_v3 = vadd.f32 %v7904_v17, %v11133_v55  ;;  %v7907_v21 = vadd.f32 %v7906_v22, %v7905_v52  ;;  %v8002_v41 = vpop.f32.mrb[128].mxu1  ;;  %v11662_v52 = vld [vmem:[#allocation7_spill] sm:$0xff] }
 0x37d   : > { %v8003_v39 = vpop.f32.mrb[129].mxu1 }
 0x37e   : > { %v11291_v18 = vadd.f32 %v7907_v21, %v11139_v63  ;;  %v8004_v12 = vadd.f32 %v8003_v39, %v8002_v41  ;;  %v8005_v27 = vpop.f32.mrb[130].mxu1 }
 0x37f   : > { %v8006_v50 = vpop.f32.mrb[131].mxu1 }
 0x380   : > { %v7908_v26 = vpop.f32.mrb[252].mxu0  ;;  %v8007_v10 = vadd.f32 %v8006_v50, %v8005_v27  ;;  %v11300_v46 = vadd.f32 %v11237_v57, %v8004_v12 }
 0x381   : > { %v7909_v58 = vpop.f32.mrb[253].mxu0 }
 0x382   : > { %v7910_v38 = vadd.f32 %v7909_v58, %v7908_v26  ;;  %v7911_v40 = vpop.f32.mrb[254].mxu0  ;;  %v11306_v61 = vadd.f32 %v11241_v24, %v8007_v10 }
 0x383   : > { %v7912_v35 = vpop.f32.mrb[255].mxu0 }
 0x384   : > { %v11294_v0 = vadd.f32 %v7910_v38, %v11146_v44  ;;  %v7913_v55 = vadd.f32 %v7912_v35, %v7911_v40  ;;  %v8008_v23 = vpop.f32.mrb[132].mxu1 }
 0x385   : > { %v8009_v63 = vpop.f32.mrb[133].mxu1 }
 0x386   : > { %v11297_v37 = vadd.f32 %v7913_v55, %v11660_v19  ;;  %v8010_v8 = vadd.f32 %v8009_v63, %v8008_v23  ;;  %v8011_v31 = vpop.f32.mrb[134].mxu1 }
 0x387   : > { %v8012_v51 = vpop.f32.mrb[135].mxu1 }
 0x388   : > { %v7914_v59 = vpop.f32.mrb[0].mxu0  ;;  %v8013_v11 = vadd.f32 %v8012_v51, %v8011_v31  ;;  %v11303_v53 = vadd.f32 %v11249_v28, %v8010_v8 }
 0x389   : > { %v7915_v30 = vpop.f32.mrb[1].mxu0 }
 0x38a   : > { %v7916_v44 = vadd.f32 %v7915_v30, %v7914_v59  ;;  %v7917_v43 = vpop.f32.mrb[2].mxu0  ;;  %v11309_v32 = vadd.f32 %v11253_v15, %v8013_v11 }
 0x38b   : > { %v7918_v7 = vpop.f32.mrb[3].mxu0 }
 0x38c   : > { %v11312_v62 = vadd.f32 %v7916_v44, %v11661_v20  ;;  %v7919_v17 = vadd.f32 %v7918_v7, %v7917_v43  ;;  %v8014_v57 = vpop.f32.mrb[136].mxu1 }
 0x38d   : > { %v8015_v21 = vpop.f32.mrb[137].mxu1 }
 0x38e   : > { %v11315_v22 = vadd.f32 %v7919_v17, %v11662_v52  ;;  %v8016_v28 = vadd.f32 %v8015_v21, %v8014_v57  ;;  %v8017_v41 = vpop.f32.mrb[138].mxu1 }
 0x38f   : > { %v8018_v12 = vpop.f32.mrb[139].mxu1 }
 0x390   : > { %v7920_v39 = vpop.f32.mrb[4].mxu0  ;;  %v8019_v24 = vadd.f32 %v8018_v12, %v8017_v41  ;;  %v11318_v26 = vadd.f32 %v11263_v29, %v8016_v28 }
 0x391   : > { %v7921_v27 = vpop.f32.mrb[5].mxu0 }
 0x392   : > { %v7922_v15 = vadd.f32 %v7921_v27, %v7920_v39  ;;  %v7923_v50 = vpop.f32.mrb[6].mxu0  ;;  %v11321_v10 = vadd.f32 %v11266_v5, %v8019_v24 }
 0x393   : > { %v7924_v58 = vpop.f32.mrb[7].mxu0 }
 0x394   : > { %v11324_v38 = vadd.f32 %v7922_v15, %v11174_v56  ;;  %v7925_v40 = vadd.f32 %v7924_v58, %v7923_v50  ;;  %v8020_v35 = vpop.f32.mrb[140].mxu1 }
 0x395   : > { %v8021_v23 = vpop.f32.mrb[141].mxu1 }
 0x396   : > { %v11327_v55 = vadd.f32 %v7925_v40, %v11178_v1  ;;  %v8022_v19 = vadd.f32 %v8021_v23, %v8020_v35  ;;  %v8023_v63 = vpop.f32.mrb[142].mxu1 }
 0x397   : > { %v8024_v29 = vpop.f32.mrb[143].mxu1 }
 0x398   : > { %v7926_v8 = vpop.f32.mrb[8].mxu0  ;;  %v8025_v59 = vadd.f32 %v8024_v29, %v8023_v63  ;;  %v11330_v51 = vadd.f32 %v11270_v54, %v8022_v19 }
 0x399   : > { %v7927_v31 = vpop.f32.mrb[9].mxu0 }
 0x39a   : > { %v7928_v5 = vadd.f32 %v7927_v31, %v7926_v8  ;;  %v7929_v30 = vpop.f32.mrb[10].mxu0  ;;  %v11333_v56 = vadd.f32 %v11273_v36, %v8025_v59 }
 0x39b   : > { %v7930_v11 = vpop.f32.mrb[11].mxu0 }
 0x39c   : > { %v11336_v44 = vadd.f32 %v7928_v5, %v11181_v16  ;;  %v7931_v1 = vadd.f32 %v7930_v11, %v7929_v30  ;;  %v8026_v43 = vpop.f32.mrb[144].mxu1 }
 0x39d   : > { %v8027_v20 = vpop.f32.mrb[145].mxu1 }
 0x39e   : > { %v11339_v7 = vadd.f32 %v7931_v1, %v11184_v13  ;;  %v8028_v17 = vadd.f32 %v8027_v20, %v8026_v43  ;;  %v8029_v57 = vpop.f32.mrb[146].mxu1 }
 0x39f   : > { %v8030_v54 = vpop.f32.mrb[147].mxu1 }
 0x3a0   : > { %v7932_v52 = vpop.f32.mrb[12].mxu0  ;;  %v8031_v28 = vadd.f32 %v8030_v54, %v8029_v57  ;;  %v11342_v41 = vadd.f32 %v11276_v6, %v8028_v17 }
 0x3a1   : > { %v7933_v21 = vpop.f32.mrb[13].mxu0 }
 0x3a2   : > { %v7934_v36 = vadd.f32 %v7933_v21, %v7932_v52  ;;  %v7935_v39 = vpop.f32.mrb[14].mxu0  ;;  %v11345_v16 = vadd.f32 %v11279_v2, %v8031_v28 }
 0x3a3   : > { %v7936_v12 = vpop.f32.mrb[15].mxu0 }
 0x3a4   : > { %v11348_v27 = vadd.f32 %v7934_v36, %v11186_v33  ;;  %v7937_v13 = vadd.f32 %v7936_v12, %v7935_v39  ;;  %v8032_v24 = vpop.f32.mrb[148].mxu1 }
 0x3a5   : > { %v8033_v50 = vpop.f32.mrb[149].mxu1 }
 0x3a6   : > { %v11351_v15 = vadd.f32 %v7937_v13, %v11190_v4  ;;  %v8034_v58 = vadd.f32 %v8033_v50, %v8032_v24  ;;  %v8035_v40 = vpop.f32.mrb[150].mxu1 }
 0x3a7   : > { %v8036_v6 = vpop.f32.mrb[151].mxu1 }
 0x3a8   : > { %v7938_v35 = vpop.f32.mrb[16].mxu0  ;;  %v8037_v19 = vadd.f32 %v8036_v6, %v8035_v40  ;;  %v11354_v63 = vadd.f32 %v11282_v47, %v8034_v58 }
 0x3a9   : > { %v7939_v23 = vpop.f32.mrb[17].mxu0 }
 0x3aa   : > { %v7940_v2 = vadd.f32 %v7939_v23, %v7938_v35  ;;  %v7941_v8 = vpop.f32.mrb[18].mxu0  ;;  %v11357_v33 = vadd.f32 %v11285_v25, %v8037_v19 }
 0x3ab   : > { %v7942_v29 = vpop.f32.mrb[19].mxu0 }
 0x3ac   : > { %v11360_v31 = vadd.f32 %v7940_v2, %v11194_v42  ;;  %v7943_v4 = vadd.f32 %v7942_v29, %v7941_v8  ;;  %v8038_v59 = vpop.f32.mrb[152].mxu1 }
 0x3ad   : > { %v8039_v30 = vpop.f32.mrb[153].mxu1 }
 0x3ae   : > { %v11363_v5 = vadd.f32 %v7943_v4, %v11198_v49  ;;  %v8040_v11 = vadd.f32 %v8039_v30, %v8038_v59  ;;  %v8041_v1 = vpop.f32.mrb[154].mxu1 }
 0x3af   : > { %v8042_v47 = vpop.f32.mrb[155].mxu1 }
 0x3b0   : > { %v7944_v43 = vpop.f32.mrb[20].mxu0  ;;  %v8043_v17 = vadd.f32 %v8042_v47, %v8041_v1  ;;  %v11366_v57 = vadd.f32 %v11288_v3, %v8040_v11 }
 0x3b1   : > { %v7945_v20 = vpop.f32.mrb[21].mxu0 }
 0x3b2   : > { %v7946_v25 = vadd.f32 %v7945_v20, %v7944_v43  ;;  %v7947_v52 = vpop.f32.mrb[22].mxu0  ;;  %v11369_v42 = vadd.f32 %v11291_v18, %v8043_v17 }
 0x3b3   : > { %v7948_v54 = vpop.f32.mrb[23].mxu0 }
 0x3b4   : > { %v11372_v21 = vadd.f32 %v7946_v25, %v11205_v34  ;;  %v7949_v49 = vadd.f32 %v7948_v54, %v7947_v52  ;;  %v8044_v28 = vpop.f32.mrb[156].mxu1 }
 0x3b5   : > { %v8045_v39 = vpop.f32.mrb[157].mxu1 }
 0x3b6   : > { %v11375_v36 = vadd.f32 %v7949_v49, %v11208_v9  ;;  %v8046_v12 = vadd.f32 %v8045_v39, %v8044_v28  ;;  %v8047_v13 = vpop.f32.mrb[158].mxu1 }
 0x3b7   : > { %v8048_v3 = vpop.f32.mrb[159].mxu1 }
 0x3b8   : > { %v7950_v24 = vpop.f32.mrb[24].mxu0  ;;  %v8049_v58 = vadd.f32 %v8048_v3, %v8047_v13  ;;  %v11378_v40 = vadd.f32 %v11294_v0, %v8046_v12 }
 0x3b9   : > { %v7951_v50 = vpop.f32.mrb[25].mxu0 }
 0x3ba   : > { %v7952_v18 = vadd.f32 %v7951_v50, %v7950_v24  ;;  %v7953_v35 = vpop.f32.mrb[26].mxu0  ;;  %v11381_v34 = vadd.f32 %v11297_v37, %v8049_v58 }
 0x3bb   : > { %v7954_v6 = vpop.f32.mrb[27].mxu0 }
 0x3bc   : > { %v11384_v23 = vadd.f32 %v7952_v18, %v11215_v45  ;;  %v7955_v9 = vadd.f32 %v7954_v6, %v7953_v35  ;;  %v8050_v19 = vpop.f32.mrb[160].mxu1 }
 0x3bd   : > { %v8051_v8 = vpop.f32.mrb[161].mxu1 }
 0x3be   : > { %v11387_v2 = vadd.f32 %v7955_v9, %v11218_v48  ;;  %v8052_v29 = vadd.f32 %v8051_v8, %v8050_v19  ;;  %v8053_v4 = vpop.f32.mrb[162].mxu1 }
 0x3bf   : > { %v8054_v0 = vpop.f32.mrb[163].mxu1 }
 0x3c0   : > { %v7956_v59 = vpop.f32.mrb[28].mxu0  ;;  %v8055_v11 = vadd.f32 %v8054_v0, %v8053_v4  ;;  %v11390_v1 = vadd.f32 %v11312_v62, %v8052_v29 }
 0x3c1   : > { %v7957_v30 = vpop.f32.mrb[29].mxu0 }
 0x3c2   : > { %v7958_v37 = vadd.f32 %v7957_v30, %v7956_v59  ;;  %v7959_v43 = vpop.f32.mrb[30].mxu0  ;;  %v11393_v45 = vadd.f32 %v11315_v22, %v8055_v11 }
 0x3c3   : > { %v7960_v47 = vpop.f32.mrb[31].mxu0 }
 0x3c4   : > { %v8622_v20 = vadd.f32 %v7958_v37, %v11225_v14  ;;  %v7961_v48 = vadd.f32 %v7960_v47, %v7959_v43  ;;  %v8056_v17 = vpop.f32.mrb[164].mxu1 }
 0x3c5   : > { %v8057_v52 = vpop.f32.mrb[165].mxu1 }
 0x3c6   : > { %v8628_v25 = vadd.f32 %v7961_v48, %v11228_v60  ;;  %v8058_v54 = vadd.f32 %v8057_v52, %v8056_v17  ;;  %v8059_v49 = vpop.f32.mrb[166].mxu1 }
 0x3c7   : > { %v8060_v28 = vpop.f32.mrb[167].mxu1 }
 0x3c8   : > { %v8061_v39 = vadd.f32 %v8060_v28, %v8059_v49  ;;  %v11398_v62 = vadd.f32 %v11324_v38, %v8058_v54 }
 0x3ca   : > { %v11401_v12 = vadd.f32 %v11327_v55, %v8061_v39 }
 0x3cc   : > { %v8062_v13 = vpop.f32.mrb[168].mxu1 }
 0x3cd   : > { %v8063_v22 = vpop.f32.mrb[169].mxu1 }
 0x3ce   : > { %v8064_v24 = vadd.f32 %v8063_v22, %v8062_v13  ;;  %v8065_v3 = vpop.f32.mrb[170].mxu1 }
 0x3cf   : > { %v8066_v14 = vpop.f32.mrb[171].mxu1 }
 0x3d0   : > { %v8067_v50 = vadd.f32 %v8066_v14, %v8065_v3  ;;  %v11404_v58 = vadd.f32 %v11336_v44, %v8064_v24 }
 0x3d2   : > { %v11407_v60 = vadd.f32 %v11339_v7, %v8067_v50 }
 0x3d4   : > { %v8068_v18 = vpop.f32.mrb[172].mxu1 }
 0x3d5   : > { %v8069_v35 = vpop.f32.mrb[173].mxu1 }
 0x3d6   : > { %v8070_v6 = vadd.f32 %v8069_v35, %v8068_v18  ;;  %v8071_v38 = vpop.f32.mrb[174].mxu1  ;;  %v11663_v18 = vld [vmem:[#allocation3_spill] sm:$0xff] }
 0x3d7   : > { %v8072_v9 = vpop.f32.mrb[175].mxu1 }
 0x3d8   : > { %v8073_v19 = vadd.f32 %v8072_v9, %v8071_v38  ;;  %v11410_v55 = vadd.f32 %v11348_v27, %v8070_v6  ;;  %v6502_v38 = vsub.s32 3, %v11663_v18 }
 0x3da   : > { %v11413_v8 = vadd.f32 %v11351_v15, %v8073_v19 }
 0x3dc   : > { %v8074_v29 = vpop.f32.mrb[176].mxu1 }
 0x3dd   : > { %v8075_v4 = vpop.f32.mrb[177].mxu1 }
 0x3de   : > { %v8076_v59 = vadd.f32 %v8075_v4, %v8074_v29  ;;  %v8077_v44 = vpop.f32.mrb[178].mxu1 }
 0x3df   : > { %v8078_v0 = vpop.f32.mrb[179].mxu1 }
 0x3e0   : > { %v8079_v30 = vadd.f32 %v8078_v0, %v8077_v44  ;;  %v11416_v7 = vadd.f32 %v11360_v31, %v8076_v59 }
 0x3e2   : > { %v11419_v11 = vadd.f32 %v11363_v5, %v8079_v30 }
 0x3e4   : > { %v8080_v37 = vpop.f32.mrb[180].mxu1 }
 0x3e5   : > { %v8081_v43 = vpop.f32.mrb[181].mxu1 }
 0x3e6   : > { %v8082_v47 = vadd.f32 %v8081_v43, %v8080_v37  ;;  %v8083_v27 = vpop.f32.mrb[182].mxu1  ;;  %v7273_v37 = vld [vmem:[%s9123_s6 + $0x31] sm:$0xff] }
 0x3e7   : > { %v8084_v48 = vpop.f32.mrb[183].mxu1 }
 0x3e8   : > { %v8085_v17 = vadd.f32 %v8084_v48, %v8083_v27  ;;  %v11422_v15 = vadd.f32 %v11372_v21, %v8082_v47  ;;  %v7271_v27 = vld [vmem:[%s9123_s6 + $0x19] sm:$0xff] }
 0x3ea   : > { %v11425_v52 = vadd.f32 %v11375_v36, %v8085_v17  ;;  %v6466_v36 = vsub.s32 2, %v11663_v18  ;;  %v7274_v17 = vld [vmem:[%s9123_s6 + $0x39] sm:$0xff] }
 0x3ec   : > { %v8086_v54 = vpop.f32.mrb[184].mxu1 }
 0x3ed   : > { %v8087_v49 = vpop.f32.mrb[185].mxu1 }
 0x3ee   : > { %v8088_v28 = vadd.f32 %v8087_v49, %v8086_v54  ;;  %v8089_v31 = vpop.f32.mrb[186].mxu1 }
 0x3ef   : > { %v8090_v39 = vpop.f32.mrb[187].mxu1 }
 0x3f0   : > { %v8091_v13 = vadd.f32 %v8090_v39, %v8089_v31  ;;  %v11428_v5 = vadd.f32 %v11384_v23, %v8088_v28  ;;  %v8980_v23 = vld [vmem:[%s11618_s3] sm:$0xff] }
 0x3f1   : > { %v11445_v4 = vrot.slane %v8980_v23, %v6502_v38  ;;  %v7272_v28 = vld [vmem:[%s9123_s6 + $0x21] sm:$0xff] }
 0x3f2   : > { %v11431_v22 = vadd.f32 %v11387_v2, %v8091_v13  ;;  %v11442_v2 = vrot.slane %v8980_v23, %v6466_v36 }
 0x3f4   : > { %v8092_v24 = vpop.f32.mrb[188].mxu1 }
 0x3f5   : > { %v8093_v3 = vpop.f32.mrb[189].mxu1 }
 0x3f6   : > { %v8094_v14 = vadd.f32 %v8093_v3, %v8092_v24  ;;  %v8095_v21 = vpop.f32.mrb[190].mxu1 }
 0x3f7   : > { %v8096_v50 = vpop.f32.mrb[191].mxu1 }
 0x3f8   : > { %v8097_v35 = vadd.f32 %v8096_v50, %v8095_v21  ;;  %v11434_v6 = vadd.f32 %v8622_v20, %v8094_v14 }
 0x3fa   : > { %v11437_v9 = vadd.f32 %v8628_v25, %v8097_v35 }
 0x3fc   : > { %v8380_v19 = vpop.f32.mrb[96].mxu1 }
 0x3fd   : > { %v8540_v29 = vadd.f32 %v11303_v53, %v8380_v19  ;;  %v6273_v20 = vpop.f32.mrb[97].mxu1 }
 0x3fe   : > { %v8543_v59 = vadd.f32 %v11300_v46, %v6273_v20  ;;  %v8381_v44 = vpop.f32.mrb[98].mxu1 }
 0x3ff   : > { %v6470_v25 = vmul.f32 %v8540_v29, %v11442_v2  ;;  %v8546_v0 = vadd.f32 %v11309_v32, %v8381_v44  ;;  %v6276_v30 = vpop.f32.mrb[99].mxu1  ;;  %v7277_v29 = vld [vmem:[%s9123_s6 + $0x61] sm:$0xff]  ;;  %v7275_v44 = vld [vmem:[%s9123_s6 + $0x49] sm:$0xff] }
 0x400   : > { %v6468_v43 = vmul.f32 %v8543_v59, %v11442_v2  ;;  %v8549_v47 = vadd.f32 %v11306_v61, %v6276_v30  ;;  %v7278_v30 = vld [vmem:[%s9123_s6 + $0x69] sm:$0xff] }
 0x401   : > { %v6506_v53 = vadd.f32 %v11445_v4, %v6470_v25  ;;  %v6471_v48 = vmul.f32 %v8546_v0, %v11442_v2 }
 0x402   : > { %v6504_v46 = vadd.f32 %v11445_v4, %v6468_v43  ;;  %v6469_v54 = vmul.f32 %v8549_v47, %v11442_v2  ;;  %v7276_v47 = vld [vmem:[%s9123_s6 + $0x51] sm:$0xff] }
 0x403   : > { %v6538_v49 = vadd.f32 %v7273_v37, %v6506_v53  ;;  %v6507_v32 = vadd.f32 %v11445_v4, %v6471_v48 }
 0x404   : > { %v6536_v61 = vadd.f32 %v7271_v27, %v6504_v46  ;;  %v6505_v31 = vadd.f32 %v11445_v4, %v6469_v54  ;;  %v8384_v39 = vpop.f32.mrb[100].mxu1 }
 0x405   : > { %v6570_v13 = vmax.f32 %v6538_v49, 0.0  ;;  %v6539_v24 = vadd.f32 %v7274_v17, %v6507_v32  ;;  %v8552_v3 = vadd.f32 %v11330_v51, %v8384_v39  ;;  %v6289_v14 = vpop.f32.mrb[101].mxu1 }
 0x406   : > { %v6568_v21 = vmax.f32 %v6536_v61, 0.0  ;;  %v6537_v50 = vadd.f32 %v7272_v28, %v6505_v31  ;;  %v8555_v18 = vadd.f32 %v11318_v26, %v6289_v14  ;;  %v8385_v36 = vpop.f32.mrb[102].mxu1 }
 0x407   : > { %6602 = vst [vmem:[%s11465_s12 + $0x10] sm:$0xff] %v6570_v13  ;;  %v6571_v35 = vmax.f32 %v6539_v24, 0.0  ;;  %v6474_v38 = vmul.f32 %v8552_v3, %v11442_v2  ;;  %v8558_v23 = vadd.f32 %v11333_v56, %v8385_v36  ;;  %v6292_v19 = vpop.f32.mrb[103].mxu1  ;;  %v7281_v3 = vld [vmem:[%s9123_s6 + $0x91] sm:$0xff] }
 0x408   : > { %6600 = vst [vmem:[%s11465_s12] sm:$0xff] %v6568_v21  ;;  %v6569_v51 = vmax.f32 %v6537_v50, 0.0  ;;  %v6472_v20 = vmul.f32 %v8555_v18, %v11442_v2  ;;  %v8561_v59 = vadd.f32 %v11321_v10, %v6292_v19  ;;  %v7279_v50 = vld [vmem:[%s9123_s6 + $0x79] sm:$0xff]  ;;  %v7280_v19 = vld [vmem:[%s9123_s6 + $0x81] sm:$0xff] }
 0x409   : > { %6603 = vst [vmem:[%s11465_s12 + $0x18] sm:$0xff] %v6571_v35  ;;  %v6510_v26 = vadd.f32 %v11445_v4, %v6474_v38  ;;  %v6475_v25 = vmul.f32 %v8558_v23, %v11442_v2  ;;  %v7282_v35 = vld [vmem:[%s9123_s6 + $0x99] sm:$0xff] }
 0x40a   : > { %6601 = vst [vmem:[%s11465_s12 + $0x8] sm:$0xff] %v6569_v51  ;;  %v6508_v0 = vadd.f32 %v11445_v4, %v6472_v20  ;;  %v6473_v56 = vmul.f32 %v8561_v59, %v11442_v2 }
 0x40b   : > { %v6542_v37 = vadd.f32 %v7277_v29, %v6510_v26  ;;  %v6511_v43 = vadd.f32 %v11445_v4, %v6475_v25 }
 0x40c   : > { %v6540_v53 = vadd.f32 %v7275_v44, %v6508_v0  ;;  %v6509_v10 = vadd.f32 %v11445_v4, %v6473_v56  ;;  %v8388_v27 = vpop.f32.mrb[104].mxu1 }
 0x40d   : > { %v6574_v48 = vmax.f32 %v6542_v37, 0.0  ;;  %v6543_v46 = vadd.f32 %v7278_v30, %v6511_v43  ;;  %v8564_v17 = vadd.f32 %v11354_v63, %v8388_v27  ;;  %v6305_v54 = vpop.f32.mrb[105].mxu1 }
 0x40e   : > { %v6572_v49 = vmax.f32 %v6540_v53, 0.0  ;;  %v6541_v32 = vadd.f32 %v7276_v47, %v6509_v10  ;;  %v8567_v28 = vadd.f32 %v11342_v41, %v6305_v54  ;;  %v8389_v61 = vpop.f32.mrb[106].mxu1  ;;  %v7285_v10 = vld [vmem:[%s9123_s6 + $0xc1] sm:$0xff] }
 0x40f   : > { %6606 = vst [vmem:[%s11465_s12 + $0x30] sm:$0xff] %v6574_v48  ;;  %v6575_v31 = vmax.f32 %v6543_v46, 0.0  ;;  %v6478_v39 = vmul.f32 %v8564_v17, %v11442_v2  ;;  %v8570_v13 = vadd.f32 %v11357_v33, %v8389_v61  ;;  %v6308_v24 = vpop.f32.mrb[107].mxu1  ;;  %v7283_v46 = vld [vmem:[%s9123_s6 + $0xa9] sm:$0xff]  ;;  %v7284_v61 = vld [vmem:[%s9123_s6 + $0xb1] sm:$0xff] }
 0x410   : > { %6604 = vst [vmem:[%s11465_s12 + $0x20] sm:$0xff] %v6572_v49  ;;  %v6573_v63 = vmax.f32 %v6541_v32, 0.0  ;;  %v6476_v14 = vmul.f32 %v8567_v28, %v11442_v2  ;;  %v8573_v21 = vadd.f32 %v11345_v16, %v6308_v24  ;;  %v7286_v49 = vld [vmem:[%s9123_s6 + $0xc9] sm:$0xff] }
 0x411   : > { %6607 = vst [vmem:[%s11465_s12 + $0x38] sm:$0xff] %v6575_v31  ;;  %v6514_v41 = vadd.f32 %v11445_v4, %v6478_v39  ;;  %v6479_v18 = vmul.f32 %v8570_v13, %v11442_v2 }
 0x412   : > { %6605 = vst [vmem:[%s11465_s12 + $0x28] sm:$0xff] %v6573_v63  ;;  %v6512_v36 = vadd.f32 %v11445_v4, %v6476_v14  ;;  %v6477_v33 = vmul.f32 %v8573_v21, %v11442_v2 }
 0x413   : > { %v6546_v38 = vadd.f32 %v7281_v3, %v6514_v41  ;;  %v6515_v23 = vadd.f32 %v11445_v4, %v6479_v18 }
 0x414   : > { %v6544_v51 = vadd.f32 %v7279_v50, %v6512_v36  ;;  %v6513_v16 = vadd.f32 %v11445_v4, %v6477_v33  ;;  %v8392_v29 = vpop.f32.mrb[108].mxu1 }
 0x415   : > { %v6578_v20 = vmax.f32 %v6546_v38, 0.0  ;;  %v6547_v59 = vadd.f32 %v7282_v35, %v6515_v23  ;;  %v8576_v26 = vadd.f32 %v11378_v40, %v8392_v29  ;;  %v6321_v44 = vpop.f32.mrb[109].mxu1  ;;  %v7289_v38 = vld [vmem:[%s9123_s6 + $0xf1] sm:$0xff] }
 0x416   : > { %v6576_v25 = vmax.f32 %v6544_v51, 0.0  ;;  %v6545_v0 = vadd.f32 %v7280_v19, %v6513_v16  ;;  %v8579_v30 = vadd.f32 %v11366_v57, %v6321_v44  ;;  %v8393_v56 = vpop.f32.mrb[110].mxu1  ;;  %v7287_v51 = vld [vmem:[%s9123_s6 + $0xd9] sm:$0xff]  ;;  %v7288_v44 = vld [vmem:[%s9123_s6 + $0xe1] sm:$0xff] }
 0x417   : > { %6610 = vst [vmem:[%s11465_s12 + $0x50] sm:$0xff] %v6578_v20  ;;  %v6579_v37 = vmax.f32 %v6547_v59, 0.0  ;;  %v6482_v43 = vmul.f32 %v8576_v26, %v11442_v2  ;;  %v8582_v47 = vadd.f32 %v11381_v34, %v8393_v56  ;;  %v6324_v53 = vpop.f32.mrb[111].mxu1  ;;  %v7290_v20 = vld [vmem:[%s9123_s6 + $0xf9] sm:$0xff] }
 0x418   : > { %6608 = vst [vmem:[%s11465_s12 + $0x40] sm:$0xff] %v6576_v25  ;;  %v6577_v40 = vmax.f32 %v6545_v0, 0.0  ;;  %v6480_v27 = vmul.f32 %v8579_v30, %v11442_v2  ;;  %v8585_v48 = vadd.f32 %v11369_v42, %v6324_v53 }
 0x419   : > { %6611 = vst [vmem:[%s11465_s12 + $0x58] sm:$0xff] %v6579_v37  ;;  %v6518_v57 = vadd.f32 %v11445_v4, %v6482_v43  ;;  %v6483_v17 = vmul.f32 %v8582_v47, %v11442_v2 }
 0x41a   : > { %6609 = vst [vmem:[%s11465_s12 + $0x48] sm:$0xff] %v6577_v40  ;;  %v6516_v54 = vadd.f32 %v11445_v4, %v6480_v27  ;;  %v6481_v34 = vmul.f32 %v8585_v48, %v11442_v2 }
 0x41b   : > { %v6550_v32 = vadd.f32 %v7285_v10, %v6518_v57  ;;  %v6519_v28 = vadd.f32 %v11445_v4, %v6483_v17  ;;  %v7293_v17 = vld [vmem:[%s9123_s6 + $0x121] sm:$0xff] }
 0x41c   : > { %v6548_v31 = vadd.f32 %v7283_v46, %v6516_v54  ;;  %v6517_v42 = vadd.f32 %v11445_v4, %v6481_v34  ;;  %v8396_v39 = vpop.f32.mrb[112].mxu1  ;;  %v7291_v34 = vld [vmem:[%s9123_s6 + $0x109] sm:$0xff] }
 0x41d   : > { %v6582_v13 = vmax.f32 %v6550_v32, 0.0  ;;  %v6551_v24 = vadd.f32 %v7286_v49, %v6519_v28  ;;  %v8588_v63 = vadd.f32 %v11398_v62, %v8396_v39  ;;  %v6337_v3 = vpop.f32.mrb[113].mxu1  ;;  %v7292_v39 = vld [vmem:[%s9123_s6 + $0x111] sm:$0xff] }
 0x41e   : > { %v6580_v14 = vmax.f32 %v6548_v31, 0.0  ;;  %v6549_v21 = vadd.f32 %v7284_v61, %v6517_v42  ;;  %v8591_v41 = vadd.f32 %v11390_v1, %v6337_v3  ;;  %v8397_v50 = vpop.f32.mrb[114].mxu1  ;;  %v7294_v61 = vld [vmem:[%s9123_s6 + $0x129] sm:$0xff] }
 0x41f   : > { %6614 = vst [vmem:[%s11465_s12 + $0x70] sm:$0xff] %v6582_v13  ;;  %v6583_v18 = vmax.f32 %v6551_v24, 0.0  ;;  %v6486_v36 = vmul.f32 %v8588_v63, %v11442_v2  ;;  %v8594_v35 = vadd.f32 %v11401_v12, %v8397_v50  ;;  %v6340_v33 = vpop.f32.mrb[115].mxu1 }
 0x420   : > { %6612 = vst [vmem:[%s11465_s12 + $0x60] sm:$0xff] %v6580_v14  ;;  %v6581_v62 = vmax.f32 %v6549_v21, 0.0  ;;  %v6484_v23 = vmul.f32 %v8591_v41, %v11442_v2  ;;  %v8597_v19 = vadd.f32 %v11393_v45, %v6340_v33 }
 0x421   : > { %6615 = vst [vmem:[%s11465_s12 + $0x78] sm:$0xff] %v6583_v18  ;;  %v6522_v1 = vadd.f32 %v11445_v4, %v6486_v36  ;;  %v6487_v16 = vmul.f32 %v8594_v35, %v11442_v2 }
 0x422   : > { %6613 = vst [vmem:[%s11465_s12 + $0x68] sm:$0xff] %v6581_v62  ;;  %v6520_v29 = vadd.f32 %v11445_v4, %v6484_v23  ;;  %v6485_v12 = vmul.f32 %v8597_v19, %v11442_v2  ;;  %v7297_v23 = vld [vmem:[%s9123_s6 + $0x151] sm:$0xff] }
 0x423   : > { %v6554_v59 = vadd.f32 %v7289_v38, %v6522_v1  ;;  %v6523_v26 = vadd.f32 %v11445_v4, %v6487_v16 }
 0x424   : > { %v6552_v25 = vadd.f32 %v7287_v51, %v6520_v29  ;;  %v6521_v45 = vadd.f32 %v11445_v4, %v6485_v12  ;;  %v8400_v0 = vpop.f32.mrb[116].mxu1  ;;  %v7295_v51 = vld [vmem:[%s9123_s6 + $0x139] sm:$0xff] }
 0x425   : > { %v6586_v30 = vmax.f32 %v6554_v59, 0.0  ;;  %v6555_v56 = vadd.f32 %v7290_v20, %v6523_v26  ;;  %v8600_v37 = vadd.f32 %v11410_v55, %v8400_v0  ;;  %v6353_v43 = vpop.f32.mrb[117].mxu1  ;;  %v7298_v20 = vld [vmem:[%s9123_s6 + $0x159] sm:$0xff]  ;;  %v7296_v26 = vld [vmem:[%s9123_s6 + $0x141] sm:$0xff] }
 0x426   : > { %v6584_v47 = vmax.f32 %v6552_v25, 0.0  ;;  %v6553_v53 = vadd.f32 %v7288_v44, %v6521_v45  ;;  %v8603_v40 = vadd.f32 %v11404_v58, %v6353_v43  ;;  %v8401_v10 = vpop.f32.mrb[118].mxu1 }
 0x427   : > { %6618 = vst [vmem:[%s11465_s12 + $0x90] sm:$0xff] %v6586_v30  ;;  %v6587_v27 = vmax.f32 %v6555_v56, 0.0  ;;  %v6490_v48 = vmul.f32 %v8600_v37, %v11442_v2  ;;  %v8606_v57 = vadd.f32 %v11413_v8, %v8401_v10  ;;  %v6356_v46 = vpop.f32.mrb[119].mxu1 }
 0x428   : > { %6616 = vst [vmem:[%s11465_s12 + $0x80] sm:$0xff] %v6584_v47  ;;  %v6585_v55 = vmax.f32 %v6553_v53, 0.0  ;;  %v6488_v54 = vmul.f32 %v8603_v40, %v11442_v2  ;;  %v8609_v49 = vadd.f32 %v11407_v60, %v6356_v46 }
 0x429   : > { %6619 = vst [vmem:[%s11465_s12 + $0x98] sm:$0xff] %v6587_v27  ;;  %v6526_v58 = vadd.f32 %v11445_v4, %v6490_v48  ;;  %v6491_v32 = vmul.f32 %v8606_v57, %v11442_v2  ;;  %v7301_v57 = vld [vmem:[%s9123_s6 + $0x181] sm:$0xff] }
 0x42a   : > { %6617 = vst [vmem:[%s11465_s12 + $0x88] sm:$0xff] %v6585_v55  ;;  %v6524_v28 = vadd.f32 %v11445_v4, %v6488_v54  ;;  %v6489_v8 = vmul.f32 %v8609_v49, %v11442_v2  ;;  %v7302_v49 = vld [vmem:[%s9123_s6 + $0x189] sm:$0xff] }
 0x42b   : > { %v6558_v31 = vadd.f32 %v7293_v17, %v6526_v58  ;;  %v6527_v42 = vadd.f32 %v11445_v4, %v6491_v32  ;;  %v7299_v17 = vld [vmem:[%s9123_s6 + $0x169] sm:$0xff] }
 0x42c   : > { %v6556_v13 = vadd.f32 %v7291_v34, %v6524_v28  ;;  %v6525_v60 = vadd.f32 %v11445_v4, %v6489_v8  ;;  %v8404_v24 = vpop.f32.mrb[120].mxu1 }
 0x42d   : > { %v6590_v63 = vmax.f32 %v6558_v31, 0.0  ;;  %v6559_v3 = vadd.f32 %v7294_v61, %v6527_v42  ;;  %v8612_v14 = vadd.f32 %v11422_v15, %v8404_v24  ;;  %v6369_v21 = vpop.f32.mrb[121].mxu1 }
 0x42e   : > { %v6588_v41 = vmax.f32 %v6556_v13, 0.0  ;;  %v6557_v50 = vadd.f32 %v7292_v39, %v6525_v60  ;;  %v8615_v18 = vadd.f32 %v11416_v7, %v6369_v21  ;;  %v8405_v36 = vpop.f32.mrb[122].mxu1 }
 0x42f   : > { %6622 = vst [vmem:[%s11465_s12 + $0xb0] sm:$0xff] %v6590_v63  ;;  %v6591_v35 = vmax.f32 %v6559_v3, 0.0  ;;  %v6494_v33 = vmul.f32 %v8612_v14, %v11442_v2  ;;  %v8618_v62 = vadd.f32 %v11425_v52, %v8405_v36  ;;  %v6372_v38 = vpop.f32.mrb[123].mxu1 }
 0x430   : > { %6620 = vst [vmem:[%s11465_s12 + $0xa0] sm:$0xff] %v6588_v41  ;;  %v6589_v15 = vmax.f32 %v6557_v50, 0.0  ;;  %v6492_v19 = vmul.f32 %v8615_v18, %v11442_v2  ;;  %v8621_v1 = vadd.f32 %v11419_v11, %v6372_v38 }
 0x431   : > { %6623 = vst [vmem:[%s11465_s12 + $0xb8] sm:$0xff] %v6591_v35  ;;  %v6530_v7 = vadd.f32 %v11445_v4, %v6494_v33  ;;  %v6495_v16 = vmul.f32 %v8618_v62, %v11442_v2 }
 0x432   : > { %6621 = vst [vmem:[%s11465_s12 + $0xa8] sm:$0xff] %v6589_v15  ;;  %v6528_v29 = vadd.f32 %v11445_v4, %v6492_v19  ;;  %v6493_v52 = vmul.f32 %v8621_v1, %v11442_v2 }
 0x433   : > { %v6562_v12 = vadd.f32 %v7297_v23, %v6530_v7  ;;  %v6531_v59 = vadd.f32 %v11445_v4, %v6495_v16 }
 0x434   : > { %v6560_v44 = vadd.f32 %v7295_v51, %v6528_v29  ;;  %v6529_v11 = vadd.f32 %v11445_v4, %v6493_v52  ;;  %v8408_v25 = vpop.f32.mrb[124].mxu1 }
 0x435   : > { %v6594_v45 = vmax.f32 %v6562_v12, 0.0  ;;  %v6563_v0 = vadd.f32 %v7298_v20, %v6531_v59  ;;  %v8624_v30 = vadd.f32 %v11434_v6, %v8408_v25  ;;  %v6385_v56 = vpop.f32.mrb[125].mxu1 }
 0x436   : > { %v6592_v37 = vmax.f32 %v6560_v44, 0.0  ;;  %v6561_v43 = vadd.f32 %v7296_v26, %v6529_v11  ;;  %v8627_v47 = vadd.f32 %v11428_v5, %v6385_v56  ;;  %v8409_v53 = vpop.f32.mrb[126].mxu1 }
 0x437   : > { %6626 = vst [vmem:[%s11465_s12 + $0xd0] sm:$0xff] %v6594_v45  ;;  %v6595_v40 = vmax.f32 %v6563_v0, 0.0  ;;  %v6498_v10 = vmul.f32 %v8624_v30, %v11442_v2  ;;  %v8630_v27 = vadd.f32 %v11437_v9, %v8409_v53  ;;  %v6388_v48 = vpop.f32.mrb[127].mxu1 }
 0x438   : > { %6624 = vst [vmem:[%s11465_s12 + $0xc0] sm:$0xff] %v6592_v37  ;;  %v6593_v6 = vmax.f32 %v6561_v43, 0.0  ;;  %v6496_v46 = vmul.f32 %v8627_v47, %v11442_v2  ;;  %v8633_v55 = vadd.f32 %v11431_v22, %v6388_v48  ;;  %v7300_v22 = vld [vmem:[%s9123_s6 + $0x171] sm:$0xff] }
 0x439   : > { %6627 = vst [vmem:[%s11465_s12 + $0xd8] sm:$0xff] %v6595_v40  ;;  %v6534_v5 = vadd.f32 %v11445_v4, %v6498_v10  ;;  %v6499_v54 = vmul.f32 %v8630_v27, %v11442_v2 }
 0x43a   : > { %6625 = vst [vmem:[%s11465_s12 + $0xc8] sm:$0xff] %v6593_v6  ;;  %v6532_v9 = vadd.f32 %v11445_v4, %v6496_v46  ;;  %v6497_v58 = vmul.f32 %v8633_v55, %v11442_v2 }
 0x43b   : > { %v6566_v34 = vadd.f32 %v7301_v57, %v6534_v5  ;;  %v6535_v32 = vadd.f32 %v11445_v4, %v6499_v54 }
 0x43c   : > { %v6564_v28 = vadd.f32 %v7299_v17, %v6532_v9  ;;  %v6533_v61 = vadd.f32 %v11445_v4, %v6497_v58 }
 0x43d   : > { %v6598_v8 = vmax.f32 %v6566_v34, 0.0  ;;  %v6567_v31 = vadd.f32 %v7302_v49, %v6535_v32 }
 0x43e   : > { %v6596_v42 = vmax.f32 %v6564_v28, 0.0  ;;  %v6565_v39 = vadd.f32 %v7300_v22, %v6533_v61 }
 0x43f   : > { %6630 = vst [vmem:[%s11465_s12 + $0xf0] sm:$0xff] %v6598_v8  ;;  %v6599_v13 = vmax.f32 %v6567_v31, 0.0 }
 0x440   : > { %6628 = vst [vmem:[%s11465_s12 + $0xe0] sm:$0xff] %v6596_v42  ;;  %v6597_v60 = vmax.f32 %v6565_v39, 0.0 }
 0x441   : > { %6631 = vst [vmem:[%s11465_s12 + $0xf8] sm:$0xff] %v6599_v13 }
 0x442   : > { %6629 = vst [vmem:[%s11465_s12 + $0xe8] sm:$0xff] %v6597_v60 }
 0x443 PF: > { %s14_s15 = sadd.s32 1, %s8987_s15  }
 0x444   : > { %p11_p4 = scmp.ge.s32.totalorder %s14_s15, 4  }
 0x446   :  { %13 = sbr.rel (!%p11_p4) target bundleno = 1 (0x1), region = 75 }

</bundles_post_ra>
